<compile_context>
chip_gen: v7x
topology: tpu7x:2x2x1
jax: 0.10.0
libtpu: 0.0.40
codegen_flags: <defaults>
</compile_context>

<pallas_src>
import jax
import jax.numpy as jnp
from jax.experimental import pallas as pl
from jax.experimental.pallas import tpu as pltpu


def _sigmoid(v):
    # EUP tanh instead of a VALU divide:  sigmoid(v) == 0.5*tanh(v/2) + 0.5
    return 0.5 * jnp.tanh(0.5 * v) + 0.5


def _make_kernel(C, H, W):
    H2, W2 = H // 2, W // 2      # after layer 2 (k=3, s=2, p=1, even H/W)
    H3, W3 = H2 // 2, W2 // 2    # after layer 3

    def kernel(x_ref, w1_ref, b1_ref, w2_ref, b2_ref, w3_ref, b3_ref,
               rs2_ref, cs2_ref, rs3_ref, cs3_ref, o_ref):
        x = x_ref[...]            # (C, H, W)   f32
        rs2 = rs2_ref[...]        # (3, H2, H)  row-select per dy (layer 2)
        cs2 = cs2_ref[...]        # (3, W, W2)  col-select per dx (layer 2)
        rs3 = rs3_ref[...]        # (3, H3, H2)
        cs3 = cs3_ref[...]        # (3, W2, W3)

        # ---- layer 1: 1x1 conv (pure channel mix) + sigmoid --------------
        # dilation=2 has no effect for a 1x1 kernel.
        xs = [x[ci] for ci in range(C)]                  # (H, W) planes
        a1 = []
        for co in range(C):
            acc = w1_ref[co * C + 0] * xs[0]
            for ci in range(1, C):
                acc = acc + w1_ref[co * C + ci] * xs[ci]
            a1.append(_sigmoid(acc + b1_ref[co]))

        # ---- 3x3, stride 2, pad 1 conv + sigmoid via selection matmuls ---
        # (R_dy @ A)[p, :]  == A[2p-1+dy, :]   (zero row when out of range)
        # (M @ C_dx)[:, q]  == M[:, 2q-1+dx]   (zero col when out of range)
        def conv3x3_s2(planes, w_ref, b_ref, rs, cs):
            B = [[jnp.dot(rs[dy], planes[ci],
                          preferred_element_type=jnp.float32)
                  for dy in range(3)] for ci in range(C)]
            out = []
            for co in range(C):
                acc = None
                for dx in range(3):
                    m = None
                    for ci in range(C):
                        for dy in range(3):
                            wv = w_ref[((co * C + ci) * 3 + dy) * 3 + dx]
                            t = wv * B[ci][dy]
                            m = t if m is None else m + t
                    s = jnp.dot(m, cs[dx], preferred_element_type=jnp.float32)
                    acc = s if acc is None else acc + s
                out.append(_sigmoid(acc + b_ref[co]))
            return out

        a2 = conv3x3_s2(a1, w2_ref, b2_ref, rs2, cs2)    # (H2, W2) planes
        a3 = conv3x3_s2(a2, w3_ref, b3_ref, rs3, cs3)    # (H3, W3) planes

        o_ref[...] = jnp.stack(a3, axis=0)               # (C, H3, W3)

    return kernel


def _row_select(h_out, h_in):
    # (3, h_out, h_in): mat[dy, p, j] = 1 iff j == 2p - 1 + dy (else 0)
    dy = jnp.arange(3)[:, None, None]
    p = jnp.arange(h_out)[None, :, None]
    j = jnp.arange(h_in)[None, None, :]
    return (j == 2 * p - 1 + dy).astype(jnp.float32)


def _col_select(w_in, w_out):
    # (3, w_in, w_out): mat[dx, j, q] = 1 iff j == 2q - 1 + dx (else 0)
    dx = jnp.arange(3)[:, None, None]
    j = jnp.arange(w_in)[None, :, None]
    q = jnp.arange(w_out)[None, None, :]
    return (j == 2 * q - 1 + dx).astype(jnp.float32)


def model_forward(x_nchw, params):
    """x_nchw: (1, 3, H, W) f32; params in PyTorch OIHW layout."""
    (w1, b1), (w2, b2), (w3, b3) = params
    N, C, H, W = x_nchw.shape
    assert N == 1 and C == 3
    assert H % 4 == 0 and W % 4 == 0

    H2, W2 = H // 2, W // 2
    H3, W3 = H2 // 2, W2 // 2

    kernel = _make_kernel(C, H, W)
    vmem = pl.BlockSpec(memory_space=pltpu.MemorySpace.VMEM)
    smem = pl.BlockSpec(memory_space=pltpu.MemorySpace.SMEM)

    out = pl.pallas_call(
        kernel,
        out_shape=jax.ShapeDtypeStruct((C, H3, W3), jnp.float32),
        in_specs=[vmem,                                   # x  (C,H,W)
                  smem, smem,                             # w1 (9,),  b1 (3,)
                  smem, smem,                             # w2 (81,), b2 (3,)
                  smem, smem,                             # w3 (81,), b3 (3,)
                  vmem, vmem, vmem, vmem],                # selection matrices
        out_specs=vmem,
    )(
        x_nchw[0].astype(jnp.float32),
        w1.reshape(-1).astype(jnp.float32), b1.astype(jnp.float32),
        w2.reshape(-1).astype(jnp.float32), b2.astype(jnp.float32),
        w3.reshape(-1).astype(jnp.float32), b3.astype(jnp.float32),
        _row_select(H2, H), _col_select(W, W2),
        _row_select(H3, H2), _col_select(W2, W3),
    )
    return out[None]                                      # (1, C, H3, W3)


# ----------------------------------------------------------------------------
# Pure-JAX reference (lax conv) for correctness checking
# ----------------------------------------------------------------------------
def _ref_forward(x_nchw, params):
    (w1, b1), (w2, b2), (w3, b3) = params
    dn = ("NCHW", "OIHW", "NCHW")

    def conv(x, w, b, stride, pad, dil):
        y = jax.lax.conv_general_dilated(
            x, w, window_strides=(stride, stride),
            padding=((pad, pad), (pad, pad)),
            rhs_dilation=(dil, dil), dimension_numbers=dn)
        return y + b.reshape(1, -1, 1, 1)

    v2 = jax.nn.sigmoid(conv(x_nchw, w1, b1, 1, 0, 2))
    v4 = jax.nn.sigmoid(conv(v2, w2, b2, 2, 1, 1))
    v6 = jax.nn.sigmoid(conv(v4, w3, b3, 2, 1, 1))
    return v6


# ----------------------------------------------------------------------------
if __name__ == "__main__":
    key = jax.random.PRNGKey(0)
    k_x, k_w1, k_b1, k_w2, k_b2, k_w3, k_b3 = jax.random.split(key, 7)

    # Shapes from the module spec: input (1, 3, 64, 64).
    x = jax.random.normal(k_x, (1, 3, 64, 64), dtype=jnp.float32)

    w1 = 0.2 * jax.random.normal(k_w1, (3, 3, 1, 1), dtype=jnp.float32)
    b1 = 0.1 * jax.random.normal(k_b1, (3,), dtype=jnp.float32)
    w2 = 0.2 * jax.random.normal(k_w2, (3, 3, 3, 3), dtype=jnp.float32)
    b2 = 0.1 * jax.random.normal(k_b2, (3,), dtype=jnp.float32)
    w3 = 0.2 * jax.random.normal(k_w3, (3, 3, 3, 3), dtype=jnp.float32)
    b3 = 0.1 * jax.random.normal(k_b3, (3,), dtype=jnp.float32)
    params = ((w1, b1), (w2, b2), (w3, b3))

    out = jax.block_until_ready(jax.jit(model_forward)(x, params))
    ref = jax.block_until_ready(_ref_forward(x, params))

    assert out.shape == (1, 3, 16, 16), out.shape
    max_err = float(jnp.max(jnp.abs(out - ref)))
    assert jnp.allclose(out, ref, atol=1e-5, rtol=1e-5), max_err
    print("KERNEL_OK")
</pallas_src>

<mosaic_0001>
module attributes {stable_mosaic.version = 11 : i64} {
  func.func @kernel(%arg0: memref<3x64x64xf32, #tpu.memory_space<vmem>>, %arg1: memref<9xf32, #tpu.memory_space<smem>>, %arg2: memref<3xf32, #tpu.memory_space<smem>>, %arg3: memref<81xf32, #tpu.memory_space<smem>>, %arg4: memref<3xf32, #tpu.memory_space<smem>>, %arg5: memref<81xf32, #tpu.memory_space<smem>>, %arg6: memref<3xf32, #tpu.memory_space<smem>>, %arg7: memref<3x32x64xf32, #tpu.memory_space<vmem>>, %arg8: memref<3x64x32xf32, #tpu.memory_space<vmem>>, %arg9: memref<3x16x32xf32, #tpu.memory_space<vmem>>, %arg10: memref<3x32x16xf32, #tpu.memory_space<vmem>>, %arg11: memref<3x16x16xf32, #tpu.memory_space<vmem>>) attributes {dimension_semantics = [], scalar_prefetch = 0 : i64, scratch_operands = 0 : i64, tpu.core_type = #tpu.core_type<tc>} {
    %c0 = arith.constant 0 : index
    %c0_0 = arith.constant 0 : index
    %c0_1 = arith.constant 0 : index
    %0 = vector.load %arg0[%c0, %c0_0, %c0_1] : memref<3x64x64xf32, #tpu.memory_space<vmem>>, vector<3x64x64xf32>
    %c0_2 = arith.constant 0 : index
    %c0_3 = arith.constant 0 : index
    %c0_4 = arith.constant 0 : index
    %1 = vector.load %arg7[%c0_2, %c0_3, %c0_4] : memref<3x32x64xf32, #tpu.memory_space<vmem>>, vector<3x32x64xf32>
    %c0_5 = arith.constant 0 : index
    %c0_6 = arith.constant 0 : index
    %c0_7 = arith.constant 0 : index
    %2 = vector.load %arg8[%c0_5, %c0_6, %c0_7] : memref<3x64x32xf32, #tpu.memory_space<vmem>>, vector<3x64x32xf32>
    %c0_8 = arith.constant 0 : index
    %c0_9 = arith.constant 0 : index
    %c0_10 = arith.constant 0 : index
    %3 = vector.load %arg9[%c0_8, %c0_9, %c0_10] : memref<3x16x32xf32, #tpu.memory_space<vmem>>, vector<3x16x32xf32>
    %c0_11 = arith.constant 0 : index
    %c0_12 = arith.constant 0 : index
    %c0_13 = arith.constant 0 : index
    %4 = vector.load %arg10[%c0_11, %c0_12, %c0_13] : memref<3x32x16xf32, #tpu.memory_space<vmem>>, vector<3x32x16xf32>
    %5 = vector.extract_strided_slice %0 {offsets = [0, 0, 0], sizes = [1, 64, 64], strides = [1, 1, 1]} : vector<3x64x64xf32> to vector<1x64x64xf32>
    %6 = vector.shape_cast %5 : vector<1x64x64xf32> to vector<64x64xf32>
    %7 = vector.extract_strided_slice %0 {offsets = [1, 0, 0], sizes = [1, 64, 64], strides = [1, 1, 1]} : vector<3x64x64xf32> to vector<1x64x64xf32>
    %8 = vector.shape_cast %7 : vector<1x64x64xf32> to vector<64x64xf32>
    %9 = vector.extract_strided_slice %0 {offsets = [2, 0, 0], sizes = [1, 64, 64], strides = [1, 1, 1]} : vector<3x64x64xf32> to vector<1x64x64xf32>
    %10 = vector.shape_cast %9 : vector<1x64x64xf32> to vector<64x64xf32>
    %c0_14 = arith.constant 0 : index
    %11 = memref.load %arg1[%c0_14] : memref<9xf32, #tpu.memory_space<smem>>
    %12 = vector.broadcast %11 : f32 to vector<64x64xf32>
    %13 = arith.mulf %12, %6 : vector<64x64xf32>
    %c1 = arith.constant 1 : index
    %14 = memref.load %arg1[%c1] : memref<9xf32, #tpu.memory_space<smem>>
    %15 = vector.broadcast %14 : f32 to vector<64x64xf32>
    %16 = arith.mulf %15, %8 : vector<64x64xf32>
    %17 = arith.addf %13, %16 : vector<64x64xf32>
    %c2 = arith.constant 2 : index
    %18 = memref.load %arg1[%c2] : memref<9xf32, #tpu.memory_space<smem>>
    %19 = vector.broadcast %18 : f32 to vector<64x64xf32>
    %20 = arith.mulf %19, %10 : vector<64x64xf32>
    %21 = arith.addf %17, %20 : vector<64x64xf32>
    %c0_15 = arith.constant 0 : index
    %22 = memref.load %arg2[%c0_15] : memref<3xf32, #tpu.memory_space<smem>>
    %23 = vector.broadcast %22 : f32 to vector<64x64xf32>
    %24 = arith.addf %21, %23 : vector<64x64xf32>
    %cst = arith.constant 5.000000e-01 : f32
    %25 = vector.broadcast %cst : f32 to vector<64x64xf32>
    %26 = arith.mulf %25, %24 : vector<64x64xf32>
    %27 = math.tanh %26 : vector<64x64xf32>
    %cst_16 = arith.constant 5.000000e-01 : f32
    %28 = vector.broadcast %cst_16 : f32 to vector<64x64xf32>
    %29 = arith.mulf %28, %27 : vector<64x64xf32>
    %cst_17 = arith.constant 5.000000e-01 : f32
    %30 = vector.broadcast %cst_17 : f32 to vector<64x64xf32>
    %31 = arith.addf %29, %30 : vector<64x64xf32>
    %c3 = arith.constant 3 : index
    %32 = memref.load %arg1[%c3] : memref<9xf32, #tpu.memory_space<smem>>
    %33 = vector.broadcast %32 : f32 to vector<64x64xf32>
    %34 = arith.mulf %33, %6 : vector<64x64xf32>
    %c4 = arith.constant 4 : index
    %35 = memref.load %arg1[%c4] : memref<9xf32, #tpu.memory_space<smem>>
    %36 = vector.broadcast %35 : f32 to vector<64x64xf32>
    %37 = arith.mulf %36, %8 : vector<64x64xf32>
    %38 = arith.addf %34, %37 : vector<64x64xf32>
    %c5 = arith.constant 5 : index
    %39 = memref.load %arg1[%c5] : memref<9xf32, #tpu.memory_space<smem>>
    %40 = vector.broadcast %39 : f32 to vector<64x64xf32>
    %41 = arith.mulf %40, %10 : vector<64x64xf32>
    %42 = arith.addf %38, %41 : vector<64x64xf32>
    %c1_18 = arith.constant 1 : index
    %43 = memref.load %arg2[%c1_18] : memref<3xf32, #tpu.memory_space<smem>>
    %44 = vector.broadcast %43 : f32 to vector<64x64xf32>
    %45 = arith.addf %42, %44 : vector<64x64xf32>
    %cst_19 = arith.constant 5.000000e-01 : f32
    %46 = vector.broadcast %cst_19 : f32 to vector<64x64xf32>
    %47 = arith.mulf %46, %45 : vector<64x64xf32>
    %48 = math.tanh %47 : vector<64x64xf32>
    %cst_20 = arith.constant 5.000000e-01 : f32
    %49 = vector.broadcast %cst_20 : f32 to vector<64x64xf32>
    %50 = arith.mulf %49, %48 : vector<64x64xf32>
    %cst_21 = arith.constant 5.000000e-01 : f32
    %51 = vector.broadcast %cst_21 : f32 to vector<64x64xf32>
    %52 = arith.addf %50, %51 : vector<64x64xf32>
    %c6 = arith.constant 6 : index
    %53 = memref.load %arg1[%c6] : memref<9xf32, #tpu.memory_space<smem>>
    %54 = vector.broadcast %53 : f32 to vector<64x64xf32>
    %55 = arith.mulf %54, %6 : vector<64x64xf32>
    %c7 = arith.constant 7 : index
    %56 = memref.load %arg1[%c7] : memref<9xf32, #tpu.memory_space<smem>>
    %57 = vector.broadcast %56 : f32 to vector<64x64xf32>
    %58 = arith.mulf %57, %8 : vector<64x64xf32>
    %59 = arith.addf %55, %58 : vector<64x64xf32>
    %c8 = arith.constant 8 : index
    %60 = memref.load %arg1[%c8] : memref<9xf32, #tpu.memory_space<smem>>
    %61 = vector.broadcast %60 : f32 to vector<64x64xf32>
    %62 = arith.mulf %61, %10 : vector<64x64xf32>
    %63 = arith.addf %59, %62 : vector<64x64xf32>
    %c2_22 = arith.constant 2 : index
    %64 = memref.load %arg2[%c2_22] : memref<3xf32, #tpu.memory_space<smem>>
    %65 = vector.broadcast %64 : f32 to vector<64x64xf32>
    %66 = arith.addf %63, %65 : vector<64x64xf32>
    %cst_23 = arith.constant 5.000000e-01 : f32
    %67 = vector.broadcast %cst_23 : f32 to vector<64x64xf32>
    %68 = arith.mulf %67, %66 : vector<64x64xf32>
    %69 = math.tanh %68 : vector<64x64xf32>
    %cst_24 = arith.constant 5.000000e-01 : f32
    %70 = vector.broadcast %cst_24 : f32 to vector<64x64xf32>
    %71 = arith.mulf %70, %69 : vector<64x64xf32>
    %cst_25 = arith.constant 5.000000e-01 : f32
    %72 = vector.broadcast %cst_25 : f32 to vector<64x64xf32>
    %73 = arith.addf %71, %72 : vector<64x64xf32>
    %74 = vector.extract_strided_slice %1 {offsets = [0, 0, 0], sizes = [1, 32, 64], strides = [1, 1, 1]} : vector<3x32x64xf32> to vector<1x32x64xf32>
    %75 = vector.shape_cast %74 : vector<1x32x64xf32> to vector<32x64xf32>
    %cst_26 = arith.constant dense<0.000000e+00> : vector<32x64xf32>
    %76 = tpu.matmul %75, %31, %cst_26 {dimension_numbers = #tpu.dot_dimension_numbers<[1], [0], [0], [1], [0, 0, 1, 1], [], []>} : vector<32x64xf32>, vector<64x64xf32>, vector<32x64xf32> -> vector<32x64xf32>
    %77 = vector.extract_strided_slice %1 {offsets = [1, 0, 0], sizes = [1, 32, 64], strides = [1, 1, 1]} : vector<3x32x64xf32> to vector<1x32x64xf32>
    %78 = vector.shape_cast %77 : vector<1x32x64xf32> to vector<32x64xf32>
    %cst_27 = arith.constant dense<0.000000e+00> : vector<32x64xf32>
    %79 = tpu.matmul %78, %31, %cst_27 {dimension_numbers = #tpu.dot_dimension_numbers<[1], [0], [0], [1], [0, 0, 1, 1], [], []>} : vector<32x64xf32>, vector<64x64xf32>, vector<32x64xf32> -> vector<32x64xf32>
    %80 = vector.extract_strided_slice %1 {offsets = [2, 0, 0], sizes = [1, 32, 64], strides = [1, 1, 1]} : vector<3x32x64xf32> to vector<1x32x64xf32>
    %81 = vector.shape_cast %80 : vector<1x32x64xf32> to vector<32x64xf32>
    %cst_28 = arith.constant dense<0.000000e+00> : vector<32x64xf32>
    %82 = tpu.matmul %81, %31, %cst_28 {dimension_numbers = #tpu.dot_dimension_numbers<[1], [0], [0], [1], [0, 0, 1, 1], [], []>} : vector<32x64xf32>, vector<64x64xf32>, vector<32x64xf32> -> vector<32x64xf32>
    %83 = vector.extract_strided_slice %1 {offsets = [0, 0, 0], sizes = [1, 32, 64], strides = [1, 1, 1]} : vector<3x32x64xf32> to vector<1x32x64xf32>
    %84 = vector.shape_cast %83 : vector<1x32x64xf32> to vector<32x64xf32>
    %cst_29 = arith.constant dense<0.000000e+00> : vector<32x64xf32>
    %85 = tpu.matmul %84, %52, %cst_29 {dimension_numbers = #tpu.dot_dimension_numbers<[1], [0], [0], [1], [0, 0, 1, 1], [], []>} : vector<32x64xf32>, vector<64x64xf32>, vector<32x64xf32> -> vector<32x64xf32>
    %86 = vector.extract_strided_slice %1 {offsets = [1, 0, 0], sizes = [1, 32, 64], strides = [1, 1, 1]} : vector<3x32x64xf32> to vector<1x32x64xf32>
    %87 = vector.shape_cast %86 : vector<1x32x64xf32> to vector<32x64xf32>
    %cst_30 = arith.constant dense<0.000000e+00> : vector<32x64xf32>
    %88 = tpu.matmul %87, %52, %cst_30 {dimension_numbers = #tpu.dot_dimension_numbers<[1], [0], [0], [1], [0, 0, 1, 1], [], []>} : vector<32x64xf32>, vector<64x64xf32>, vector<32x64xf32> -> vector<32x64xf32>
    %89 = vector.extract_strided_slice %1 {offsets = [2, 0, 0], sizes = [1, 32, 64], strides = [1, 1, 1]} : vector<3x32x64xf32> to vector<1x32x64xf32>
    %90 = vector.shape_cast %89 : vector<1x32x64xf32> to vector<32x64xf32>
    %cst_31 = arith.constant dense<0.000000e+00> : vector<32x64xf32>
    %91 = tpu.matmul %90, %52, %cst_31 {dimension_numbers = #tpu.dot_dimension_numbers<[1], [0], [0], [1], [0, 0, 1, 1], [], []>} : vector<32x64xf32>, vector<64x64xf32>, vector<32x64xf32> -> vector<32x64xf32>
    %92 = vector.extract_strided_slice %1 {offsets = [0, 0, 0], sizes = [1, 32, 64], strides = [1, 1, 1]} : vector<3x32x64xf32> to vector<1x32x64xf32>
    %93 = vector.shape_cast %92 : vector<1x32x64xf32> to vector<32x64xf32>
    %cst_32 = arith.constant dense<0.000000e+00> : vector<32x64xf32>
    %94 = tpu.matmul %93, %73, %cst_32 {dimension_numbers = #tpu.dot_dimension_numbers<[1], [0], [0], [1], [0, 0, 1, 1], [], []>} : vector<32x64xf32>, vector<64x64xf32>, vector<32x64xf32> -> vector<32x64xf32>
    %95 = vector.extract_strided_slice %1 {offsets = [1, 0, 0], sizes = [1, 32, 64], strides = [1, 1, 1]} : vector<3x32x64xf32> to vector<1x32x64xf32>
    %96 = vector.shape_cast %95 : vector<1x32x64xf32> to vector<32x64xf32>
    %cst_33 = arith.constant dense<0.000000e+00> : vector<32x64xf32>
    %97 = tpu.matmul %96, %73, %cst_33 {dimension_numbers = #tpu.dot_dimension_numbers<[1], [0], [0], [1], [0, 0, 1, 1], [], []>} : vector<32x64xf32>, vector<64x64xf32>, vector<32x64xf32> -> vector<32x64xf32>
    %98 = vector.extract_strided_slice %1 {offsets = [2, 0, 0], sizes = [1, 32, 64], strides = [1, 1, 1]} : vector<3x32x64xf32> to vector<1x32x64xf32>
    %99 = vector.shape_cast %98 : vector<1x32x64xf32> to vector<32x64xf32>
    %cst_34 = arith.constant dense<0.000000e+00> : vector<32x64xf32>
    %100 = tpu.matmul %99, %73, %cst_34 {dimension_numbers = #tpu.dot_dimension_numbers<[1], [0], [0], [1], [0, 0, 1, 1], [], []>} : vector<32x64xf32>, vector<64x64xf32>, vector<32x64xf32> -> vector<32x64xf32>
    %c0_35 = arith.constant 0 : index
    %101 = memref.load %arg3[%c0_35] : memref<81xf32, #tpu.memory_space<smem>>
    %102 = vector.broadcast %101 : f32 to vector<32x64xf32>
    %103 = arith.mulf %102, %76 : vector<32x64xf32>
    %c3_36 = arith.constant 3 : index
    %104 = memref.load %arg3[%c3_36] : memref<81xf32, #tpu.memory_space<smem>>
    %105 = vector.broadcast %104 : f32 to vector<32x64xf32>
    %106 = arith.mulf %105, %79 : vector<32x64xf32>
    %107 = arith.addf %103, %106 : vector<32x64xf32>
    %c6_37 = arith.constant 6 : index
    %108 = memref.load %arg3[%c6_37] : memref<81xf32, #tpu.memory_space<smem>>
    %109 = vector.broadcast %108 : f32 to vector<32x64xf32>
    %110 = arith.mulf %109, %82 : vector<32x64xf32>
    %111 = arith.addf %107, %110 : vector<32x64xf32>
    %c9 = arith.constant 9 : index
    %112 = memref.load %arg3[%c9] : memref<81xf32, #tpu.memory_space<smem>>
    %113 = vector.broadcast %112 : f32 to vector<32x64xf32>
    %114 = arith.mulf %113, %85 : vector<32x64xf32>
    %115 = arith.addf %111, %114 : vector<32x64xf32>
    %c12 = arith.constant 12 : index
    %116 = memref.load %arg3[%c12] : memref<81xf32, #tpu.memory_space<smem>>
    %117 = vector.broadcast %116 : f32 to vector<32x64xf32>
    %118 = arith.mulf %117, %88 : vector<32x64xf32>
    %119 = arith.addf %115, %118 : vector<32x64xf32>
    %c15 = arith.constant 15 : index
    %120 = memref.load %arg3[%c15] : memref<81xf32, #tpu.memory_space<smem>>
    %121 = vector.broadcast %120 : f32 to vector<32x64xf32>
    %122 = arith.mulf %121, %91 : vector<32x64xf32>
    %123 = arith.addf %119, %122 : vector<32x64xf32>
    %c18 = arith.constant 18 : index
    %124 = memref.load %arg3[%c18] : memref<81xf32, #tpu.memory_space<smem>>
    %125 = vector.broadcast %124 : f32 to vector<32x64xf32>
    %126 = arith.mulf %125, %94 : vector<32x64xf32>
    %127 = arith.addf %123, %126 : vector<32x64xf32>
    %c21 = arith.constant 21 : index
    %128 = memref.load %arg3[%c21] : memref<81xf32, #tpu.memory_space<smem>>
    %129 = vector.broadcast %128 : f32 to vector<32x64xf32>
    %130 = arith.mulf %129, %97 : vector<32x64xf32>
    %131 = arith.addf %127, %130 : vector<32x64xf32>
    %c24 = arith.constant 24 : index
    %132 = memref.load %arg3[%c24] : memref<81xf32, #tpu.memory_space<smem>>
    %133 = vector.broadcast %132 : f32 to vector<32x64xf32>
    %134 = arith.mulf %133, %100 : vector<32x64xf32>
    %135 = arith.addf %131, %134 : vector<32x64xf32>
    %136 = vector.extract_strided_slice %2 {offsets = [0, 0, 0], sizes = [1, 64, 32], strides = [1, 1, 1]} : vector<3x64x32xf32> to vector<1x64x32xf32>
    %137 = vector.shape_cast %136 : vector<1x64x32xf32> to vector<64x32xf32>
    %cst_38 = arith.constant dense<0.000000e+00> : vector<32x32xf32>
    %138 = tpu.matmul %135, %137, %cst_38 {dimension_numbers = #tpu.dot_dimension_numbers<[1], [0], [0], [1], [0, 0, 1, 1], [], []>} : vector<32x64xf32>, vector<64x32xf32>, vector<32x32xf32> -> vector<32x32xf32>
    %c1_39 = arith.constant 1 : index
    %139 = memref.load %arg3[%c1_39] : memref<81xf32, #tpu.memory_space<smem>>
    %140 = vector.broadcast %139 : f32 to vector<32x64xf32>
    %141 = arith.mulf %140, %76 : vector<32x64xf32>
    %c4_40 = arith.constant 4 : index
    %142 = memref.load %arg3[%c4_40] : memref<81xf32, #tpu.memory_space<smem>>
    %143 = vector.broadcast %142 : f32 to vector<32x64xf32>
    %144 = arith.mulf %143, %79 : vector<32x64xf32>
    %145 = arith.addf %141, %144 : vector<32x64xf32>
    %c7_41 = arith.constant 7 : index
    %146 = memref.load %arg3[%c7_41] : memref<81xf32, #tpu.memory_space<smem>>
    %147 = vector.broadcast %146 : f32 to vector<32x64xf32>
    %148 = arith.mulf %147, %82 : vector<32x64xf32>
    %149 = arith.addf %145, %148 : vector<32x64xf32>
    %c10 = arith.constant 10 : index
    %150 = memref.load %arg3[%c10] : memref<81xf32, #tpu.memory_space<smem>>
    %151 = vector.broadcast %150 : f32 to vector<32x64xf32>
    %152 = arith.mulf %151, %85 : vector<32x64xf32>
    %153 = arith.addf %149, %152 : vector<32x64xf32>
    %c13 = arith.constant 13 : index
    %154 = memref.load %arg3[%c13] : memref<81xf32, #tpu.memory_space<smem>>
    %155 = vector.broadcast %154 : f32 to vector<32x64xf32>
    %156 = arith.mulf %155, %88 : vector<32x64xf32>
    %157 = arith.addf %153, %156 : vector<32x64xf32>
    %c16 = arith.constant 16 : index
    %158 = memref.load %arg3[%c16] : memref<81xf32, #tpu.memory_space<smem>>
    %159 = vector.broadcast %158 : f32 to vector<32x64xf32>
    %160 = arith.mulf %159, %91 : vector<32x64xf32>
    %161 = arith.addf %157, %160 : vector<32x64xf32>
    %c19 = arith.constant 19 : index
    %162 = memref.load %arg3[%c19] : memref<81xf32, #tpu.memory_space<smem>>
    %163 = vector.broadcast %162 : f32 to vector<32x64xf32>
    %164 = arith.mulf %163, %94 : vector<32x64xf32>
    %165 = arith.addf %161, %164 : vector<32x64xf32>
    %c22 = arith.constant 22 : index
    %166 = memref.load %arg3[%c22] : memref<81xf32, #tpu.memory_space<smem>>
    %167 = vector.broadcast %166 : f32 to vector<32x64xf32>
    %168 = arith.mulf %167, %97 : vector<32x64xf32>
    %169 = arith.addf %165, %168 : vector<32x64xf32>
    %c25 = arith.constant 25 : index
    %170 = memref.load %arg3[%c25] : memref<81xf32, #tpu.memory_space<smem>>
    %171 = vector.broadcast %170 : f32 to vector<32x64xf32>
    %172 = arith.mulf %171, %100 : vector<32x64xf32>
    %173 = arith.addf %169, %172 : vector<32x64xf32>
    %174 = vector.extract_strided_slice %2 {offsets = [1, 0, 0], sizes = [1, 64, 32], strides = [1, 1, 1]} : vector<3x64x32xf32> to vector<1x64x32xf32>
    %175 = vector.shape_cast %174 : vector<1x64x32xf32> to vector<64x32xf32>
    %cst_42 = arith.constant dense<0.000000e+00> : vector<32x32xf32>
    %176 = tpu.matmul %173, %175, %cst_42 {dimension_numbers = #tpu.dot_dimension_numbers<[1], [0], [0], [1], [0, 0, 1, 1], [], []>} : vector<32x64xf32>, vector<64x32xf32>, vector<32x32xf32> -> vector<32x32xf32>
    %177 = arith.addf %138, %176 : vector<32x32xf32>
    %c2_43 = arith.constant 2 : index
    %178 = memref.load %arg3[%c2_43] : memref<81xf32, #tpu.memory_space<smem>>
    %179 = vector.broadcast %178 : f32 to vector<32x64xf32>
    %180 = arith.mulf %179, %76 : vector<32x64xf32>
    %c5_44 = arith.constant 5 : index
    %181 = memref.load %arg3[%c5_44] : memref<81xf32, #tpu.memory_space<smem>>
    %182 = vector.broadcast %181 : f32 to vector<32x64xf32>
    %183 = arith.mulf %182, %79 : vector<32x64xf32>
    %184 = arith.addf %180, %183 : vector<32x64xf32>
    %c8_45 = arith.constant 8 : index
    %185 = memref.load %arg3[%c8_45] : memref<81xf32, #tpu.memory_space<smem>>
    %186 = vector.broadcast %185 : f32 to vector<32x64xf32>
    %187 = arith.mulf %186, %82 : vector<32x64xf32>
    %188 = arith.addf %184, %187 : vector<32x64xf32>
    %c11 = arith.constant 11 : index
    %189 = memref.load %arg3[%c11] : memref<81xf32, #tpu.memory_space<smem>>
    %190 = vector.broadcast %189 : f32 to vector<32x64xf32>
    %191 = arith.mulf %190, %85 : vector<32x64xf32>
    %192 = arith.addf %188, %191 : vector<32x64xf32>
    %c14 = arith.constant 14 : index
    %193 = memref.load %arg3[%c14] : memref<81xf32, #tpu.memory_space<smem>>
    %194 = vector.broadcast %193 : f32 to vector<32x64xf32>
    %195 = arith.mulf %194, %88 : vector<32x64xf32>
    %196 = arith.addf %192, %195 : vector<32x64xf32>
    %c17 = arith.constant 17 : index
    %197 = memref.load %arg3[%c17] : memref<81xf32, #tpu.memory_space<smem>>
    %198 = vector.broadcast %197 : f32 to vector<32x64xf32>
    %199 = arith.mulf %198, %91 : vector<32x64xf32>
    %200 = arith.addf %196, %199 : vector<32x64xf32>
    %c20 = arith.constant 20 : index
    %201 = memref.load %arg3[%c20] : memref<81xf32, #tpu.memory_space<smem>>
    %202 = vector.broadcast %201 : f32 to vector<32x64xf32>
    %203 = arith.mulf %202, %94 : vector<32x64xf32>
    %204 = arith.addf %200, %203 : vector<32x64xf32>
    %c23 = arith.constant 23 : index
    %205 = memref.load %arg3[%c23] : memref<81xf32, #tpu.memory_space<smem>>
    %206 = vector.broadcast %205 : f32 to vector<32x64xf32>
    %207 = arith.mulf %206, %97 : vector<32x64xf32>
    %208 = arith.addf %204, %207 : vector<32x64xf32>
    %c26 = arith.constant 26 : index
    %209 = memref.load %arg3[%c26] : memref<81xf32, #tpu.memory_space<smem>>
    %210 = vector.broadcast %209 : f32 to vector<32x64xf32>
    %211 = arith.mulf %210, %100 : vector<32x64xf32>
    %212 = arith.addf %208, %211 : vector<32x64xf32>
    %213 = vector.extract_strided_slice %2 {offsets = [2, 0, 0], sizes = [1, 64, 32], strides = [1, 1, 1]} : vector<3x64x32xf32> to vector<1x64x32xf32>
    %214 = vector.shape_cast %213 : vector<1x64x32xf32> to vector<64x32xf32>
    %cst_46 = arith.constant dense<0.000000e+00> : vector<32x32xf32>
    %215 = tpu.matmul %212, %214, %cst_46 {dimension_numbers = #tpu.dot_dimension_numbers<[1], [0], [0], [1], [0, 0, 1, 1], [], []>} : vector<32x64xf32>, vector<64x32xf32>, vector<32x32xf32> -> vector<32x32xf32>
    %216 = arith.addf %177, %215 : vector<32x32xf32>
    %c0_47 = arith.constant 0 : index
    %217 = memref.load %arg4[%c0_47] : memref<3xf32, #tpu.memory_space<smem>>
    %218 = vector.broadcast %217 : f32 to vector<32x32xf32>
    %219 = arith.addf %216, %218 : vector<32x32xf32>
    %cst_48 = arith.constant 5.000000e-01 : f32
    %220 = vector.broadcast %cst_48 : f32 to vector<32x32xf32>
    %221 = arith.mulf %220, %219 : vector<32x32xf32>
    %222 = math.tanh %221 : vector<32x32xf32>
    %cst_49 = arith.constant 5.000000e-01 : f32
    %223 = vector.broadcast %cst_49 : f32 to vector<32x32xf32>
    %224 = arith.mulf %223, %222 : vector<32x32xf32>
    %cst_50 = arith.constant 5.000000e-01 : f32
    %225 = vector.broadcast %cst_50 : f32 to vector<32x32xf32>
    %226 = arith.addf %224, %225 : vector<32x32xf32>
    %c27 = arith.constant 27 : index
    %227 = memref.load %arg3[%c27] : memref<81xf32, #tpu.memory_space<smem>>
    %228 = vector.broadcast %227 : f32 to vector<32x64xf32>
    %229 = arith.mulf %228, %76 : vector<32x64xf32>
    %c30 = arith.constant 30 : index
    %230 = memref.load %arg3[%c30] : memref<81xf32, #tpu.memory_space<smem>>
    %231 = vector.broadcast %230 : f32 to vector<32x64xf32>
    %232 = arith.mulf %231, %79 : vector<32x64xf32>
    %233 = arith.addf %229, %232 : vector<32x64xf32>
    %c33 = arith.constant 33 : index
    %234 = memref.load %arg3[%c33] : memref<81xf32, #tpu.memory_space<smem>>
    %235 = vector.broadcast %234 : f32 to vector<32x64xf32>
    %236 = arith.mulf %235, %82 : vector<32x64xf32>
    %237 = arith.addf %233, %236 : vector<32x64xf32>
    %c36 = arith.constant 36 : index
    %238 = memref.load %arg3[%c36] : memref<81xf32, #tpu.memory_space<smem>>
    %239 = vector.broadcast %238 : f32 to vector<32x64xf32>
    %240 = arith.mulf %239, %85 : vector<32x64xf32>
    %241 = arith.addf %237, %240 : vector<32x64xf32>
    %c39 = arith.constant 39 : index
    %242 = memref.load %arg3[%c39] : memref<81xf32, #tpu.memory_space<smem>>
    %243 = vector.broadcast %242 : f32 to vector<32x64xf32>
    %244 = arith.mulf %243, %88 : vector<32x64xf32>
    %245 = arith.addf %241, %244 : vector<32x64xf32>
    %c42 = arith.constant 42 : index
    %246 = memref.load %arg3[%c42] : memref<81xf32, #tpu.memory_space<smem>>
    %247 = vector.broadcast %246 : f32 to vector<32x64xf32>
    %248 = arith.mulf %247, %91 : vector<32x64xf32>
    %249 = arith.addf %245, %248 : vector<32x64xf32>
    %c45 = arith.constant 45 : index
    %250 = memref.load %arg3[%c45] : memref<81xf32, #tpu.memory_space<smem>>
    %251 = vector.broadcast %250 : f32 to vector<32x64xf32>
    %252 = arith.mulf %251, %94 : vector<32x64xf32>
    %253 = arith.addf %249, %252 : vector<32x64xf32>
    %c48 = arith.constant 48 : index
    %254 = memref.load %arg3[%c48] : memref<81xf32, #tpu.memory_space<smem>>
    %255 = vector.broadcast %254 : f32 to vector<32x64xf32>
    %256 = arith.mulf %255, %97 : vector<32x64xf32>
    %257 = arith.addf %253, %256 : vector<32x64xf32>
    %c51 = arith.constant 51 : index
    %258 = memref.load %arg3[%c51] : memref<81xf32, #tpu.memory_space<smem>>
    %259 = vector.broadcast %258 : f32 to vector<32x64xf32>
    %260 = arith.mulf %259, %100 : vector<32x64xf32>
    %261 = arith.addf %257, %260 : vector<32x64xf32>
    %262 = vector.extract_strided_slice %2 {offsets = [0, 0, 0], sizes = [1, 64, 32], strides = [1, 1, 1]} : vector<3x64x32xf32> to vector<1x64x32xf32>
    %263 = vector.shape_cast %262 : vector<1x64x32xf32> to vector<64x32xf32>
    %cst_51 = arith.constant dense<0.000000e+00> : vector<32x32xf32>
    %264 = tpu.matmul %261, %263, %cst_51 {dimension_numbers = #tpu.dot_dimension_numbers<[1], [0], [0], [1], [0, 0, 1, 1], [], []>} : vector<32x64xf32>, vector<64x32xf32>, vector<32x32xf32> -> vector<32x32xf32>
    %c28 = arith.constant 28 : index
    %265 = memref.load %arg3[%c28] : memref<81xf32, #tpu.memory_space<smem>>
    %266 = vector.broadcast %265 : f32 to vector<32x64xf32>
    %267 = arith.mulf %266, %76 : vector<32x64xf32>
    %c31 = arith.constant 31 : index
    %268 = memref.load %arg3[%c31] : memref<81xf32, #tpu.memory_space<smem>>
    %269 = vector.broadcast %268 : f32 to vector<32x64xf32>
    %270 = arith.mulf %269, %79 : vector<32x64xf32>
    %271 = arith.addf %267, %270 : vector<32x64xf32>
    %c34 = arith.constant 34 : index
    %272 = memref.load %arg3[%c34] : memref<81xf32, #tpu.memory_space<smem>>
    %273 = vector.broadcast %272 : f32 to vector<32x64xf32>
    %274 = arith.mulf %273, %82 : vector<32x64xf32>
    %275 = arith.addf %271, %274 : vector<32x64xf32>
    %c37 = arith.constant 37 : index
    %276 = memref.load %arg3[%c37] : memref<81xf32, #tpu.memory_space<smem>>
    %277 = vector.broadcast %276 : f32 to vector<32x64xf32>
    %278 = arith.mulf %277, %85 : vector<32x64xf32>
    %279 = arith.addf %275, %278 : vector<32x64xf32>
    %c40 = arith.constant 40 : index
    %280 = memref.load %arg3[%c40] : memref<81xf32, #tpu.memory_space<smem>>
    %281 = vector.broadcast %280 : f32 to vector<32x64xf32>
    %282 = arith.mulf %281, %88 : vector<32x64xf32>
    %283 = arith.addf %279, %282 : vector<32x64xf32>
    %c43 = arith.constant 43 : index
    %284 = memref.load %arg3[%c43] : memref<81xf32, #tpu.memory_space<smem>>
    %285 = vector.broadcast %284 : f32 to vector<32x64xf32>
    %286 = arith.mulf %285, %91 : vector<32x64xf32>
    %287 = arith.addf %283, %286 : vector<32x64xf32>
    %c46 = arith.constant 46 : index
    %288 = memref.load %arg3[%c46] : memref<81xf32, #tpu.memory_space<smem>>
    %289 = vector.broadcast %288 : f32 to vector<32x64xf32>
    %290 = arith.mulf %289, %94 : vector<32x64xf32>
    %291 = arith.addf %287, %290 : vector<32x64xf32>
    %c49 = arith.constant 49 : index
    %292 = memref.load %arg3[%c49] : memref<81xf32, #tpu.memory_space<smem>>
    %293 = vector.broadcast %292 : f32 to vector<32x64xf32>
    %294 = arith.mulf %293, %97 : vector<32x64xf32>
    %295 = arith.addf %291, %294 : vector<32x64xf32>
    %c52 = arith.constant 52 : index
    %296 = memref.load %arg3[%c52] : memref<81xf32, #tpu.memory_space<smem>>
    %297 = vector.broadcast %296 : f32 to vector<32x64xf32>
    %298 = arith.mulf %297, %100 : vector<32x64xf32>
    %299 = arith.addf %295, %298 : vector<32x64xf32>
    %300 = vector.extract_strided_slice %2 {offsets = [1, 0, 0], sizes = [1, 64, 32], strides = [1, 1, 1]} : vector<3x64x32xf32> to vector<1x64x32xf32>
    %301 = vector.shape_cast %300 : vector<1x64x32xf32> to vector<64x32xf32>
    %cst_52 = arith.constant dense<0.000000e+00> : vector<32x32xf32>
    %302 = tpu.matmul %299, %301, %cst_52 {dimension_numbers = #tpu.dot_dimension_numbers<[1], [0], [0], [1], [0, 0, 1, 1], [], []>} : vector<32x64xf32>, vector<64x32xf32>, vector<32x32xf32> -> vector<32x32xf32>
    %303 = arith.addf %264, %302 : vector<32x32xf32>
    %c29 = arith.constant 29 : index
    %304 = memref.load %arg3[%c29] : memref<81xf32, #tpu.memory_space<smem>>
    %305 = vector.broadcast %304 : f32 to vector<32x64xf32>
    %306 = arith.mulf %305, %76 : vector<32x64xf32>
    %c32 = arith.constant 32 : index
    %307 = memref.load %arg3[%c32] : memref<81xf32, #tpu.memory_space<smem>>
    %308 = vector.broadcast %307 : f32 to vector<32x64xf32>
    %309 = arith.mulf %308, %79 : vector<32x64xf32>
    %310 = arith.addf %306, %309 : vector<32x64xf32>
    %c35 = arith.constant 35 : index
    %311 = memref.load %arg3[%c35] : memref<81xf32, #tpu.memory_space<smem>>
    %312 = vector.broadcast %311 : f32 to vector<32x64xf32>
    %313 = arith.mulf %312, %82 : vector<32x64xf32>
    %314 = arith.addf %310, %313 : vector<32x64xf32>
    %c38 = arith.constant 38 : index
    %315 = memref.load %arg3[%c38] : memref<81xf32, #tpu.memory_space<smem>>
    %316 = vector.broadcast %315 : f32 to vector<32x64xf32>
    %317 = arith.mulf %316, %85 : vector<32x64xf32>
    %318 = arith.addf %314, %317 : vector<32x64xf32>
    %c41 = arith.constant 41 : index
    %319 = memref.load %arg3[%c41] : memref<81xf32, #tpu.memory_space<smem>>
    %320 = vector.broadcast %319 : f32 to vector<32x64xf32>
    %321 = arith.mulf %320, %88 : vector<32x64xf32>
    %322 = arith.addf %318, %321 : vector<32x64xf32>
    %c44 = arith.constant 44 : index
    %323 = memref.load %arg3[%c44] : memref<81xf32, #tpu.memory_space<smem>>
    %324 = vector.broadcast %323 : f32 to vector<32x64xf32>
    %325 = arith.mulf %324, %91 : vector<32x64xf32>
    %326 = arith.addf %322, %325 : vector<32x64xf32>
    %c47 = arith.constant 47 : index
    %327 = memref.load %arg3[%c47] : memref<81xf32, #tpu.memory_space<smem>>
    %328 = vector.broadcast %327 : f32 to vector<32x64xf32>
    %329 = arith.mulf %328, %94 : vector<32x64xf32>
    %330 = arith.addf %326, %329 : vector<32x64xf32>
    %c50 = arith.constant 50 : index
    %331 = memref.load %arg3[%c50] : memref<81xf32, #tpu.memory_space<smem>>
    %332 = vector.broadcast %331 : f32 to vector<32x64xf32>
    %333 = arith.mulf %332, %97 : vector<32x64xf32>
    %334 = arith.addf %330, %333 : vector<32x64xf32>
    %c53 = arith.constant 53 : index
    %335 = memref.load %arg3[%c53] : memref<81xf32, #tpu.memory_space<smem>>
    %336 = vector.broadcast %335 : f32 to vector<32x64xf32>
    %337 = arith.mulf %336, %100 : vector<32x64xf32>
    %338 = arith.addf %334, %337 : vector<32x64xf32>
    %339 = vector.extract_strided_slice %2 {offsets = [2, 0, 0], sizes = [1, 64, 32], strides = [1, 1, 1]} : vector<3x64x32xf32> to vector<1x64x32xf32>
    %340 = vector.shape_cast %339 : vector<1x64x32xf32> to vector<64x32xf32>
    %cst_53 = arith.constant dense<0.000000e+00> : vector<32x32xf32>
    %341 = tpu.matmul %338, %340, %cst_53 {dimension_numbers = #tpu.dot_dimension_numbers<[1], [0], [0], [1], [0, 0, 1, 1], [], []>} : vector<32x64xf32>, vector<64x32xf32>, vector<32x32xf32> -> vector<32x32xf32>
    %342 = arith.addf %303, %341 : vector<32x32xf32>
    %c1_54 = arith.constant 1 : index
    %343 = memref.load %arg4[%c1_54] : memref<3xf32, #tpu.memory_space<smem>>
    %344 = vector.broadcast %343 : f32 to vector<32x32xf32>
    %345 = arith.addf %342, %344 : vector<32x32xf32>
    %cst_55 = arith.constant 5.000000e-01 : f32
    %346 = vector.broadcast %cst_55 : f32 to vector<32x32xf32>
    %347 = arith.mulf %346, %345 : vector<32x32xf32>
    %348 = math.tanh %347 : vector<32x32xf32>
    %cst_56 = arith.constant 5.000000e-01 : f32
    %349 = vector.broadcast %cst_56 : f32 to vector<32x32xf32>
    %350 = arith.mulf %349, %348 : vector<32x32xf32>
    %cst_57 = arith.constant 5.000000e-01 : f32
    %351 = vector.broadcast %cst_57 : f32 to vector<32x32xf32>
    %352 = arith.addf %350, %351 : vector<32x32xf32>
    %c54 = arith.constant 54 : index
    %353 = memref.load %arg3[%c54] : memref<81xf32, #tpu.memory_space<smem>>
    %354 = vector.broadcast %353 : f32 to vector<32x64xf32>
    %355 = arith.mulf %354, %76 : vector<32x64xf32>
    %c57 = arith.constant 57 : index
    %356 = memref.load %arg3[%c57] : memref<81xf32, #tpu.memory_space<smem>>
    %357 = vector.broadcast %356 : f32 to vector<32x64xf32>
    %358 = arith.mulf %357, %79 : vector<32x64xf32>
    %359 = arith.addf %355, %358 : vector<32x64xf32>
    %c60 = arith.constant 60 : index
    %360 = memref.load %arg3[%c60] : memref<81xf32, #tpu.memory_space<smem>>
    %361 = vector.broadcast %360 : f32 to vector<32x64xf32>
    %362 = arith.mulf %361, %82 : vector<32x64xf32>
    %363 = arith.addf %359, %362 : vector<32x64xf32>
    %c63 = arith.constant 63 : index
    %364 = memref.load %arg3[%c63] : memref<81xf32, #tpu.memory_space<smem>>
    %365 = vector.broadcast %364 : f32 to vector<32x64xf32>
    %366 = arith.mulf %365, %85 : vector<32x64xf32>
    %367 = arith.addf %363, %366 : vector<32x64xf32>
    %c66 = arith.constant 66 : index
    %368 = memref.load %arg3[%c66] : memref<81xf32, #tpu.memory_space<smem>>
    %369 = vector.broadcast %368 : f32 to vector<32x64xf32>
    %370 = arith.mulf %369, %88 : vector<32x64xf32>
    %371 = arith.addf %367, %370 : vector<32x64xf32>
    %c69 = arith.constant 69 : index
    %372 = memref.load %arg3[%c69] : memref<81xf32, #tpu.memory_space<smem>>
    %373 = vector.broadcast %372 : f32 to vector<32x64xf32>
    %374 = arith.mulf %373, %91 : vector<32x64xf32>
    %375 = arith.addf %371, %374 : vector<32x64xf32>
    %c72 = arith.constant 72 : index
    %376 = memref.load %arg3[%c72] : memref<81xf32, #tpu.memory_space<smem>>
    %377 = vector.broadcast %376 : f32 to vector<32x64xf32>
    %378 = arith.mulf %377, %94 : vector<32x64xf32>
    %379 = arith.addf %375, %378 : vector<32x64xf32>
    %c75 = arith.constant 75 : index
    %380 = memref.load %arg3[%c75] : memref<81xf32, #tpu.memory_space<smem>>
    %381 = vector.broadcast %380 : f32 to vector<32x64xf32>
    %382 = arith.mulf %381, %97 : vector<32x64xf32>
    %383 = arith.addf %379, %382 : vector<32x64xf32>
    %c78 = arith.constant 78 : index
    %384 = memref.load %arg3[%c78] : memref<81xf32, #tpu.memory_space<smem>>
    %385 = vector.broadcast %384 : f32 to vector<32x64xf32>
    %386 = arith.mulf %385, %100 : vector<32x64xf32>
    %387 = arith.addf %383, %386 : vector<32x64xf32>
    %388 = vector.extract_strided_slice %2 {offsets = [0, 0, 0], sizes = [1, 64, 32], strides = [1, 1, 1]} : vector<3x64x32xf32> to vector<1x64x32xf32>
    %389 = vector.shape_cast %388 : vector<1x64x32xf32> to vector<64x32xf32>
    %cst_58 = arith.constant dense<0.000000e+00> : vector<32x32xf32>
    %390 = tpu.matmul %387, %389, %cst_58 {dimension_numbers = #tpu.dot_dimension_numbers<[1], [0], [0], [1], [0, 0, 1, 1], [], []>} : vector<32x64xf32>, vector<64x32xf32>, vector<32x32xf32> -> vector<32x32xf32>
    %c55 = arith.constant 55 : index
    %391 = memref.load %arg3[%c55] : memref<81xf32, #tpu.memory_space<smem>>
    %392 = vector.broadcast %391 : f32 to vector<32x64xf32>
    %393 = arith.mulf %392, %76 : vector<32x64xf32>
    %c58 = arith.constant 58 : index
    %394 = memref.load %arg3[%c58] : memref<81xf32, #tpu.memory_space<smem>>
    %395 = vector.broadcast %394 : f32 to vector<32x64xf32>
    %396 = arith.mulf %395, %79 : vector<32x64xf32>
    %397 = arith.addf %393, %396 : vector<32x64xf32>
    %c61 = arith.constant 61 : index
    %398 = memref.load %arg3[%c61] : memref<81xf32, #tpu.memory_space<smem>>
    %399 = vector.broadcast %398 : f32 to vector<32x64xf32>
    %400 = arith.mulf %399, %82 : vector<32x64xf32>
    %401 = arith.addf %397, %400 : vector<32x64xf32>
    %c64 = arith.constant 64 : index
    %402 = memref.load %arg3[%c64] : memref<81xf32, #tpu.memory_space<smem>>
    %403 = vector.broadcast %402 : f32 to vector<32x64xf32>
    %404 = arith.mulf %403, %85 : vector<32x64xf32>
    %405 = arith.addf %401, %404 : vector<32x64xf32>
    %c67 = arith.constant 67 : index
    %406 = memref.load %arg3[%c67] : memref<81xf32, #tpu.memory_space<smem>>
    %407 = vector.broadcast %406 : f32 to vector<32x64xf32>
    %408 = arith.mulf %407, %88 : vector<32x64xf32>
    %409 = arith.addf %405, %408 : vector<32x64xf32>
    %c70 = arith.constant 70 : index
    %410 = memref.load %arg3[%c70] : memref<81xf32, #tpu.memory_space<smem>>
    %411 = vector.broadcast %410 : f32 to vector<32x64xf32>
    %412 = arith.mulf %411, %91 : vector<32x64xf32>
    %413 = arith.addf %409, %412 : vector<32x64xf32>
    %c73 = arith.constant 73 : index
    %414 = memref.load %arg3[%c73] : memref<81xf32, #tpu.memory_space<smem>>
    %415 = vector.broadcast %414 : f32 to vector<32x64xf32>
    %416 = arith.mulf %415, %94 : vector<32x64xf32>
    %417 = arith.addf %413, %416 : vector<32x64xf32>
    %c76 = arith.constant 76 : index
    %418 = memref.load %arg3[%c76] : memref<81xf32, #tpu.memory_space<smem>>
    %419 = vector.broadcast %418 : f32 to vector<32x64xf32>
    %420 = arith.mulf %419, %97 : vector<32x64xf32>
    %421 = arith.addf %417, %420 : vector<32x64xf32>
    %c79 = arith.constant 79 : index
    %422 = memref.load %arg3[%c79] : memref<81xf32, #tpu.memory_space<smem>>
    %423 = vector.broadcast %422 : f32 to vector<32x64xf32>
    %424 = arith.mulf %423, %100 : vector<32x64xf32>
    %425 = arith.addf %421, %424 : vector<32x64xf32>
    %426 = vector.extract_strided_slice %2 {offsets = [1, 0, 0], sizes = [1, 64, 32], strides = [1, 1, 1]} : vector<3x64x32xf32> to vector<1x64x32xf32>
    %427 = vector.shape_cast %426 : vector<1x64x32xf32> to vector<64x32xf32>
    %cst_59 = arith.constant dense<0.000000e+00> : vector<32x32xf32>
    %428 = tpu.matmul %425, %427, %cst_59 {dimension_numbers = #tpu.dot_dimension_numbers<[1], [0], [0], [1], [0, 0, 1, 1], [], []>} : vector<32x64xf32>, vector<64x32xf32>, vector<32x32xf32> -> vector<32x32xf32>
    %429 = arith.addf %390, %428 : vector<32x32xf32>
    %c56 = arith.constant 56 : index
    %430 = memref.load %arg3[%c56] : memref<81xf32, #tpu.memory_space<smem>>
    %431 = vector.broadcast %430 : f32 to vector<32x64xf32>
    %432 = arith.mulf %431, %76 : vector<32x64xf32>
    %c59 = arith.constant 59 : index
    %433 = memref.load %arg3[%c59] : memref<81xf32, #tpu.memory_space<smem>>
    %434 = vector.broadcast %433 : f32 to vector<32x64xf32>
    %435 = arith.mulf %434, %79 : vector<32x64xf32>
    %436 = arith.addf %432, %435 : vector<32x64xf32>
    %c62 = arith.constant 62 : index
    %437 = memref.load %arg3[%c62] : memref<81xf32, #tpu.memory_space<smem>>
    %438 = vector.broadcast %437 : f32 to vector<32x64xf32>
    %439 = arith.mulf %438, %82 : vector<32x64xf32>
    %440 = arith.addf %436, %439 : vector<32x64xf32>
    %c65 = arith.constant 65 : index
    %441 = memref.load %arg3[%c65] : memref<81xf32, #tpu.memory_space<smem>>
    %442 = vector.broadcast %441 : f32 to vector<32x64xf32>
    %443 = arith.mulf %442, %85 : vector<32x64xf32>
    %444 = arith.addf %440, %443 : vector<32x64xf32>
    %c68 = arith.constant 68 : index
    %445 = memref.load %arg3[%c68] : memref<81xf32, #tpu.memory_space<smem>>
    %446 = vector.broadcast %445 : f32 to vector<32x64xf32>
    %447 = arith.mulf %446, %88 : vector<32x64xf32>
    %448 = arith.addf %444, %447 : vector<32x64xf32>
    %c71 = arith.constant 71 : index
    %449 = memref.load %arg3[%c71] : memref<81xf32, #tpu.memory_space<smem>>
    %450 = vector.broadcast %449 : f32 to vector<32x64xf32>
    %451 = arith.mulf %450, %91 : vector<32x64xf32>
    %452 = arith.addf %448, %451 : vector<32x64xf32>
    %c74 = arith.constant 74 : index
    %453 = memref.load %arg3[%c74] : memref<81xf32, #tpu.memory_space<smem>>
    %454 = vector.broadcast %453 : f32 to vector<32x64xf32>
    %455 = arith.mulf %454, %94 : vector<32x64xf32>
    %456 = arith.addf %452, %455 : vector<32x64xf32>
    %c77 = arith.constant 77 : index
    %457 = memref.load %arg3[%c77] : memref<81xf32, #tpu.memory_space<smem>>
    %458 = vector.broadcast %457 : f32 to vector<32x64xf32>
    %459 = arith.mulf %458, %97 : vector<32x64xf32>
    %460 = arith.addf %456, %459 : vector<32x64xf32>
    %c80 = arith.constant 80 : index
    %461 = memref.load %arg3[%c80] : memref<81xf32, #tpu.memory_space<smem>>
    %462 = vector.broadcast %461 : f32 to vector<32x64xf32>
    %463 = arith.mulf %462, %100 : vector<32x64xf32>
    %464 = arith.addf %460, %463 : vector<32x64xf32>
    %465 = vector.extract_strided_slice %2 {offsets = [2, 0, 0], sizes = [1, 64, 32], strides = [1, 1, 1]} : vector<3x64x32xf32> to vector<1x64x32xf32>
    %466 = vector.shape_cast %465 : vector<1x64x32xf32> to vector<64x32xf32>
    %cst_60 = arith.constant dense<0.000000e+00> : vector<32x32xf32>
    %467 = tpu.matmul %464, %466, %cst_60 {dimension_numbers = #tpu.dot_dimension_numbers<[1], [0], [0], [1], [0, 0, 1, 1], [], []>} : vector<32x64xf32>, vector<64x32xf32>, vector<32x32xf32> -> vector<32x32xf32>
    %468 = arith.addf %429, %467 : vector<32x32xf32>
    %c2_61 = arith.constant 2 : index
    %469 = memref.load %arg4[%c2_61] : memref<3xf32, #tpu.memory_space<smem>>
    %470 = vector.broadcast %469 : f32 to vector<32x32xf32>
    %471 = arith.addf %468, %470 : vector<32x32xf32>
    %cst_62 = arith.constant 5.000000e-01 : f32
    %472 = vector.broadcast %cst_62 : f32 to vector<32x32xf32>
    %473 = arith.mulf %472, %471 : vector<32x32xf32>
    %474 = math.tanh %473 : vector<32x32xf32>
    %cst_63 = arith.constant 5.000000e-01 : f32
    %475 = vector.broadcast %cst_63 : f32 to vector<32x32xf32>
    %476 = arith.mulf %475, %474 : vector<32x32xf32>
    %cst_64 = arith.constant 5.000000e-01 : f32
    %477 = vector.broadcast %cst_64 : f32 to vector<32x32xf32>
    %478 = arith.addf %476, %477 : vector<32x32xf32>
    %479 = vector.extract_strided_slice %3 {offsets = [0, 0, 0], sizes = [1, 16, 32], strides = [1, 1, 1]} : vector<3x16x32xf32> to vector<1x16x32xf32>
    %480 = vector.shape_cast %479 : vector<1x16x32xf32> to vector<16x32xf32>
    %cst_65 = arith.constant dense<0.000000e+00> : vector<16x32xf32>
    %481 = tpu.matmul %480, %226, %cst_65 {dimension_numbers = #tpu.dot_dimension_numbers<[1], [0], [0], [1], [0, 0, 1, 1], [], []>} : vector<16x32xf32>, vector<32x32xf32>, vector<16x32xf32> -> vector<16x32xf32>
    %482 = vector.extract_strided_slice %3 {offsets = [1, 0, 0], sizes = [1, 16, 32], strides = [1, 1, 1]} : vector<3x16x32xf32> to vector<1x16x32xf32>
    %483 = vector.shape_cast %482 : vector<1x16x32xf32> to vector<16x32xf32>
    %cst_66 = arith.constant dense<0.000000e+00> : vector<16x32xf32>
    %484 = tpu.matmul %483, %226, %cst_66 {dimension_numbers = #tpu.dot_dimension_numbers<[1], [0], [0], [1], [0, 0, 1, 1], [], []>} : vector<16x32xf32>, vector<32x32xf32>, vector<16x32xf32> -> vector<16x32xf32>
    %485 = vector.extract_strided_slice %3 {offsets = [2, 0, 0], sizes = [1, 16, 32], strides = [1, 1, 1]} : vector<3x16x32xf32> to vector<1x16x32xf32>
    %486 = vector.shape_cast %485 : vector<1x16x32xf32> to vector<16x32xf32>
    %cst_67 = arith.constant dense<0.000000e+00> : vector<16x32xf32>
    %487 = tpu.matmul %486, %226, %cst_67 {dimension_numbers = #tpu.dot_dimension_numbers<[1], [0], [0], [1], [0, 0, 1, 1], [], []>} : vector<16x32xf32>, vector<32x32xf32>, vector<16x32xf32> -> vector<16x32xf32>
    %488 = vector.extract_strided_slice %3 {offsets = [0, 0, 0], sizes = [1, 16, 32], strides = [1, 1, 1]} : vector<3x16x32xf32> to vector<1x16x32xf32>
    %489 = vector.shape_cast %488 : vector<1x16x32xf32> to vector<16x32xf32>
    %cst_68 = arith.constant dense<0.000000e+00> : vector<16x32xf32>
    %490 = tpu.matmul %489, %352, %cst_68 {dimension_numbers = #tpu.dot_dimension_numbers<[1], [0], [0], [1], [0, 0, 1, 1], [], []>} : vector<16x32xf32>, vector<32x32xf32>, vector<16x32xf32> -> vector<16x32xf32>
    %491 = vector.extract_strided_slice %3 {offsets = [1, 0, 0], sizes = [1, 16, 32], strides = [1, 1, 1]} : vector<3x16x32xf32> to vector<1x16x32xf32>
    %492 = vector.shape_cast %491 : vector<1x16x32xf32> to vector<16x32xf32>
    %cst_69 = arith.constant dense<0.000000e+00> : vector<16x32xf32>
    %493 = tpu.matmul %492, %352, %cst_69 {dimension_numbers = #tpu.dot_dimension_numbers<[1], [0], [0], [1], [0, 0, 1, 1], [], []>} : vector<16x32xf32>, vector<32x32xf32>, vector<16x32xf32> -> vector<16x32xf32>
    %494 = vector.extract_strided_slice %3 {offsets = [2, 0, 0], sizes = [1, 16, 32], strides = [1, 1, 1]} : vector<3x16x32xf32> to vector<1x16x32xf32>
    %495 = vector.shape_cast %494 : vector<1x16x32xf32> to vector<16x32xf32>
    %cst_70 = arith.constant dense<0.000000e+00> : vector<16x32xf32>
    %496 = tpu.matmul %495, %352, %cst_70 {dimension_numbers = #tpu.dot_dimension_numbers<[1], [0], [0], [1], [0, 0, 1, 1], [], []>} : vector<16x32xf32>, vector<32x32xf32>, vector<16x32xf32> -> vector<16x32xf32>
    %497 = vector.extract_strided_slice %3 {offsets = [0, 0, 0], sizes = [1, 16, 32], strides = [1, 1, 1]} : vector<3x16x32xf32> to vector<1x16x32xf32>
    %498 = vector.shape_cast %497 : vector<1x16x32xf32> to vector<16x32xf32>
    %cst_71 = arith.constant dense<0.000000e+00> : vector<16x32xf32>
    %499 = tpu.matmul %498, %478, %cst_71 {dimension_numbers = #tpu.dot_dimension_numbers<[1], [0], [0], [1], [0, 0, 1, 1], [], []>} : vector<16x32xf32>, vector<32x32xf32>, vector<16x32xf32> -> vector<16x32xf32>
    %500 = vector.extract_strided_slice %3 {offsets = [1, 0, 0], sizes = [1, 16, 32], strides = [1, 1, 1]} : vector<3x16x32xf32> to vector<1x16x32xf32>
    %501 = vector.shape_cast %500 : vector<1x16x32xf32> to vector<16x32xf32>
    %cst_72 = arith.constant dense<0.000000e+00> : vector<16x32xf32>
    %502 = tpu.matmul %501, %478, %cst_72 {dimension_numbers = #tpu.dot_dimension_numbers<[1], [0], [0], [1], [0, 0, 1, 1], [], []>} : vector<16x32xf32>, vector<32x32xf32>, vector<16x32xf32> -> vector<16x32xf32>
    %503 = vector.extract_strided_slice %3 {offsets = [2, 0, 0], sizes = [1, 16, 32], strides = [1, 1, 1]} : vector<3x16x32xf32> to vector<1x16x32xf32>
    %504 = vector.shape_cast %503 : vector<1x16x32xf32> to vector<16x32xf32>
    %cst_73 = arith.constant dense<0.000000e+00> : vector<16x32xf32>
    %505 = tpu.matmul %504, %478, %cst_73 {dimension_numbers = #tpu.dot_dimension_numbers<[1], [0], [0], [1], [0, 0, 1, 1], [], []>} : vector<16x32xf32>, vector<32x32xf32>, vector<16x32xf32> -> vector<16x32xf32>
    %c0_74 = arith.constant 0 : index
    %506 = memref.load %arg5[%c0_74] : memref<81xf32, #tpu.memory_space<smem>>
    %507 = vector.broadcast %506 : f32 to vector<16x32xf32>
    %508 = arith.mulf %507, %481 : vector<16x32xf32>
    %c3_75 = arith.constant 3 : index
    %509 = memref.load %arg5[%c3_75] : memref<81xf32, #tpu.memory_space<smem>>
    %510 = vector.broadcast %509 : f32 to vector<16x32xf32>
    %511 = arith.mulf %510, %484 : vector<16x32xf32>
    %512 = arith.addf %508, %511 : vector<16x32xf32>
    %c6_76 = arith.constant 6 : index
    %513 = memref.load %arg5[%c6_76] : memref<81xf32, #tpu.memory_space<smem>>
    %514 = vector.broadcast %513 : f32 to vector<16x32xf32>
    %515 = arith.mulf %514, %487 : vector<16x32xf32>
    %516 = arith.addf %512, %515 : vector<16x32xf32>
    %c9_77 = arith.constant 9 : index
    %517 = memref.load %arg5[%c9_77] : memref<81xf32, #tpu.memory_space<smem>>
    %518 = vector.broadcast %517 : f32 to vector<16x32xf32>
    %519 = arith.mulf %518, %490 : vector<16x32xf32>
    %520 = arith.addf %516, %519 : vector<16x32xf32>
    %c12_78 = arith.constant 12 : index
    %521 = memref.load %arg5[%c12_78] : memref<81xf32, #tpu.memory_space<smem>>
    %522 = vector.broadcast %521 : f32 to vector<16x32xf32>
    %523 = arith.mulf %522, %493 : vector<16x32xf32>
    %524 = arith.addf %520, %523 : vector<16x32xf32>
    %c15_79 = arith.constant 15 : index
    %525 = memref.load %arg5[%c15_79] : memref<81xf32, #tpu.memory_space<smem>>
    %526 = vector.broadcast %525 : f32 to vector<16x32xf32>
    %527 = arith.mulf %526, %496 : vector<16x32xf32>
    %528 = arith.addf %524, %527 : vector<16x32xf32>
    %c18_80 = arith.constant 18 : index
    %529 = memref.load %arg5[%c18_80] : memref<81xf32, #tpu.memory_space<smem>>
    %530 = vector.broadcast %529 : f32 to vector<16x32xf32>
    %531 = arith.mulf %530, %499 : vector<16x32xf32>
    %532 = arith.addf %528, %531 : vector<16x32xf32>
    %c21_81 = arith.constant 21 : index
    %533 = memref.load %arg5[%c21_81] : memref<81xf32, #tpu.memory_space<smem>>
    %534 = vector.broadcast %533 : f32 to vector<16x32xf32>
    %535 = arith.mulf %534, %502 : vector<16x32xf32>
    %536 = arith.addf %532, %535 : vector<16x32xf32>
    %c24_82 = arith.constant 24 : index
    %537 = memref.load %arg5[%c24_82] : memref<81xf32, #tpu.memory_space<smem>>
    %538 = vector.broadcast %537 : f32 to vector<16x32xf32>
    %539 = arith.mulf %538, %505 : vector<16x32xf32>
    %540 = arith.addf %536, %539 : vector<16x32xf32>
    %541 = vector.extract_strided_slice %4 {offsets = [0, 0, 0], sizes = [1, 32, 16], strides = [1, 1, 1]} : vector<3x32x16xf32> to vector<1x32x16xf32>
    %542 = vector.shape_cast %541 : vector<1x32x16xf32> to vector<32x16xf32>
    %cst_83 = arith.constant dense<0.000000e+00> : vector<16x16xf32>
    %543 = tpu.matmul %540, %542, %cst_83 {dimension_numbers = #tpu.dot_dimension_numbers<[1], [0], [0], [1], [0, 0, 1, 1], [], []>} : vector<16x32xf32>, vector<32x16xf32>, vector<16x16xf32> -> vector<16x16xf32>
    %c1_84 = arith.constant 1 : index
    %544 = memref.load %arg5[%c1_84] : memref<81xf32, #tpu.memory_space<smem>>
    %545 = vector.broadcast %544 : f32 to vector<16x32xf32>
    %546 = arith.mulf %545, %481 : vector<16x32xf32>
    %c4_85 = arith.constant 4 : index
    %547 = memref.load %arg5[%c4_85] : memref<81xf32, #tpu.memory_space<smem>>
    %548 = vector.broadcast %547 : f32 to vector<16x32xf32>
    %549 = arith.mulf %548, %484 : vector<16x32xf32>
    %550 = arith.addf %546, %549 : vector<16x32xf32>
    %c7_86 = arith.constant 7 : index
    %551 = memref.load %arg5[%c7_86] : memref<81xf32, #tpu.memory_space<smem>>
    %552 = vector.broadcast %551 : f32 to vector<16x32xf32>
    %553 = arith.mulf %552, %487 : vector<16x32xf32>
    %554 = arith.addf %550, %553 : vector<16x32xf32>
    %c10_87 = arith.constant 10 : index
    %555 = memref.load %arg5[%c10_87] : memref<81xf32, #tpu.memory_space<smem>>
    %556 = vector.broadcast %555 : f32 to vector<16x32xf32>
    %557 = arith.mulf %556, %490 : vector<16x32xf32>
    %558 = arith.addf %554, %557 : vector<16x32xf32>
    %c13_88 = arith.constant 13 : index
    %559 = memref.load %arg5[%c13_88] : memref<81xf32, #tpu.memory_space<smem>>
    %560 = vector.broadcast %559 : f32 to vector<16x32xf32>
    %561 = arith.mulf %560, %493 : vector<16x32xf32>
    %562 = arith.addf %558, %561 : vector<16x32xf32>
    %c16_89 = arith.constant 16 : index
    %563 = memref.load %arg5[%c16_89] : memref<81xf32, #tpu.memory_space<smem>>
    %564 = vector.broadcast %563 : f32 to vector<16x32xf32>
    %565 = arith.mulf %564, %496 : vector<16x32xf32>
    %566 = arith.addf %562, %565 : vector<16x32xf32>
    %c19_90 = arith.constant 19 : index
    %567 = memref.load %arg5[%c19_90] : memref<81xf32, #tpu.memory_space<smem>>
    %568 = vector.broadcast %567 : f32 to vector<16x32xf32>
    %569 = arith.mulf %568, %499 : vector<16x32xf32>
    %570 = arith.addf %566, %569 : vector<16x32xf32>
    %c22_91 = arith.constant 22 : index
    %571 = memref.load %arg5[%c22_91] : memref<81xf32, #tpu.memory_space<smem>>
    %572 = vector.broadcast %571 : f32 to vector<16x32xf32>
    %573 = arith.mulf %572, %502 : vector<16x32xf32>
    %574 = arith.addf %570, %573 : vector<16x32xf32>
    %c25_92 = arith.constant 25 : index
    %575 = memref.load %arg5[%c25_92] : memref<81xf32, #tpu.memory_space<smem>>
    %576 = vector.broadcast %575 : f32 to vector<16x32xf32>
    %577 = arith.mulf %576, %505 : vector<16x32xf32>
    %578 = arith.addf %574, %577 : vector<16x32xf32>
    %579 = vector.extract_strided_slice %4 {offsets = [1, 0, 0], sizes = [1, 32, 16], strides = [1, 1, 1]} : vector<3x32x16xf32> to vector<1x32x16xf32>
    %580 = vector.shape_cast %579 : vector<1x32x16xf32> to vector<32x16xf32>
    %cst_93 = arith.constant dense<0.000000e+00> : vector<16x16xf32>
    %581 = tpu.matmul %578, %580, %cst_93 {dimension_numbers = #tpu.dot_dimension_numbers<[1], [0], [0], [1], [0, 0, 1, 1], [], []>} : vector<16x32xf32>, vector<32x16xf32>, vector<16x16xf32> -> vector<16x16xf32>
    %582 = arith.addf %543, %581 : vector<16x16xf32>
    %c2_94 = arith.constant 2 : index
    %583 = memref.load %arg5[%c2_94] : memref<81xf32, #tpu.memory_space<smem>>
    %584 = vector.broadcast %583 : f32 to vector<16x32xf32>
    %585 = arith.mulf %584, %481 : vector<16x32xf32>
    %c5_95 = arith.constant 5 : index
    %586 = memref.load %arg5[%c5_95] : memref<81xf32, #tpu.memory_space<smem>>
    %587 = vector.broadcast %586 : f32 to vector<16x32xf32>
    %588 = arith.mulf %587, %484 : vector<16x32xf32>
    %589 = arith.addf %585, %588 : vector<16x32xf32>
    %c8_96 = arith.constant 8 : index
    %590 = memref.load %arg5[%c8_96] : memref<81xf32, #tpu.memory_space<smem>>
    %591 = vector.broadcast %590 : f32 to vector<16x32xf32>
    %592 = arith.mulf %591, %487 : vector<16x32xf32>
    %593 = arith.addf %589, %592 : vector<16x32xf32>
    %c11_97 = arith.constant 11 : index
    %594 = memref.load %arg5[%c11_97] : memref<81xf32, #tpu.memory_space<smem>>
    %595 = vector.broadcast %594 : f32 to vector<16x32xf32>
    %596 = arith.mulf %595, %490 : vector<16x32xf32>
    %597 = arith.addf %593, %596 : vector<16x32xf32>
    %c14_98 = arith.constant 14 : index
    %598 = memref.load %arg5[%c14_98] : memref<81xf32, #tpu.memory_space<smem>>
    %599 = vector.broadcast %598 : f32 to vector<16x32xf32>
    %600 = arith.mulf %599, %493 : vector<16x32xf32>
    %601 = arith.addf %597, %600 : vector<16x32xf32>
    %c17_99 = arith.constant 17 : index
    %602 = memref.load %arg5[%c17_99] : memref<81xf32, #tpu.memory_space<smem>>
    %603 = vector.broadcast %602 : f32 to vector<16x32xf32>
    %604 = arith.mulf %603, %496 : vector<16x32xf32>
    %605 = arith.addf %601, %604 : vector<16x32xf32>
    %c20_100 = arith.constant 20 : index
    %606 = memref.load %arg5[%c20_100] : memref<81xf32, #tpu.memory_space<smem>>
    %607 = vector.broadcast %606 : f32 to vector<16x32xf32>
    %608 = arith.mulf %607, %499 : vector<16x32xf32>
    %609 = arith.addf %605, %608 : vector<16x32xf32>
    %c23_101 = arith.constant 23 : index
    %610 = memref.load %arg5[%c23_101] : memref<81xf32, #tpu.memory_space<smem>>
    %611 = vector.broadcast %610 : f32 to vector<16x32xf32>
    %612 = arith.mulf %611, %502 : vector<16x32xf32>
    %613 = arith.addf %609, %612 : vector<16x32xf32>
    %c26_102 = arith.constant 26 : index
    %614 = memref.load %arg5[%c26_102] : memref<81xf32, #tpu.memory_space<smem>>
    %615 = vector.broadcast %614 : f32 to vector<16x32xf32>
    %616 = arith.mulf %615, %505 : vector<16x32xf32>
    %617 = arith.addf %613, %616 : vector<16x32xf32>
    %618 = vector.extract_strided_slice %4 {offsets = [2, 0, 0], sizes = [1, 32, 16], strides = [1, 1, 1]} : vector<3x32x16xf32> to vector<1x32x16xf32>
    %619 = vector.shape_cast %618 : vector<1x32x16xf32> to vector<32x16xf32>
    %cst_103 = arith.constant dense<0.000000e+00> : vector<16x16xf32>
    %620 = tpu.matmul %617, %619, %cst_103 {dimension_numbers = #tpu.dot_dimension_numbers<[1], [0], [0], [1], [0, 0, 1, 1], [], []>} : vector<16x32xf32>, vector<32x16xf32>, vector<16x16xf32> -> vector<16x16xf32>
    %621 = arith.addf %582, %620 : vector<16x16xf32>
    %c0_104 = arith.constant 0 : index
    %622 = memref.load %arg6[%c0_104] : memref<3xf32, #tpu.memory_space<smem>>
    %623 = vector.broadcast %622 : f32 to vector<16x16xf32>
    %624 = arith.addf %621, %623 : vector<16x16xf32>
    %cst_105 = arith.constant 5.000000e-01 : f32
    %625 = vector.broadcast %cst_105 : f32 to vector<16x16xf32>
    %626 = arith.mulf %625, %624 : vector<16x16xf32>
    %627 = math.tanh %626 : vector<16x16xf32>
    %cst_106 = arith.constant 5.000000e-01 : f32
    %628 = vector.broadcast %cst_106 : f32 to vector<16x16xf32>
    %629 = arith.mulf %628, %627 : vector<16x16xf32>
    %cst_107 = arith.constant 5.000000e-01 : f32
    %630 = vector.broadcast %cst_107 : f32 to vector<16x16xf32>
    %631 = arith.addf %629, %630 : vector<16x16xf32>
    %c27_108 = arith.constant 27 : index
    %632 = memref.load %arg5[%c27_108] : memref<81xf32, #tpu.memory_space<smem>>
    %633 = vector.broadcast %632 : f32 to vector<16x32xf32>
    %634 = arith.mulf %633, %481 : vector<16x32xf32>
    %c30_109 = arith.constant 30 : index
    %635 = memref.load %arg5[%c30_109] : memref<81xf32, #tpu.memory_space<smem>>
    %636 = vector.broadcast %635 : f32 to vector<16x32xf32>
    %637 = arith.mulf %636, %484 : vector<16x32xf32>
    %638 = arith.addf %634, %637 : vector<16x32xf32>
    %c33_110 = arith.constant 33 : index
    %639 = memref.load %arg5[%c33_110] : memref<81xf32, #tpu.memory_space<smem>>
    %640 = vector.broadcast %639 : f32 to vector<16x32xf32>
    %641 = arith.mulf %640, %487 : vector<16x32xf32>
    %642 = arith.addf %638, %641 : vector<16x32xf32>
    %c36_111 = arith.constant 36 : index
    %643 = memref.load %arg5[%c36_111] : memref<81xf32, #tpu.memory_space<smem>>
    %644 = vector.broadcast %643 : f32 to vector<16x32xf32>
    %645 = arith.mulf %644, %490 : vector<16x32xf32>
    %646 = arith.addf %642, %645 : vector<16x32xf32>
    %c39_112 = arith.constant 39 : index
    %647 = memref.load %arg5[%c39_112] : memref<81xf32, #tpu.memory_space<smem>>
    %648 = vector.broadcast %647 : f32 to vector<16x32xf32>
    %649 = arith.mulf %648, %493 : vector<16x32xf32>
    %650 = arith.addf %646, %649 : vector<16x32xf32>
    %c42_113 = arith.constant 42 : index
    %651 = memref.load %arg5[%c42_113] : memref<81xf32, #tpu.memory_space<smem>>
    %652 = vector.broadcast %651 : f32 to vector<16x32xf32>
    %653 = arith.mulf %652, %496 : vector<16x32xf32>
    %654 = arith.addf %650, %653 : vector<16x32xf32>
    %c45_114 = arith.constant 45 : index
    %655 = memref.load %arg5[%c45_114] : memref<81xf32, #tpu.memory_space<smem>>
    %656 = vector.broadcast %655 : f32 to vector<16x32xf32>
    %657 = arith.mulf %656, %499 : vector<16x32xf32>
    %658 = arith.addf %654, %657 : vector<16x32xf32>
    %c48_115 = arith.constant 48 : index
    %659 = memref.load %arg5[%c48_115] : memref<81xf32, #tpu.memory_space<smem>>
    %660 = vector.broadcast %659 : f32 to vector<16x32xf32>
    %661 = arith.mulf %660, %502 : vector<16x32xf32>
    %662 = arith.addf %658, %661 : vector<16x32xf32>
    %c51_116 = arith.constant 51 : index
    %663 = memref.load %arg5[%c51_116] : memref<81xf32, #tpu.memory_space<smem>>
    %664 = vector.broadcast %663 : f32 to vector<16x32xf32>
    %665 = arith.mulf %664, %505 : vector<16x32xf32>
    %666 = arith.addf %662, %665 : vector<16x32xf32>
    %667 = vector.extract_strided_slice %4 {offsets = [0, 0, 0], sizes = [1, 32, 16], strides = [1, 1, 1]} : vector<3x32x16xf32> to vector<1x32x16xf32>
    %668 = vector.shape_cast %667 : vector<1x32x16xf32> to vector<32x16xf32>
    %cst_117 = arith.constant dense<0.000000e+00> : vector<16x16xf32>
    %669 = tpu.matmul %666, %668, %cst_117 {dimension_numbers = #tpu.dot_dimension_numbers<[1], [0], [0], [1], [0, 0, 1, 1], [], []>} : vector<16x32xf32>, vector<32x16xf32>, vector<16x16xf32> -> vector<16x16xf32>
    %c28_118 = arith.constant 28 : index
    %670 = memref.load %arg5[%c28_118] : memref<81xf32, #tpu.memory_space<smem>>
    %671 = vector.broadcast %670 : f32 to vector<16x32xf32>
    %672 = arith.mulf %671, %481 : vector<16x32xf32>
    %c31_119 = arith.constant 31 : index
    %673 = memref.load %arg5[%c31_119] : memref<81xf32, #tpu.memory_space<smem>>
    %674 = vector.broadcast %673 : f32 to vector<16x32xf32>
    %675 = arith.mulf %674, %484 : vector<16x32xf32>
    %676 = arith.addf %672, %675 : vector<16x32xf32>
    %c34_120 = arith.constant 34 : index
    %677 = memref.load %arg5[%c34_120] : memref<81xf32, #tpu.memory_space<smem>>
    %678 = vector.broadcast %677 : f32 to vector<16x32xf32>
    %679 = arith.mulf %678, %487 : vector<16x32xf32>
    %680 = arith.addf %676, %679 : vector<16x32xf32>
    %c37_121 = arith.constant 37 : index
    %681 = memref.load %arg5[%c37_121] : memref<81xf32, #tpu.memory_space<smem>>
    %682 = vector.broadcast %681 : f32 to vector<16x32xf32>
    %683 = arith.mulf %682, %490 : vector<16x32xf32>
    %684 = arith.addf %680, %683 : vector<16x32xf32>
    %c40_122 = arith.constant 40 : index
    %685 = memref.load %arg5[%c40_122] : memref<81xf32, #tpu.memory_space<smem>>
    %686 = vector.broadcast %685 : f32 to vector<16x32xf32>
    %687 = arith.mulf %686, %493 : vector<16x32xf32>
    %688 = arith.addf %684, %687 : vector<16x32xf32>
    %c43_123 = arith.constant 43 : index
    %689 = memref.load %arg5[%c43_123] : memref<81xf32, #tpu.memory_space<smem>>
    %690 = vector.broadcast %689 : f32 to vector<16x32xf32>
    %691 = arith.mulf %690, %496 : vector<16x32xf32>
    %692 = arith.addf %688, %691 : vector<16x32xf32>
    %c46_124 = arith.constant 46 : index
    %693 = memref.load %arg5[%c46_124] : memref<81xf32, #tpu.memory_space<smem>>
    %694 = vector.broadcast %693 : f32 to vector<16x32xf32>
    %695 = arith.mulf %694, %499 : vector<16x32xf32>
    %696 = arith.addf %692, %695 : vector<16x32xf32>
    %c49_125 = arith.constant 49 : index
    %697 = memref.load %arg5[%c49_125] : memref<81xf32, #tpu.memory_space<smem>>
    %698 = vector.broadcast %697 : f32 to vector<16x32xf32>
    %699 = arith.mulf %698, %502 : vector<16x32xf32>
    %700 = arith.addf %696, %699 : vector<16x32xf32>
    %c52_126 = arith.constant 52 : index
    %701 = memref.load %arg5[%c52_126] : memref<81xf32, #tpu.memory_space<smem>>
    %702 = vector.broadcast %701 : f32 to vector<16x32xf32>
    %703 = arith.mulf %702, %505 : vector<16x32xf32>
    %704 = arith.addf %700, %703 : vector<16x32xf32>
    %705 = vector.extract_strided_slice %4 {offsets = [1, 0, 0], sizes = [1, 32, 16], strides = [1, 1, 1]} : vector<3x32x16xf32> to vector<1x32x16xf32>
    %706 = vector.shape_cast %705 : vector<1x32x16xf32> to vector<32x16xf32>
    %cst_127 = arith.constant dense<0.000000e+00> : vector<16x16xf32>
    %707 = tpu.matmul %704, %706, %cst_127 {dimension_numbers = #tpu.dot_dimension_numbers<[1], [0], [0], [1], [0, 0, 1, 1], [], []>} : vector<16x32xf32>, vector<32x16xf32>, vector<16x16xf32> -> vector<16x16xf32>
    %708 = arith.addf %669, %707 : vector<16x16xf32>
    %c29_128 = arith.constant 29 : index
    %709 = memref.load %arg5[%c29_128] : memref<81xf32, #tpu.memory_space<smem>>
    %710 = vector.broadcast %709 : f32 to vector<16x32xf32>
    %711 = arith.mulf %710, %481 : vector<16x32xf32>
    %c32_129 = arith.constant 32 : index
    %712 = memref.load %arg5[%c32_129] : memref<81xf32, #tpu.memory_space<smem>>
    %713 = vector.broadcast %712 : f32 to vector<16x32xf32>
    %714 = arith.mulf %713, %484 : vector<16x32xf32>
    %715 = arith.addf %711, %714 : vector<16x32xf32>
    %c35_130 = arith.constant 35 : index
    %716 = memref.load %arg5[%c35_130] : memref<81xf32, #tpu.memory_space<smem>>
    %717 = vector.broadcast %716 : f32 to vector<16x32xf32>
    %718 = arith.mulf %717, %487 : vector<16x32xf32>
    %719 = arith.addf %715, %718 : vector<16x32xf32>
    %c38_131 = arith.constant 38 : index
    %720 = memref.load %arg5[%c38_131] : memref<81xf32, #tpu.memory_space<smem>>
    %721 = vector.broadcast %720 : f32 to vector<16x32xf32>
    %722 = arith.mulf %721, %490 : vector<16x32xf32>
    %723 = arith.addf %719, %722 : vector<16x32xf32>
    %c41_132 = arith.constant 41 : index
    %724 = memref.load %arg5[%c41_132] : memref<81xf32, #tpu.memory_space<smem>>
    %725 = vector.broadcast %724 : f32 to vector<16x32xf32>
    %726 = arith.mulf %725, %493 : vector<16x32xf32>
    %727 = arith.addf %723, %726 : vector<16x32xf32>
    %c44_133 = arith.constant 44 : index
    %728 = memref.load %arg5[%c44_133] : memref<81xf32, #tpu.memory_space<smem>>
    %729 = vector.broadcast %728 : f32 to vector<16x32xf32>
    %730 = arith.mulf %729, %496 : vector<16x32xf32>
    %731 = arith.addf %727, %730 : vector<16x32xf32>
    %c47_134 = arith.constant 47 : index
    %732 = memref.load %arg5[%c47_134] : memref<81xf32, #tpu.memory_space<smem>>
    %733 = vector.broadcast %732 : f32 to vector<16x32xf32>
    %734 = arith.mulf %733, %499 : vector<16x32xf32>
    %735 = arith.addf %731, %734 : vector<16x32xf32>
    %c50_135 = arith.constant 50 : index
    %736 = memref.load %arg5[%c50_135] : memref<81xf32, #tpu.memory_space<smem>>
    %737 = vector.broadcast %736 : f32 to vector<16x32xf32>
    %738 = arith.mulf %737, %502 : vector<16x32xf32>
    %739 = arith.addf %735, %738 : vector<16x32xf32>
    %c53_136 = arith.constant 53 : index
    %740 = memref.load %arg5[%c53_136] : memref<81xf32, #tpu.memory_space<smem>>
    %741 = vector.broadcast %740 : f32 to vector<16x32xf32>
    %742 = arith.mulf %741, %505 : vector<16x32xf32>
    %743 = arith.addf %739, %742 : vector<16x32xf32>
    %744 = vector.extract_strided_slice %4 {offsets = [2, 0, 0], sizes = [1, 32, 16], strides = [1, 1, 1]} : vector<3x32x16xf32> to vector<1x32x16xf32>
    %745 = vector.shape_cast %744 : vector<1x32x16xf32> to vector<32x16xf32>
    %cst_137 = arith.constant dense<0.000000e+00> : vector<16x16xf32>
    %746 = tpu.matmul %743, %745, %cst_137 {dimension_numbers = #tpu.dot_dimension_numbers<[1], [0], [0], [1], [0, 0, 1, 1], [], []>} : vector<16x32xf32>, vector<32x16xf32>, vector<16x16xf32> -> vector<16x16xf32>
    %747 = arith.addf %708, %746 : vector<16x16xf32>
    %c1_138 = arith.constant 1 : index
    %748 = memref.load %arg6[%c1_138] : memref<3xf32, #tpu.memory_space<smem>>
    %749 = vector.broadcast %748 : f32 to vector<16x16xf32>
    %750 = arith.addf %747, %749 : vector<16x16xf32>
    %cst_139 = arith.constant 5.000000e-01 : f32
    %751 = vector.broadcast %cst_139 : f32 to vector<16x16xf32>
    %752 = arith.mulf %751, %750 : vector<16x16xf32>
    %753 = math.tanh %752 : vector<16x16xf32>
    %cst_140 = arith.constant 5.000000e-01 : f32
    %754 = vector.broadcast %cst_140 : f32 to vector<16x16xf32>
    %755 = arith.mulf %754, %753 : vector<16x16xf32>
    %cst_141 = arith.constant 5.000000e-01 : f32
    %756 = vector.broadcast %cst_141 : f32 to vector<16x16xf32>
    %757 = arith.addf %755, %756 : vector<16x16xf32>
    %c54_142 = arith.constant 54 : index
    %758 = memref.load %arg5[%c54_142] : memref<81xf32, #tpu.memory_space<smem>>
    %759 = vector.broadcast %758 : f32 to vector<16x32xf32>
    %760 = arith.mulf %759, %481 : vector<16x32xf32>
    %c57_143 = arith.constant 57 : index
    %761 = memref.load %arg5[%c57_143] : memref<81xf32, #tpu.memory_space<smem>>
    %762 = vector.broadcast %761 : f32 to vector<16x32xf32>
    %763 = arith.mulf %762, %484 : vector<16x32xf32>
    %764 = arith.addf %760, %763 : vector<16x32xf32>
    %c60_144 = arith.constant 60 : index
    %765 = memref.load %arg5[%c60_144] : memref<81xf32, #tpu.memory_space<smem>>
    %766 = vector.broadcast %765 : f32 to vector<16x32xf32>
    %767 = arith.mulf %766, %487 : vector<16x32xf32>
    %768 = arith.addf %764, %767 : vector<16x32xf32>
    %c63_145 = arith.constant 63 : index
    %769 = memref.load %arg5[%c63_145] : memref<81xf32, #tpu.memory_space<smem>>
    %770 = vector.broadcast %769 : f32 to vector<16x32xf32>
    %771 = arith.mulf %770, %490 : vector<16x32xf32>
    %772 = arith.addf %768, %771 : vector<16x32xf32>
    %c66_146 = arith.constant 66 : index
    %773 = memref.load %arg5[%c66_146] : memref<81xf32, #tpu.memory_space<smem>>
    %774 = vector.broadcast %773 : f32 to vector<16x32xf32>
    %775 = arith.mulf %774, %493 : vector<16x32xf32>
    %776 = arith.addf %772, %775 : vector<16x32xf32>
    %c69_147 = arith.constant 69 : index
    %777 = memref.load %arg5[%c69_147] : memref<81xf32, #tpu.memory_space<smem>>
    %778 = vector.broadcast %777 : f32 to vector<16x32xf32>
    %779 = arith.mulf %778, %496 : vector<16x32xf32>
    %780 = arith.addf %776, %779 : vector<16x32xf32>
    %c72_148 = arith.constant 72 : index
    %781 = memref.load %arg5[%c72_148] : memref<81xf32, #tpu.memory_space<smem>>
    %782 = vector.broadcast %781 : f32 to vector<16x32xf32>
    %783 = arith.mulf %782, %499 : vector<16x32xf32>
    %784 = arith.addf %780, %783 : vector<16x32xf32>
    %c75_149 = arith.constant 75 : index
    %785 = memref.load %arg5[%c75_149] : memref<81xf32, #tpu.memory_space<smem>>
    %786 = vector.broadcast %785 : f32 to vector<16x32xf32>
    %787 = arith.mulf %786, %502 : vector<16x32xf32>
    %788 = arith.addf %784, %787 : vector<16x32xf32>
    %c78_150 = arith.constant 78 : index
    %789 = memref.load %arg5[%c78_150] : memref<81xf32, #tpu.memory_space<smem>>
    %790 = vector.broadcast %789 : f32 to vector<16x32xf32>
    %791 = arith.mulf %790, %505 : vector<16x32xf32>
    %792 = arith.addf %788, %791 : vector<16x32xf32>
    %793 = vector.extract_strided_slice %4 {offsets = [0, 0, 0], sizes = [1, 32, 16], strides = [1, 1, 1]} : vector<3x32x16xf32> to vector<1x32x16xf32>
    %794 = vector.shape_cast %793 : vector<1x32x16xf32> to vector<32x16xf32>
    %cst_151 = arith.constant dense<0.000000e+00> : vector<16x16xf32>
    %795 = tpu.matmul %792, %794, %cst_151 {dimension_numbers = #tpu.dot_dimension_numbers<[1], [0], [0], [1], [0, 0, 1, 1], [], []>} : vector<16x32xf32>, vector<32x16xf32>, vector<16x16xf32> -> vector<16x16xf32>
    %c55_152 = arith.constant 55 : index
    %796 = memref.load %arg5[%c55_152] : memref<81xf32, #tpu.memory_space<smem>>
    %797 = vector.broadcast %796 : f32 to vector<16x32xf32>
    %798 = arith.mulf %797, %481 : vector<16x32xf32>
    %c58_153 = arith.constant 58 : index
    %799 = memref.load %arg5[%c58_153] : memref<81xf32, #tpu.memory_space<smem>>
    %800 = vector.broadcast %799 : f32 to vector<16x32xf32>
    %801 = arith.mulf %800, %484 : vector<16x32xf32>
    %802 = arith.addf %798, %801 : vector<16x32xf32>
    %c61_154 = arith.constant 61 : index
    %803 = memref.load %arg5[%c61_154] : memref<81xf32, #tpu.memory_space<smem>>
    %804 = vector.broadcast %803 : f32 to vector<16x32xf32>
    %805 = arith.mulf %804, %487 : vector<16x32xf32>
    %806 = arith.addf %802, %805 : vector<16x32xf32>
    %c64_155 = arith.constant 64 : index
    %807 = memref.load %arg5[%c64_155] : memref<81xf32, #tpu.memory_space<smem>>
    %808 = vector.broadcast %807 : f32 to vector<16x32xf32>
    %809 = arith.mulf %808, %490 : vector<16x32xf32>
    %810 = arith.addf %806, %809 : vector<16x32xf32>
    %c67_156 = arith.constant 67 : index
    %811 = memref.load %arg5[%c67_156] : memref<81xf32, #tpu.memory_space<smem>>
    %812 = vector.broadcast %811 : f32 to vector<16x32xf32>
    %813 = arith.mulf %812, %493 : vector<16x32xf32>
    %814 = arith.addf %810, %813 : vector<16x32xf32>
    %c70_157 = arith.constant 70 : index
    %815 = memref.load %arg5[%c70_157] : memref<81xf32, #tpu.memory_space<smem>>
    %816 = vector.broadcast %815 : f32 to vector<16x32xf32>
    %817 = arith.mulf %816, %496 : vector<16x32xf32>
    %818 = arith.addf %814, %817 : vector<16x32xf32>
    %c73_158 = arith.constant 73 : index
    %819 = memref.load %arg5[%c73_158] : memref<81xf32, #tpu.memory_space<smem>>
    %820 = vector.broadcast %819 : f32 to vector<16x32xf32>
    %821 = arith.mulf %820, %499 : vector<16x32xf32>
    %822 = arith.addf %818, %821 : vector<16x32xf32>
    %c76_159 = arith.constant 76 : index
    %823 = memref.load %arg5[%c76_159] : memref<81xf32, #tpu.memory_space<smem>>
    %824 = vector.broadcast %823 : f32 to vector<16x32xf32>
    %825 = arith.mulf %824, %502 : vector<16x32xf32>
    %826 = arith.addf %822, %825 : vector<16x32xf32>
    %c79_160 = arith.constant 79 : index
    %827 = memref.load %arg5[%c79_160] : memref<81xf32, #tpu.memory_space<smem>>
    %828 = vector.broadcast %827 : f32 to vector<16x32xf32>
    %829 = arith.mulf %828, %505 : vector<16x32xf32>
    %830 = arith.addf %826, %829 : vector<16x32xf32>
    %831 = vector.extract_strided_slice %4 {offsets = [1, 0, 0], sizes = [1, 32, 16], strides = [1, 1, 1]} : vector<3x32x16xf32> to vector<1x32x16xf32>
    %832 = vector.shape_cast %831 : vector<1x32x16xf32> to vector<32x16xf32>
    %cst_161 = arith.constant dense<0.000000e+00> : vector<16x16xf32>
    %833 = tpu.matmul %830, %832, %cst_161 {dimension_numbers = #tpu.dot_dimension_numbers<[1], [0], [0], [1], [0, 0, 1, 1], [], []>} : vector<16x32xf32>, vector<32x16xf32>, vector<16x16xf32> -> vector<16x16xf32>
    %834 = arith.addf %795, %833 : vector<16x16xf32>
    %c56_162 = arith.constant 56 : index
    %835 = memref.load %arg5[%c56_162] : memref<81xf32, #tpu.memory_space<smem>>
    %836 = vector.broadcast %835 : f32 to vector<16x32xf32>
    %837 = arith.mulf %836, %481 : vector<16x32xf32>
    %c59_163 = arith.constant 59 : index
    %838 = memref.load %arg5[%c59_163] : memref<81xf32, #tpu.memory_space<smem>>
    %839 = vector.broadcast %838 : f32 to vector<16x32xf32>
    %840 = arith.mulf %839, %484 : vector<16x32xf32>
    %841 = arith.addf %837, %840 : vector<16x32xf32>
    %c62_164 = arith.constant 62 : index
    %842 = memref.load %arg5[%c62_164] : memref<81xf32, #tpu.memory_space<smem>>
    %843 = vector.broadcast %842 : f32 to vector<16x32xf32>
    %844 = arith.mulf %843, %487 : vector<16x32xf32>
    %845 = arith.addf %841, %844 : vector<16x32xf32>
    %c65_165 = arith.constant 65 : index
    %846 = memref.load %arg5[%c65_165] : memref<81xf32, #tpu.memory_space<smem>>
    %847 = vector.broadcast %846 : f32 to vector<16x32xf32>
    %848 = arith.mulf %847, %490 : vector<16x32xf32>
    %849 = arith.addf %845, %848 : vector<16x32xf32>
    %c68_166 = arith.constant 68 : index
    %850 = memref.load %arg5[%c68_166] : memref<81xf32, #tpu.memory_space<smem>>
    %851 = vector.broadcast %850 : f32 to vector<16x32xf32>
    %852 = arith.mulf %851, %493 : vector<16x32xf32>
    %853 = arith.addf %849, %852 : vector<16x32xf32>
    %c71_167 = arith.constant 71 : index
    %854 = memref.load %arg5[%c71_167] : memref<81xf32, #tpu.memory_space<smem>>
    %855 = vector.broadcast %854 : f32 to vector<16x32xf32>
    %856 = arith.mulf %855, %496 : vector<16x32xf32>
    %857 = arith.addf %853, %856 : vector<16x32xf32>
    %c74_168 = arith.constant 74 : index
    %858 = memref.load %arg5[%c74_168] : memref<81xf32, #tpu.memory_space<smem>>
    %859 = vector.broadcast %858 : f32 to vector<16x32xf32>
    %860 = arith.mulf %859, %499 : vector<16x32xf32>
    %861 = arith.addf %857, %860 : vector<16x32xf32>
    %c77_169 = arith.constant 77 : index
    %862 = memref.load %arg5[%c77_169] : memref<81xf32, #tpu.memory_space<smem>>
    %863 = vector.broadcast %862 : f32 to vector<16x32xf32>
    %864 = arith.mulf %863, %502 : vector<16x32xf32>
    %865 = arith.addf %861, %864 : vector<16x32xf32>
    %c80_170 = arith.constant 80 : index
    %866 = memref.load %arg5[%c80_170] : memref<81xf32, #tpu.memory_space<smem>>
    %867 = vector.broadcast %866 : f32 to vector<16x32xf32>
    %868 = arith.mulf %867, %505 : vector<16x32xf32>
    %869 = arith.addf %865, %868 : vector<16x32xf32>
    %870 = vector.extract_strided_slice %4 {offsets = [2, 0, 0], sizes = [1, 32, 16], strides = [1, 1, 1]} : vector<3x32x16xf32> to vector<1x32x16xf32>
    %871 = vector.shape_cast %870 : vector<1x32x16xf32> to vector<32x16xf32>
    %cst_171 = arith.constant dense<0.000000e+00> : vector<16x16xf32>
    %872 = tpu.matmul %869, %871, %cst_171 {dimension_numbers = #tpu.dot_dimension_numbers<[1], [0], [0], [1], [0, 0, 1, 1], [], []>} : vector<16x32xf32>, vector<32x16xf32>, vector<16x16xf32> -> vector<16x16xf32>
    %873 = arith.addf %834, %872 : vector<16x16xf32>
    %c2_172 = arith.constant 2 : index
    %874 = memref.load %arg6[%c2_172] : memref<3xf32, #tpu.memory_space<smem>>
    %875 = vector.broadcast %874 : f32 to vector<16x16xf32>
    %876 = arith.addf %873, %875 : vector<16x16xf32>
    %cst_173 = arith.constant 5.000000e-01 : f32
    %877 = vector.broadcast %cst_173 : f32 to vector<16x16xf32>
    %878 = arith.mulf %877, %876 : vector<16x16xf32>
    %879 = math.tanh %878 : vector<16x16xf32>
    %cst_174 = arith.constant 5.000000e-01 : f32
    %880 = vector.broadcast %cst_174 : f32 to vector<16x16xf32>
    %881 = arith.mulf %880, %879 : vector<16x16xf32>
    %cst_175 = arith.constant 5.000000e-01 : f32
    %882 = vector.broadcast %cst_175 : f32 to vector<16x16xf32>
    %883 = arith.addf %881, %882 : vector<16x16xf32>
    %884 = vector.shape_cast %631 : vector<16x16xf32> to vector<1x16x16xf32>
    %885 = vector.shape_cast %757 : vector<16x16xf32> to vector<1x16x16xf32>
    %886 = vector.shape_cast %883 : vector<16x16xf32> to vector<1x16x16xf32>
    %887 = tpu.concatenate %884, %885, %886 in 0 : vector<1x16x16xf32>, vector<1x16x16xf32>, vector<1x16x16xf32> -> vector<3x16x16xf32>
    %c0_176 = arith.constant 0 : index
    %c0_177 = arith.constant 0 : index
    %c0_178 = arith.constant 0 : index
    %888 = vector.load %arg11[%c0_176, %c0_177, %c0_178] : memref<3x16x16xf32, #tpu.memory_space<vmem>>, vector<3x16x16xf32>
    tpu.vector_store %arg11[%c0_176, %c0_177, %c0_178], %887 {strides = array<i32>} : memref<3x16x16xf32, #tpu.memory_space<vmem>>, vector<3x16x16xf32>,
    return
  }
}

</mosaic_0001>

<bundles_post_ra>
// kernel: model_forward.1
= control target key start
LH: loop header
LB: loop body
LE: loop exit
PB: predicated region body
PF: predicated region fallthrough
CT: control target
= control target key end

     0   :  { %s9847_s0 = inlined_call_operand.vmem [shape: f32[3,64,64], index: 0, kind: input, shape index: {}]   ;;  %s9848_s1 = inlined_call_operand.vmem [shape: f32[9], index: 1, kind: input, shape index: {}]   ;;  %s9849_s2 = inlined_call_operand.vmem [shape: f32[3], index: 2, kind: input, shape index: {}]   ;;  %s9850_s3 = inlined_call_operand.vmem [shape: f32[81], index: 3, kind: input, shape index: {}]   ;;  %s9851_s4 = inlined_call_operand.vmem [shape: f32[3], index: 4, kind: input, shape index: {}]   ;;  %s9852_s5 = inlined_call_operand.vmem [shape: f32[81], index: 5, kind: input, shape index: {}]   ;;  %s9853_s6 = inlined_call_operand.vmem [shape: f32[3], index: 6, kind: input, shape index: {}]   ;;  %s9854_s7 = inlined_call_operand.vmem [shape: f32[3,32,64], index: 7, kind: input, shape index: {}]   ;;  %s9855_s8 = inlined_call_operand.vmem [shape: f32[3,64,32], index: 8, kind: input, shape index: {}]   ;;  %s9856_s9 = inlined_call_operand.vmem [shape: f32[3,16,32], index: 9, kind: input, shape index: {}]   ;;  %s9857_s10 = inlined_call_operand.vmem [shape: f32[3,32,16], index: 10, kind: input, shape index: {}]   ;;  %s9858_s11 = inlined_call_operand.hbm [shape: f32[3,16,16], index: 11, kind: output, shape index: {}]  }
   0x1   :  { %10102 = sst [smem:[#allocation144_spill]] %s9855_s8 }
   0x2   :  { %10103 = sst [smem:[#allocation145_spill]] %s9856_s9 }
   0x3   :  { %10104 = sst [smem:[#allocation146_spill]] %s9857_s10 }
   0x4   :  { %10105 = sst [smem:[#allocation147_spill]] %s9858_s11 }
   0x5   :  { %16 = vsyncpa [#allocation4], 0 }
   0x6   :  { %17 = vsyncpa [#allocation6], 0 }
   0x7   :  { %18 = vsyncpa [#allocation9], 0 }
   0x8   :  { %19 = vsyncpa [#allocation12], 0  ;;  %s39_s19 = sshll.u32 %s9849_s2, 4  ;;  %s40_s19 = int_to_ptr.vmem [resolvable:$true] %s39_s19 }
   0x9   :  { %20 = vsyncpa [#allocation3], 0  ;;  %s59_s22 = sshll.u32 %s9851_s4, 4  ;;  %s6700_s23 = scalar_lea.vmem %s40_s19, 16  ;;  %s60_s22 = int_to_ptr.vmem [resolvable:$true] %s59_s22 }
   0xa   :  { %p6701_p0 = scmp.ne.s32.totalorder %s40_s19, %s6700_s23  ;;  %p6705_p1 = scmp.lt.s32.totalorder %s40_s19, %s40_s19 }
   0xb   :  { %p6706_p2 = scmp.lt.s32.totalorder %s6700_s23, %s6700_s23 }
   0xd   :  { %p6707_p3 = por %p6706_p2, %p6705_p1 }
   0xf   :  { %p6708_p4 = pnand %p6707_p3, %p6701_p0 }
  0x11   :  { %6711 = shalt.err (!%p6708_p4)
}
  0x12   :  { %s6804_s24 = smov [#allocation5]   ;;  %s6712_s25 = scalar_lea.vmem %s60_s22, 16 }
  0x13   :  { %42 = dma.vmem_to_smem %s40_s19, 16, %s6804_s24, [#allocation6]  }
  0x14   :  { %p6713_p5 = scmp.ne.s32.totalorder %s60_s22, %s6712_s25  ;;  %p6717_p6 = scmp.lt.s32.totalorder %s60_s22, %s60_s22 }
  0x15   :  { %p6718_p7 = scmp.lt.s32.totalorder %s6712_s25, %s6712_s25 }
  0x17   :  { %p6719_p8 = por %p6718_p7, %p6717_p6 }
  0x19   :  { %p6720_p9 = pnand %p6719_p8, %p6713_p5 }
  0x1b   :  { %6723 = shalt.err (!%p6720_p9)
}
  0x1c   :  { %s6805_s2 = smov [#allocation8]   ;;  %s29_s27 = sshll.u32 %s9848_s1, 4  ;;  %s30_s27 = int_to_ptr.vmem [resolvable:$true] %s29_s27 }
  0x1d   :  { %62 = dma.vmem_to_smem %s60_s22, 16, %s6805_s2, [#allocation9]  }
  0x1e   :  { %s49_s30 = sshll.u32 %s9850_s3, 4  ;;  %s6724_s12 = scalar_lea.vmem %s30_s27, 16  ;;  %s50_s30 = int_to_ptr.vmem [resolvable:$true] %s49_s30 }
  0x1f   :  { %p6725_p10 = scmp.ne.s32.totalorder %s30_s27, %s6724_s12  ;;  %p6729_p11 = scmp.lt.s32.totalorder %s30_s27, %s30_s27 }
  0x20   :  { %p6730_p12 = scmp.lt.s32.totalorder %s6724_s12, %s6724_s12 }
  0x22   :  { %p6731_p13 = por %p6730_p12, %p6729_p11 }
  0x24   :  { %p6732_p0 = pnand %p6731_p13, %p6725_p10 }
  0x26   :  { %6735 = shalt.err (!%p6732_p0)
}
  0x27   :  { %s6806_s13 = smov [#allocation2]   ;;  %s6736_s14 = scalar_lea.vmem %s50_s30, 16 }
  0x28   :  { %32 = dma.vmem_to_smem %s30_s27, 16, %s6806_s13, [#allocation4]  }
  0x29   :  { %p6737_p1 = scmp.ne.s32.totalorder %s50_s30, %s6736_s14  ;;  %p6741_p2 = scmp.lt.s32.totalorder %s50_s30, %s50_s30 }
  0x2a   :  { %p6742_p3 = scmp.lt.s32.totalorder %s6736_s14, %s6736_s14 }
  0x2c   :  { %p6743_p4 = por %p6742_p3, %p6741_p2 }
  0x2e   :  { %p6744_p5 = pnand %p6743_p4, %p6737_p1 }
  0x30   :  { %6747 = shalt.err (!%p6744_p5)
}
  0x31   :  { %s6807_s1 = smov [#allocation7]   ;;  %s69_s16 = sshll.u32 %s9852_s5, 4  ;;  %s70_s16 = int_to_ptr.vmem [resolvable:$true] %s69_s16 }
  0x32   :  { %52 = dma.vmem_to_smem %s50_s30, 16, %s6807_s1, [#allocation6]  }
  0x33   :  { %s79_s19 = sshll.u32 %s9853_s6, 4  ;;  %s6748_s20 = scalar_lea.vmem %s70_s16, 16  ;;  %s80_s19 = int_to_ptr.vmem [resolvable:$true] %s79_s19 }
  0x34   :  { %p6749_p6 = scmp.ne.s32.totalorder %s70_s16, %s6748_s20  ;;  %p6753_p7 = scmp.lt.s32.totalorder %s70_s16, %s70_s16 }
  0x35   :  { %p6754_p8 = scmp.lt.s32.totalorder %s6748_s20, %s6748_s20 }
  0x37   :  { %p6755_p9 = por %p6754_p8, %p6753_p7 }
  0x39   :  { %p6756_p10 = pnand %p6755_p9, %p6749_p6 }
  0x3b   :  { %6759 = shalt.err (!%p6756_p10)
}
  0x3c   :  { %s6808_s21 = smov [#allocation10]   ;;  %s6760_s22 = scalar_lea.vmem %s80_s19, 16 }
  0x3d   :  { %72 = dma.vmem_to_smem %s70_s16, 16, %s6808_s21, [#allocation9]  }
  0x3e   :  { %p6761_p11 = scmp.ne.s32.totalorder %s80_s19, %s6760_s22  ;;  %p6765_p12 = scmp.lt.s32.totalorder %s80_s19, %s80_s19 }
  0x3f   :  { %p6766_p13 = scmp.lt.s32.totalorder %s6760_s22, %s6760_s22 }
  0x41   :  { %p6767_p0 = por %p6766_p13, %p6765_p12 }
  0x43   :  { %p6768_p1 = pnand %p6767_p0, %p6761_p11 }
  0x45   :  { %6771 = shalt.err (!%p6768_p1)
}
  0x46   :  { %s6809_s5 = smov [#allocation11]  }
  0x47   :  { %82 = dma.vmem_to_smem %s80_s19, 16, %s6809_s5, [#allocation12]  }
  0x48   :  { %6794 = dma.done.wait [#allocation4], 16  }
  0x49   :  { %6795 = vsyncadd [#allocation4], 4294967280 }
  0x4a   :  { %6796 = dma.done.wait [#allocation6], 32  }
  0x4b   :  { %6797 = vsyncadd [#allocation6], 4294967264 }
  0x4c   :  { %6798 = dma.done.wait [#allocation9], 32  }
  0x4d   :  { %6799 = vsyncadd [#allocation9], 4294967264 }
  0x4e   :  { %6800 = dma.done.wait [#allocation12], 16  }
  0x4f   :  { %6801 = vsyncadd [#allocation12], 4294967280 }
  0x50   :  { %109 = sfence }
  0x51   :  { %s188_s6 = sld [smem:[#allocation2]]  ;;  %s4939_s23 = sld [smem:[#allocation2 + $0x1]]  ;;  %v6894_v0 = vld [vmem:[%s9847_s0] sm:$0xff]  ;;  %v6899_v1 = vld [vmem:[%s9847_s0 + $0x8] sm:$0xff]  ;;  %v6909_v3 = vld [vmem:[%s9847_s0 + $0x10] sm:$0xff]  ;;  %vm452_vm0 = vcmask 523264  }
  0x52   :  { %s4940_s24 = sld [smem:[#allocation2 + $0x2]]  ;;  %s234_s25 = sld [smem:[#allocation5]]  ;;  %v6904_v2 = vld [vmem:[%s9847_s0 + $0x40] sm:$0xff]  ;;  %v6914_v4 = vld [vmem:[%s9847_s0 + $0x48] sm:$0xff]  ;;  %v6929_v8 = vld [vmem:[%s9847_s0 + $0x18] sm:$0xff]  ;;  %vm2979_vm1 = vcmask 261120  }
  0x53   :  { %v6919_v5 = vld [vmem:[%s9847_s0 + $0x80] sm:$0xff]  ;;  %v6924_v6 = vld [vmem:[%s9847_s0 + $0x88] sm:$0xff]  ;;  %v6934_v9 = vld [vmem:[%s9847_s0 + $0x50] sm:$0xff]  ;;  %s7035_s22 = sld [smem:[#allocation2 + $0x3]]  ;;  %s7055_s26 = sld [smem:[#allocation2 + $0x4]]  ;;  %vm4912_vm2 = vcmask 130048  }
  0x54   :  { %v6939_v10 = vld [vmem:[%s9847_s0 + $0x58] sm:$0xff]  ;;  %v6948_v14 = vld [vmem:[%s9847_s0 + $0x90] sm:$0xff]  ;;  %v6959_v17 = vld [vmem:[%s9847_s0 + $0x20] sm:$0xff]  ;;  %s7066_s28 = sld [smem:[#allocation2 + $0x5]]  ;;  %s7068_s29 = sld [smem:[#allocation5 + $0x1]] }
  0x55   :  { %v6953_v15 = vld [vmem:[%s9847_s0 + $0x98] sm:$0xff]  ;;  %v6972_v22 = vld [vmem:[%s9847_s0 + $0x28] sm:$0xff]  ;;  %v6977_v23 = vld [vmem:[%s9854_s7] sm:$0xff]  ;;  %s7161_s12 = sld [smem:[#allocation2 + $0x8]]  ;;  %s7181_s13 = sld [smem:[#allocation5 + $0x2]] }
  0x56   :  { %v6989_v28 = vld [vmem:[%s9847_s0 + $0x60] sm:$0xff]  ;;  %5561 = vmatprep.mubr.msk.f32.mxu0 %vm452_vm0, %v6977_v23  ;;  %v7005_v34 = vld [vmem:[%s9847_s0 + $0x68] sm:$0xff]  ;;  %v7028_v45 = vld [vmem:[%s9847_s0 + $0x30] sm:$0xff]  ;;  %s7471_s2 = sld [smem:[#allocation7]]  ;;  %s7473_s4 = sld [smem:[#allocation7 + $0x1]] }
  0x57   :  { %v189_v7 = vstv %s188_s6  ;;  %v6943_v13 = vstv %s4939_s23  ;;  %v6996_v29 = vld [vmem:[%s9854_s7 + $0x20] sm:$0xff]  ;;  %v7015_v36 = vld [vmem:[%s9847_s0 + $0xa8] sm:$0xff]  ;;  %s7477_s27 = sld [smem:[#allocation7 + $0x1b]]  ;;  %s7479_s23 = sld [smem:[#allocation7 + $0x1c]] }
  0x58   :  { %v190_v11 = vmul.f32 %v189_v7, %v6894_v0  ;;  %v191_v12 = vmul.f32 %v189_v7, %v6899_v1  ;;  %v192_v16 = vmul.f32 %v189_v7, %v6909_v3  ;;  %v200_v18 = vmul.f32 %v6943_v13, %v6904_v2  ;;  %v7010_v35 = vld [vmem:[%s9847_s0 + $0xa0] sm:$0xff]  ;;  %5583 = vmatprep.mubr.msk.f32.mxu1 %vm452_vm0, %v6996_v29  ;;  %v7033_v46 = vld [vmem:[%s9847_s0 + $0x38] sm:$0xff]  ;;  %v7048_v55 = vld [vmem:[%s9847_s0 + $0x70] sm:$0xff]  ;;  %s7487_s30 = sld [smem:[#allocation7 + $0x38]]  ;;  %s7501_s1 = sld [smem:[#allocation7 + $0x39]] }
  0x59   :  { %v201_v19 = vmul.f32 %v6943_v13, %v6914_v4  ;;  %v6965_v20 = vstv %s4940_s24  ;;  %v6967_v21 = vstv %s234_s25  ;;  %v193_v26 = vmul.f32 %v189_v7, %v6929_v8  ;;  %v7053_v56 = vld [vmem:[%s9847_s0 + $0x78] sm:$0xff]  ;;  %v7061_v59 = vld [vmem:[%s9847_s0 + $0xb0] sm:$0xff]  ;;  %s7135_s25 = sld [smem:[#allocation2 + $0x7]]  ;;  %s7489_s24 = sld [smem:[#allocation7 + $0x3]] }
  0x5a   :  { %v218_v24 = vmul.f32 %v6965_v20, %v6919_v5  ;;  %v219_v25 = vmul.f32 %v6965_v20, %v6924_v6  ;;  %v202_v27 = vmul.f32 %v6943_v13, %v6934_v9  ;;  %v208_v30 = vadd.f32 %v200_v18, %v190_v11  ;;  %s7499_s14 = sld [smem:[#allocation7 + $0x20]]  ;;  %s7503_s3 = sld [smem:[#allocation7 + $0x3a]] }
  0x5b   :  { %v209_v31 = vadd.f32 %v201_v19, %v191_v12  ;;  %v203_v32 = vmul.f32 %v6943_v13, %v6939_v10  ;;  %v220_v33 = vmul.f32 %v6965_v20, %v6948_v14  ;;  %v221_v38 = vmul.f32 %v6965_v20, %v6953_v15  ;;  %v7073_v19 = vld [vmem:[%s9847_s0 + $0xb8] sm:$0xff]  ;;  %s7133_s0 = sld [smem:[#allocation2 + $0x6]]  ;;  %s7505_s15 = sld [smem:[#allocation7 + $0x3b]] }
  0x5c   :  { %v210_v37 = vadd.f32 %v202_v27, %v192_v16  ;;  %v194_v39 = vmul.f32 %v189_v7, %v6959_v17  ;;  %v195_v40 = vmul.f32 %v189_v7, %v6972_v22  ;;  %v226_v41 = vadd.f32 %v218_v24, %v208_v30  ;;  %s7507_s16 = sld [smem:[#allocation7 + $0x6]]  ;;  %s7509_s17 = sld [smem:[#allocation7 + $0x7]] }
  0x5d   :  { %v227_v42 = vadd.f32 %v219_v25, %v209_v31  ;;  %v211_v43 = vadd.f32 %v203_v32, %v193_v26  ;;  %v204_v44 = vmul.f32 %v6943_v13, %v6989_v28  ;;  %v205_v48 = vmul.f32 %v6943_v13, %v7005_v34  ;;  %s7511_s18 = sld [smem:[#allocation7 + $0x8]]  ;;  %s7513_s19 = sld [smem:[#allocation7 + $0x21]] }
  0x5e   :  { %v228_v47 = vadd.f32 %v220_v33, %v210_v37  ;;  %v222_v49 = vmul.f32 %v6965_v20, %v7010_v35  ;;  %v223_v50 = vmul.f32 %v6965_v20, %v7015_v36  ;;  %v236_v51 = vadd.f32 %v6967_v21, %v226_v41  ;;  %s7515_s20 = sld [smem:[#allocation7 + $0x22]]  ;;  %s7517_s21 = sld [smem:[#allocation7 + $0x23]] }
  0x5f   :  { %v237_v52 = vadd.f32 %v6967_v21, %v227_v42  ;;  %v229_v53 = vadd.f32 %v221_v38, %v211_v43  ;;  %v212_v54 = vadd.f32 %v204_v44, %v194_v39  ;;  %v213_v58 = vadd.f32 %v205_v48, %v195_v40  ;;  %s7521_s5 = sld [smem:[#allocation7 + $0x3d]]  ;;  %s7523_s6 = sld [smem:[#allocation7 + $0x3e]] }
  0x60   :  { %v238_v57 = vadd.f32 %v6967_v21, %v228_v47  ;;  %v196_v60 = vmul.f32 %v189_v7, %v7028_v45  ;;  %v197_v61 = vmul.f32 %v189_v7, %v7033_v46  ;;  %v244_v62 = vmul.f32 0.5, %v236_v51  ;;  %s7525_s11 = sld [smem:[#allocation7 + $0xa]]  ;;  %s7527_s10 = sld [smem:[#allocation7 + $0x25]] }
  0x61   :  { %v245_v63 = vmul.f32 0.5, %v237_v52  ;;  %v239_v11 = vadd.f32 %v6967_v21, %v229_v53  ;;  %v230_v12 = vadd.f32 %v222_v49, %v212_v54  ;;  %v231_v18 = vadd.f32 %v223_v50, %v213_v58  ;;  %s7529_s9 = sld [smem:[#allocation7 + $0x9]] }
  0x62   :  { %v246_v16 = vmul.f32 0.5, %v238_v57  ;;  %v206_v7 = vmul.f32 %v6943_v13, %v7048_v55  ;;  %v207_v24 = vmul.f32 %v6943_v13, %v7053_v56  ;;  %6616 = vtanh.f32 %v244_v62 }
  0x63   :  { %v247_v25 = vmul.f32 0.5, %v239_v11  ;;  %v240_v26 = vadd.f32 %v6967_v21, %v230_v12  ;;  %v224_v27 = vmul.f32 %v6965_v20, %v7061_v59  ;;  %6618 = vtanh.f32 %v245_v63 }
  0x64   :  { %v241_v30 = vadd.f32 %v6967_v21, %v231_v18  ;;  %v214_v31 = vadd.f32 %v206_v7, %v196_v60  ;;  %v215_v32 = vadd.f32 %v207_v24, %v197_v61  ;;  %6620 = vtanh.f32 %v246_v16  ;;  %10111 = sst [smem:[#allocation24_spill]] %s7515_s20  ;;  %s7539_s20 = sld [smem:[#allocation7 + $0x2b]] }
  0x65   :  { %v248_v33 = vmul.f32 0.5, %v240_v26  ;;  %v225_v37 = vmul.f32 %v6965_v20, %v7073_v19  ;;  %v7086_v13 = vstv %s7035_s22  ;;  %6622 = vtanh.f32 %v247_v25  ;;  %10112 = sst [smem:[#allocation25_spill]] %s7517_s21  ;;  %s7519_s22 = sld [smem:[#allocation7 + $0x3c]] }
  0x66   :  { %v249_v38 = vmul.f32 0.5, %v241_v30  ;;  %v232_v39 = vadd.f32 %v224_v27, %v214_v31  ;;  %v278_v40 = vmul.f32 %v7086_v13, %v6894_v0  ;;  %v279_v42 = vmul.f32 %v7086_v13, %v6899_v1  ;;  %10114 = sst [smem:[#allocation27_spill]] %s7521_s5  ;;  %s7533_s21 = sld [smem:[#allocation7 + $0xd]] }
  0x67   :  { %6624 = vtanh.f32 %v248_v33  ;;  %v233_v41 = vadd.f32 %v225_v37, %v215_v32  ;;  %v7093_v43 = vstv %s7055_s26  ;;  %v7102_v49 = vstv %s7066_s28  ;;  %s7475_s26 = sld [smem:[#allocation7 + $0x2]]  ;;  %s7481_s28 = sld [smem:[#allocation7 + $0x1d]] }
  0x68   :  { %6626 = vtanh.f32 %v249_v38  ;;  %v242_v44 = vadd.f32 %v6967_v21, %v232_v39  ;;  %v288_v20 = vmul.f32 %v7093_v43, %v6904_v2  ;;  %v289_v47 = vmul.f32 %v7093_v43, %v6914_v4  ;;  %10115 = sst [smem:[#allocation28_spill]] %s7527_s10  ;;  %s7537_s5 = sld [smem:[#allocation7 + $0x10]] }
  0x69   :  { %v243_v48 = vadd.f32 %v6967_v21, %v233_v41  ;;  %v7105_v50 = vstv %s7068_s29  ;;  %v280_v51 = vmul.f32 %v7086_v13, %v6909_v3  ;;  %v306_v57 = vmul.f32 %v7102_v49, %v6919_v5  ;;  %s7483_s29 = sld [smem:[#allocation7 + $0x36]]  ;;  %10116 = sst [smem:[#allocation29_spill]] %s7529_s9 }
  0x6a   :  { %v250_v52 = vmul.f32 0.5, %v242_v44  ;;  %v296_v53 = vadd.f32 %v288_v20, %v278_v40  ;;  %v297_v54 = vadd.f32 %v289_v47, %v279_v42  ;;  %v307_v60 = vmul.f32 %v7102_v49, %v6924_v6  ;;  %10117 = sst [smem:[#allocation30_spill]] %s7539_s20  ;;  %s7544_s10 = sld [smem:[#allocation7 + $0xc]] }
  0x6b   :  { %v251_v58 = vmul.f32 0.5, %v243_v48  ;;  %v281_v21 = vmul.f32 %v7086_v13, %v6929_v8  ;;  %v290_v61 = vmul.f32 %v7093_v43, %v6934_v9  ;;  %v291_v63 = vmul.f32 %v7093_v43, %v6939_v10  ;;  %10113 = sst [smem:[#allocation26_spill]] %s7519_s22  ;;  %s7535_s22 = sld [smem:[#allocation7 + $0x28]] }
  0x6c   :  { %6628 = vtanh.f32 %v250_v52  ;;  %v314_v62 = vadd.f32 %v306_v57, %v296_v53  ;;  %v308_v11 = vmul.f32 %v7102_v49, %v6948_v14  ;;  %v6617_v12 = vpop.eup %6616  ;;  %v315_v16 = vadd.f32 %v307_v60, %v297_v54  ;;  %s7546_s9 = sld [smem:[#allocation7 + $0x27]] }
  0x6d   :  { %6630 = vtanh.f32 %v251_v58  ;;  %v298_v18 = vadd.f32 %v290_v61, %v280_v51  ;;  %v309_v7 = vmul.f32 %v7102_v49, %v6953_v15  ;;  %v6619_v24 = vpop.eup %6618  ;;  %v260_v25 = vmul.f32 0.5, %v6617_v12  ;;  %s7560_s20 = sld [smem:[#allocation7 + $0xf]] }
  0x6e   :  { %v324_v26 = vadd.f32 %v7105_v50, %v314_v62  ;;  %v299_v27 = vadd.f32 %v291_v63, %v281_v21  ;;  %v282_v30 = vmul.f32 %v7086_v13, %v6959_v17  ;;  %v6621_v31 = vpop.eup %6620  ;;  %v261_v32 = vmul.f32 0.5, %v6619_v24 }
  0x6f   :  { %v325_v33 = vadd.f32 %v7105_v50, %v315_v16  ;;  %v316_v37 = vadd.f32 %v308_v11, %v298_v18  ;;  %v283_v38 = vmul.f32 %v7086_v13, %v6972_v22  ;;  %v6623_v39 = vpop.eup %6622  ;;  %v268_v40 = vadd.f32 0.5, %v260_v25 }
  0x70   :  { %v262_v41 = vmul.f32 0.5, %v6621_v31  ;;  %v332_v42 = vmul.f32 0.5, %v324_v26  ;;  %v317_v44 = vadd.f32 %v309_v7, %v299_v27  ;;  %v269_v47 = vadd.f32 0.5, %v261_v32 }
  0x71   :  { %v6625_v20 = vpop.eup %6624  ;;  %v263_v48 = vmul.f32 0.5, %v6623_v39  ;;  %v333_v51 = vmul.f32 0.5, %v325_v33  ;;  %v326_v52 = vadd.f32 %v7105_v50, %v316_v37  ;;  %v292_v12 = vmul.f32 %v7093_v43, %v6989_v28 }
  0x72   :  { %v6627_v53 = vpop.eup %6626  ;;  %v270_v54 = vadd.f32 0.5, %v262_v41  ;;  %v264_v57 = vmul.f32 0.5, %v6625_v20  ;;  %6632 = vtanh.f32 %v332_v42  ;;  %v327_v58 = vadd.f32 %v7105_v50, %v317_v44 }
  0x73   :  { %v7131_v60 = vpack.c.bf16 %v269_v47, %v268_v40  ;;  %v271_v21 = vadd.f32 0.5, %v263_v48  ;;  %v265_v61 = vmul.f32 0.5, %v6627_v53  ;;  %6634 = vtanh.f32 %v333_v51 }
  0x74   :  { %v272_v62 = vadd.f32 0.5, %v264_v57  ;;  %v334_v63 = vmul.f32 0.5, %v326_v52  ;;  %v335_v11 = vmul.f32 0.5, %v327_v58  ;;  %v293_v7 = vmul.f32 %v7093_v43, %v7005_v34 }
  0x75   :  { %6140 = vmatprep.subr.bf16.mxu0 %v7131_v60  ;;  %6156 = vmatprep.subr.bf16.mxu1 %v7131_v60  ;;  %v7141_v16 = vpack.c.bf16 %v271_v21, %v270_v54  ;;  %v273_v18 = vadd.f32 0.5, %v265_v61  ;;  %v310_v24 = vmul.f32 %v7102_v49, %v7010_v35  ;;  %v300_v26 = vadd.f32 %v292_v12, %v282_v30 }
  0x76   :  { %v6629_v25 = vpop.eup %6628  ;;  %6142 = vmatpush3.bf16.msra.mxu0 %v7131_v60  ;;  %6158 = vmatpush3.bf16.msra.mxu1 %v7131_v60  ;;  %6636 = vtanh.f32 %v334_v63  ;;  %v311_v27 = vmul.f32 %v7102_v49, %v7015_v36  ;;  %v284_v31 = vmul.f32 %v7086_v13, %v7028_v45  ;;  %v301_v39 = vadd.f32 %v293_v7, %v283_v38 }
  0x77   :  { %v6631_v32 = vpop.eup %6630  ;;  %6144 = vmatprep.subr.bf16.mxu0 %v7141_v16  ;;  %6160 = vmatprep.subr.bf16.mxu1 %v7141_v16  ;;  %v7155_v33 = vpack.c.bf16 %v273_v18, %v272_v62  ;;  %v266_v37 = vmul.f32 0.5, %v6629_v25  ;;  %6638 = vtanh.f32 %v335_v11  ;;  %v318_v41 = vadd.f32 %v310_v24, %v300_v26 }
  0x78   :  { %v267_v40 = vmul.f32 0.5, %v6631_v32  ;;  %v285_v30 = vmul.f32 %v7086_v13, %v7033_v46  ;;  %v294_v42 = vmul.f32 %v7093_v43, %v7048_v55  ;;  %v319_v20 = vadd.f32 %v311_v27, %v301_v39 }
  0x79   :  { %v274_v44 = vadd.f32 0.5, %v266_v37  ;;  %v295_v47 = vmul.f32 %v7093_v43, %v7053_v56  ;;  %v312_v38 = vmul.f32 %v7102_v49, %v7061_v59  ;;  %v328_v48 = vadd.f32 %v7105_v50, %v318_v41 }
  0x7a   :  { %6146 = vmatpush3.bf16.msra.mxu0 %v7141_v16  ;;  %6162 = vmatpush3.bf16.msra.mxu1 %v7141_v16  ;;  %v275_v13 = vadd.f32 0.5, %v267_v40  ;;  %v302_v51 = vadd.f32 %v294_v42, %v284_v31  ;;  %v313_v52 = vmul.f32 %v7102_v49, %v7073_v19  ;;  %v329_v43 = vadd.f32 %v7105_v50, %v319_v20 }
  0x7b   :  { %6148 = vmatprep.subr.bf16.mxu0 %v7155_v33  ;;  %6164 = vmatprep.subr.bf16.mxu1 %v7155_v33  ;;  %v303_v53 = vadd.f32 %v295_v47, %v285_v30  ;;  %v7176_v54 = vstv %s7133_s0  ;;  %v7179_v57 = vstv %s7135_s25  ;;  %v336_v61 = vmul.f32 0.5, %v328_v48  ;;  %s7491_s0 = sld [smem:[#allocation7 + $0x4]]  ;;  %s7493_s25 = sld [smem:[#allocation7 + $0x5]] }
  0x7c   :  { %v6633_v58 = vpop.eup %6632  ;;  %v7183_v21 = vpack.c.bf16 %v275_v13, %v274_v44  ;;  %v320_v62 = vadd.f32 %v312_v38, %v302_v51  ;;  %v366_v49 = vmul.f32 %v7176_v54, %v6894_v0  ;;  %v337_v12 = vmul.f32 0.5, %v329_v43 }
  0x7d   :  { %v6635_v63 = vpop.eup %6634  ;;  %v348_v11 = vmul.f32 0.5, %v6633_v58  ;;  %v321_v18 = vadd.f32 %v313_v52, %v303_v53  ;;  %v367_v7 = vmul.f32 %v7176_v54, %v6899_v1  ;;  %6640 = vtanh.f32 %v336_v61  ;;  %v7228_v52 = vld [vmem:[%s9854_s7 + $0x10] sm:$0xff] }
  0x7e   :  { %6150 = vmatpush3.bf16.msra.mxu0 %v7155_v33  ;;  %6166 = vmatpush3.bf16.msra.mxu1 %v7155_v33  ;;  %v349_v24 = vmul.f32 0.5, %v6635_v63  ;;  %v330_v25 = vadd.f32 %v7105_v50, %v320_v62  ;;  %v376_v26 = vmul.f32 %v7179_v57, %v6904_v2  ;;  %6642 = vtanh.f32 %v337_v12  ;;  %v7241_v58 = vld [vmem:[%s9854_s7 + $0x30] sm:$0xff]  ;;  %v7260_v63 = vld [vmem:[%s9854_s7 + $0x38] sm:$0xff] }
  0x7f   :  { %6152 = vmatprep.subr.bf16.mxu0 %v7183_v21  ;;  %6168 = vmatprep.subr.bf16.mxu1 %v7183_v21  ;;  %v356_v0 = vadd.f32 0.5, %v348_v11  ;;  %v331_v1 = vadd.f32 %v7105_v50, %v321_v18  ;;  %v377_v27 = vmul.f32 %v7179_v57, %v6914_v4  ;;  %v7200_v40 = vstv %s7161_s12  ;;  %v7209_v4 = vld [vmem:[%s9854_s7 + $0x8] sm:$0xff]  ;;  %s7495_s12 = sld [smem:[#allocation7 + $0x1e]] }
  0x80   :  { %v6637_v31 = vpop.eup %6636  ;;  %v357_v32 = vadd.f32 0.5, %v349_v24  ;;  %v338_v37 = vmul.f32 0.5, %v330_v25  ;;  %v384_v39 = vadd.f32 %v376_v26, %v366_v49  ;;  %v394_v44 = vmul.f32 %v7200_v40, %v6919_v5  ;;  %v7214_v50 = vld [vmem:[%s9854_s7 + $0x28] sm:$0xff]  ;;  %v7255_v49 = vld [vmem:[%s9854_s7 + $0x18] sm:$0xff] }
  0x81   :  { %v6639_v41 = vpop.eup %6638  ;;  %v350_v30 = vmul.f32 0.5, %v6637_v31  ;;  %v339_v2 = vmul.f32 0.5, %v331_v1  ;;  %v385_v42 = vadd.f32 %v377_v27, %v367_v7  ;;  %v395_v5 = vmul.f32 %v7200_v40, %v6924_v6 }
  0x82   :  { %6154 = vmatpush3.bf16.msra.mxu0 %v7183_v21  ;;  %6170 = vmatpush3.bf16.msra.mxu1 %v7183_v21  ;;  %v7216_v20 = vpack.c.bf16 %v357_v32, %v356_v0  ;;  %v351_v47 = vmul.f32 0.5, %v6639_v41  ;;  %6644 = vtanh.f32 %v338_v37  ;;  %v402_v13 = vadd.f32 %v394_v44, %v384_v39 }
  0x83   :  { %6172 = vmatprep.subr.bf16.mxu0 %v7131_v60  ;;  %v358_v38 = vadd.f32 0.5, %v350_v30  ;;  %6646 = vtanh.f32 %v339_v2  ;;  %v7222_v48 = vstv %s7181_s13  ;;  %v403_v43 = vadd.f32 %v395_v5, %v385_v42  ;;  %s7497_s13 = sld [smem:[#allocation7 + $0x1f]] }
  0x84   :  { %6188 = vmatprep.subr.bf16.mxu1 %v7216_v20  ;;  %v359_v51 = vadd.f32 0.5, %v351_v47  ;;  %v368_v53 = vmul.f32 %v7176_v54, %v6909_v3  ;;  %v369_v6 = vmul.f32 %v7176_v54, %v6929_v8  ;;  %v412_v61 = vadd.f32 %v7222_v48, %v402_v13 }
  0x85   :  { %5562 = vmatmul.mubr.msk.f32.vlgmr.msra.gmra.mrb[0].mxu0 %vm452_vm0, %v7209_v4  ;;  %5584 = vmatmul.mubr.msk.f32.vlgmr.msra.gmra.mrb[0].mxu1 %vm452_vm0, %v7214_v50  ;;  %v378_v62 = vmul.f32 %v7179_v57, %v6934_v9  ;;  %v379_v3 = vmul.f32 %v7179_v57, %v6939_v10  ;;  %v413_v9 = vadd.f32 %v7222_v48, %v403_v43 }
  0x86   :  { %6174 = vmatpush3.bf16.msra.mxu0 %v7131_v60  ;;  %6190 = vmatpush3.bf16.msra.mxu1 %v7216_v20  ;;  %v7250_v8 = vpack.c.bf16 %v359_v51, %v358_v38  ;;  %v396_v10 = vmul.f32 %v7200_v40, %v6948_v14  ;;  %v420_v60 = vmul.f32 0.5, %v412_v61  ;;  %v397_v18 = vmul.f32 %v7200_v40, %v6953_v15  ;;  %v7276_v14 = vld [vmem:[%s9854_s7 + $0x40] sm:$0xff] }
  0x87   :  { %6176 = vmatprep.subr.bf16.mxu0 %v7141_v16  ;;  %5564 = vmatprep.mubr.msk.f32.mxu0 %vm452_vm0, %v7228_v52  ;;  %v386_v11 = vadd.f32 %v378_v62, %v368_v53  ;;  %v387_v12 = vadd.f32 %v379_v3, %v369_v6  ;;  %v6641_v7 = vpop.eup %6640  ;;  %v421_v24 = vmul.f32 0.5, %v413_v9  ;;  %v370_v25 = vmul.f32 %v7176_v54, %v6959_v17 }
  0x88   :  { %6192 = vmatprep.subr.bf16.mxu1 %v7250_v8  ;;  %5586 = vmatprep.mubr.msk.f32.mxu1 %vm452_vm0, %v7241_v58  ;;  %v371_v26 = vmul.f32 %v7176_v54, %v6972_v22  ;;  %v380_v15 = vmul.f32 %v7179_v57, %v6989_v28  ;;  %v6643_v0 = vpop.eup %6642  ;;  %v352_v1 = vmul.f32 0.5, %v6641_v7  ;;  %6648 = vtanh.f32 %v420_v60 }
  0x89   :  { %5565 = vmatmul.mubr.msk.f32.gmra.mrb[2].mxu0 %vm452_vm0, %v7255_v49  ;;  %5587 = vmatmul.mubr.msk.f32.gmra.mrb[2].mxu1 %vm452_vm0, %v7260_v63  ;;  %v404_v27 = vadd.f32 %v396_v10, %v386_v11  ;;  %v405_v31 = vadd.f32 %v397_v18, %v387_v12  ;;  %v353_v17 = vmul.f32 0.5, %v6643_v0  ;;  %6650 = vtanh.f32 %v421_v24  ;;  %v7329_v10 = vld [vmem:[%s9854_s7 + $0x48] sm:$0xff]  ;;  %v7347_v12 = vld [vmem:[%s9854_s7 + $0x58] sm:$0xff] }
  0x8a   :  { %6178 = vmatpush3.bf16.msra.mxu0 %v7141_v16  ;;  %6194 = vmatpush3.bf16.msra.mxu1 %v7250_v8  ;;  %v381_v22 = vmul.f32 %v7179_v57, %v7005_v34  ;;  %v388_v28 = vadd.f32 %v380_v15, %v370_v25  ;;  %v360_v32 = vadd.f32 0.5, %v352_v1  ;;  %v398_v16 = vmul.f32 %v7200_v40, %v7010_v35 }
  0x8b   :  { %6180 = vmatprep.subr.bf16.mxu0 %v7155_v33  ;;  %5605 = vmatprep.mubr.msk.f32.mxu0 %vm452_vm0, %v7276_v14  ;;  %v414_v37 = vadd.f32 %v7222_v48, %v404_v27  ;;  %v415_v39 = vadd.f32 %v7222_v48, %v405_v31  ;;  %v361_v30 = vadd.f32 0.5, %v353_v17  ;;  %v399_v2 = vmul.f32 %v7200_v40, %v7015_v36 }
  0x8c   :  { %v6645_v41 = vpop.eup %6644  ;;  %5627 = vmatprep.mubr.msk.f32.mxu1 %vm452_vm0, %v6977_v23  ;;  %v389_v34 = vadd.f32 %v381_v22, %v371_v26  ;;  %v372_v42 = vmul.f32 %v7176_v54, %v7028_v45  ;;  %v406_v13 = vadd.f32 %v398_v16, %v388_v28  ;;  %v373_v53 = vmul.f32 %v7176_v54, %v7033_v46 }
  0x8d   :  { %v6647_v44 = vpop.eup %6646  ;;  %v354_v47 = vmul.f32 0.5, %v6645_v41  ;;  %v422_v5 = vmul.f32 0.5, %v414_v37  ;;  %v423_v38 = vmul.f32 0.5, %v415_v39  ;;  %v7306_v35 = vpack.c.bf16 %v361_v30, %v360_v32 }
  0x8e   :  { %6182 = vmatpush3.bf16.msra.mxu0 %v7155_v33  ;;  %v355_v51 = vmul.f32 0.5, %v6647_v44  ;;  %v407_v43 = vadd.f32 %v399_v2, %v389_v34  ;;  %v416_v45 = vadd.f32 %v7222_v48, %v406_v13  ;;  %v382_v6 = vmul.f32 %v7179_v57, %v7048_v55  ;;  %v160_v13 = vld [vmem:[%s9855_s8 + $0x70] sm:$0xff] }
  0x8f   :  { %6184 = vmatprep.subr.bf16.mxu0 %v7183_v21  ;;  %v362_v36 = vadd.f32 0.5, %v354_v47  ;;  %6652 = vtanh.f32 %v422_v5  ;;  %6196 = vmatprep.subr.bf16.mxu1 %v7306_v35  ;;  %v383_v62 = vmul.f32 %v7179_v57, %v7053_v56  ;;  %v400_v3 = vmul.f32 %v7200_v40, %v7061_v59 }
  0x90   :  { %v363_v61 = vadd.f32 0.5, %v355_v51  ;;  %6654 = vtanh.f32 %v423_v38  ;;  %v417_v33 = vadd.f32 %v7222_v48, %v407_v43  ;;  %6198 = vmatpush3.bf16.msra.mxu1 %v7306_v35  ;;  %v424_v46 = vmul.f32 0.5, %v416_v45  ;;  %v146_v43 = vld [vmem:[%s9855_s8] sm:$0xff] }
  0x91   :  { %v390_v54 = vadd.f32 %v382_v6, %v372_v42  ;;  %v401_v9 = vmul.f32 %v7200_v40, %v7073_v19  ;;  %v391_v57 = vadd.f32 %v383_v62, %v373_v53  ;;  %v7336_v19 = vld [vmem:[%s9854_s7 + $0x50] sm:$0xff]  ;;  %v147_v53 = vld [vmem:[%s9855_s8 + $0x8] sm:$0xff]  ;;  %s7485_s7 = sld [smem:[#allocation7 + $0x37]]  ;;  %v7542_v45 = vstv %s7471_s2  ;;  %s7562_s2 = sld [smem:[#allocation7 + $0x2a]] }
  0x92   :  { %6186 = vmatpush3.bf16.msra.mxu0 %v7183_v21  ;;  %v7324_v55 = vpack.c.bf16 %v363_v61, %v362_v36  ;;  %v425_v56 = vmul.f32 0.5, %v417_v33  ;;  %v6649_v60 = vpop.eup %6648  ;;  %6656 = vtanh.f32 %v424_v46  ;;  %v7467_v36 = vpack.c.bf16 %v147_v53, %v146_v43 }
  0x93   :  { %6204 = vmatprep.subr.bf16.mxu0 %v7216_v20  ;;  %v408_v11 = vadd.f32 %v400_v3, %v390_v54  ;;  %v6651_v59 = vpop.eup %6650  ;;  %v409_v21 = vadd.f32 %v401_v9, %v391_v57  ;;  %v436_v18 = vmul.f32 0.5, %v6649_v60  ;;  %v7549_v6 = vstv %s7473_s4  ;;  %s7576_s4 = sld [smem:[#allocation7 + $0x13]] }
  0x94   :  { %6200 = vmatprep.subr.bf16.mxu1 %v7324_v55  ;;  %6658 = vtanh.f32 %v425_v56  ;;  %v437_v7 = vmul.f32 0.5, %v6651_v59  ;;  %10110 = vst [vmem:[#allocation23_spill] sm:$0xff] %v7467_v36  ;;  %v7552_v61 = vstv %s7475_s26  ;;  %v7555_v33 = vstv %s7477_s27  ;;  %s7578_s26 = sld [smem:[#allocation7 + $0x2e]]  ;;  %s10124_s27 = sld [smem:[#allocation24_spill]] }
  0x95   :  { %6202 = vmatpush3.bf16.msra.mxu1 %v7324_v55  ;;  %5606 = vmatmul.mubr.msk.f32.vlgmr.msra.gmra.mrb[4].mxu0 %vm452_vm0, %v7329_v10  ;;  %v418_v40 = vadd.f32 %v7222_v48, %v408_v11  ;;  %v419_v24 = vadd.f32 %v7222_v48, %v409_v21  ;;  %v444_v48 = vadd.f32 0.5, %v436_v18  ;;  %10118 = vst [vmem:[#allocation31_spill] sm:$0xff] %v7552_v61  ;;  %v7558_v62 = vstv %s7479_s23  ;;  %s10125_s23 = sld [smem:[#allocation25_spill]] }
  0x96   :  { %6206 = vmatpush3.bf16.msra.mxu0 %v7216_v20  ;;  %6220 = vmatprep.subr.bf16.mxu1 %v7216_v20  ;;  %v445_v1 = vadd.f32 0.5, %v437_v7  ;;  %v7565_v46 = vstv %s7481_s28  ;;  %v7568_v54 = vstv %s7483_s29  ;;  %v7574_v9 = vstv %s7487_s30  ;;  %s7592_s28 = sld [smem:[#allocation7 + $0x16]]  ;;  %s10126_s29 = sld [smem:[#allocation26_spill]] }
  0x97   :  { %5608 = vmatprep.mubr.msk.f32.mxu0 %vm452_vm0, %v7336_v19  ;;  %6208 = vmatprep.subr.bf16.mxu0 %v7250_v8  ;;  %v426_v25 = vmul.f32 0.5, %v418_v40  ;;  %v427_v26 = vmul.f32 0.5, %v419_v24  ;;  %10119 = vst [vmem:[#allocation32_spill] sm:$0xff] %v7565_v46  ;;  %10120 = vst [vmem:[#allocation33_spill] sm:$0xff] %v7568_v54  ;;  %v7571_v3 = vstv %s7485_s7  ;;  %v7587_v56 = vstv %s7493_s25  ;;  %s7594_s7 = sld [smem:[#allocation7 + $0x31]]  ;;  %s10128_s30 = sld [smem:[#allocation27_spill]] }
  0x98   :  { %5628 = vmatmul.mubr.msk.f32.vlgmr.msra.gmra.mrb[4].mxu1 %vm452_vm0, %v7209_v4  ;;  %v6235_v22 = vpack.c.bf16 %v445_v1, %v444_v48  ;;  %10121 = vst [vmem:[#allocation34_spill] sm:$0xff] %v7571_v3  ;;  %10122 = vst [vmem:[#allocation35_spill] sm:$0xff] %v7574_v9  ;;  %v7590_v57 = vstv %s7495_s12  ;;  %v7597_v60 = vstv %s7497_s13  ;;  %v7600_v11 = vstv %s7499_s14  ;;  %s7622_s25 = sld [smem:[#allocation7 + $0x15]]  ;;  %s10136_s14 = sld [smem:[#allocation30_spill]] }
  0x99   :  { %v6653_v15 = vpop.eup %6652  ;;  %6222 = vmatpush3.bf16.msra.mxu1 %v7216_v20  ;;  %5609 = vmatmul.mubr.msk.f32.gmra.mrb[6].mxu0 %vm452_vm0, %v7347_v12  ;;  %6660 = vtanh.f32 %v426_v25  ;;  %10123 = vst [vmem:[#allocation36_spill] sm:$0xff] %v7587_v56  ;;  %10127 = vst [vmem:[#allocation37_spill] sm:$0xff] %v7600_v11  ;;  %v7603_v59 = vstv %s7501_s1  ;;  %v7611_v21 = vstv %s7505_s15  ;;  %v7614_v40 = vstv %s7507_s16  ;;  %s10133_s12 = sld [smem:[#allocation29_spill]]  ;;  %s7638_s1 = sld [smem:[#allocation7 + $0x19]] }
  0x9a   :  { %v6655_v0 = vpop.eup %6654  ;;  %5630 = vmatprep.mubr.msk.f32.mxu1 %vm452_vm0, %v7228_v52  ;;  %6210 = vmatpush3.bf16.msra.mxu0 %v7250_v8  ;;  %6662 = vtanh.f32 %v427_v26  ;;  %v438_v27 = vmul.f32 0.5, %v6653_v15  ;;  %10129 = vst [vmem:[#allocation38_spill] sm:$0xff] %v7603_v59  ;;  %10132 = vst [vmem:[#allocation40_spill] sm:$0xff] %v7611_v21  ;;  %v7620_v18 = vstv %s7511_s18  ;;  %s7624_s13 = sld [smem:[#allocation7 + $0x2d]]  ;;  %v7627_v7 = vstv %s7513_s19  ;;  %s7654_s15 = sld [smem:[#allocation7 + $0x34]] }
  0x9b   :  { %6224 = vmatprep.subr.bf16.mxu1 %v7250_v8  ;;  %6212 = vmatprep.subr.bf16.mxu0 %v7306_v35  ;;  %v439_v31 = vmul.f32 0.5, %v6655_v0  ;;  %v7630_v24 = vstv %s10124_s27  ;;  %v7633_v25 = vstv %s10125_s23  ;;  %v7646_v0 = vstv %s7523_s6  ;;  %s7656_s16 = sld [smem:[#allocation7 + $0x18]]  ;;  %s7686_s18 = sld [smem:[#allocation7 + $0xe]] }
  0x9c   :  { %5631 = vmatmul.mubr.msk.f32.gmra.mrb[6].mxu1 %vm452_vm0, %v7255_v49  ;;  %5649 = vmatprep.mubr.msk.f32.mxu0 %vm452_vm0, %v6996_v29  ;;  %v6657_v20 = vpop.eup %6656  ;;  %v446_v28 = vadd.f32 0.5, %v438_v27  ;;  %10134 = vst [vmem:[#allocation41_spill] sm:$0xff] %v7633_v25  ;;  %v7636_v26 = vstv %s10126_s29  ;;  %10138 = vst [vmem:[#allocation44_spill] sm:$0xff] %v7646_v0  ;;  %v7649_v48 = vstv %s7525_s11  ;;  %v7659_v27 = vstv %s7533_s21  ;;  %s7670_s11 = sld [smem:[#allocation7 + $0x33]]  ;;  %s7688_s19 = sld [smem:[#allocation7 + $0x11]] }
  0x9d   :  { %6226 = vmatpush3.bf16.msra.mxu1 %v7250_v8  ;;  %5671 = vmatprep.mubr.msk.f32.mxu1 %vm452_vm0, %v7276_v14  ;;  %v447_v32 = vadd.f32 0.5, %v439_v31  ;;  %v440_v37 = vmul.f32 0.5, %v6657_v20  ;;  %10135 = vst [vmem:[#allocation42_spill] sm:$0xff] %v7636_v26  ;;  %v7643_v15 = vstv %s10128_s30  ;;  %v7662_v31 = vstv %s7535_s22  ;;  %s8280_s21 = sld [smem:[#allocation7 + $0x2c]]  ;;  %s8284_s22 = sld [smem:[#allocation7 + $0x2f]] }
  0x9e   :  { %v6659_v17 = vpop.eup %6658  ;;  %6214 = vmatpush3.bf16.msra.mxu0 %v7306_v35  ;;  %6228 = vmatprep.subr.bf16.mxu1 %v7306_v35  ;;  %10137 = vst [vmem:[#allocation43_spill] sm:$0xff] %v7643_v15  ;;  %s8324_s6 = sld [smem:[#allocation7 + $0x40]]  ;;  %s8400_s27 = sld [smem:[#allocation7 + $0x4c]] }
  0x9f   :  { %6216 = vmatprep.subr.bf16.mxu0 %v7324_v55  ;;  %v441_v39 = vmul.f32 0.5, %v6659_v17  ;;  %v6239_v16 = vpack.c.bf16 %v447_v32, %v446_v28  ;;  %v448_v41 = vadd.f32 0.5, %v440_v37  ;;  %v7665_v20 = vstv %s10133_s12  ;;  %s8411_s23 = sld [smem:[#allocation7 + $0x4f]]  ;;  %s8434_s29 = sld [smem:[#allocation7 + $0x42]] }
  0xa0   :  { %v7678_v28 = vstv %s10136_s14  ;;  %v7681_v32 = vstv %s7544_s10  ;;  %v7684_v37 = vstv %s7546_s9  ;;  %s10144_s10 = sld [smem:[#allocation144_spill]]  ;;  %v7751_v43 = vstv %s7638_s1  ;;  %s8264_s9 = sld [smem:[#allocation7 + $0x26]] }
  0xa1   :  { %6230 = vmatpush3.bf16.msra.mxu1 %v7306_v35  ;;  %v449_v30 = vadd.f32 0.5, %v441_v39  ;;  %v161_v35 = vld [vmem:[%s9855_s8 + $0x78] sm:$0xff]  ;;  %v7691_v39 = vstv %s7576_s4  ;;  %10149 = vst [vmem:[#allocation54_spill] sm:$0xff] %v7751_v43  ;;  %v7754_v53 = vstv %s7654_s15  ;;  %v7776_v43 = vstv %s7686_s18  ;;  %s8228_s18 = sld [smem:[#allocation7 + $0x14]]  ;;  %s8368_s4 = sld [smem:[#allocation7 + $0x46]] }
  0xa2   :  { %6218 = vmatpush3.bf16.msra.mxu0 %v7324_v55  ;;  %6232 = vmatprep.subr.bf16.mxu1 %v7324_v55  ;;  %v7453_v51 = vpack.c.bf16 %v161_v35, %v160_v13  ;;  %10139 = vst [vmem:[#allocation45_spill] sm:$0xff] %v7691_v39  ;;  %10150 = vst [vmem:[#allocation55_spill] sm:$0xff] %v7754_v53  ;;  %s8453_s30 = sld [smem:[#allocation7 + $0x48]]  ;;  %s8521_s12 = sld [smem:[#allocation7 + $0x41]] }
  0xa3   :  { %v6661_v8 = vpop.eup %6660  ;;  %6236 = vmatprep.subr.bf16.mxu0 %v6235_v22  ;;  %v6243_v44 = vpack.c.bf16 %v449_v30, %v448_v41  ;;  %v7700_v41 = vstv %s7562_s2  ;;  %v7703_v30 = vstv %s7592_s28  ;;  %10159 = vst [vmem:[#allocation64_spill] sm:$0xff] %v7776_v43  ;;  %s8335_s2 = sld [smem:[#allocation7 + $0x43]]  ;;  %s8426_s28 = sld [smem:[#allocation7 + $0x3f]] }
  0xa4   :  { %v6663_v34 = vpop.eup %6662  ;;  %v442_v2 = vmul.f32 0.5, %v6661_v8  ;;  %10109 = vst [vmem:[#allocation22_spill] sm:$0xff] %v7453_v51  ;;  %v7694_v8 = vstv %s7578_s26  ;;  %10141 = vst [vmem:[#allocation47_spill] sm:$0xff] %v7700_v41  ;;  %s8381_s26 = sld [smem:[#allocation7 + $0x49]]  ;;  %s8552_s14 = sld [smem:[#allocation7 + $0x4a]] }
  0xa5   :  { %6234 = vmatpush3.bf16.msra.mxu1 %v7324_v55  ;;  %5650 = vmatmul.mubr.msk.f32.vlgmr.msra.gmra.mrb[8].mxu0 %vm452_vm0, %v7214_v50  ;;  %v443_v42 = vmul.f32 0.5, %v6663_v34  ;;  %v7581_v55 = vstv %s7489_s24  ;;  %s7608_s24 = sld [smem:[#allocation7 + $0x12]]  ;;  %10140 = vst [vmem:[#allocation46_spill] sm:$0xff] %v7694_v8  ;;  %10142 = vst [vmem:[#allocation48_spill] sm:$0xff] %v7703_v30  ;;  %v7706_v34 = vstv %s7594_s7  ;;  %s8446_s7 = sld [smem:[#allocation7 + $0x45]] }
  0xa6   :  { %6238 = vmatpush3.bf16.msra.mxu0 %v6235_v22  ;;  %6252 = vmatprep.subr.bf16.mxu1 %v6235_v22  ;;  %v450_v47 = vadd.f32 0.5, %v442_v2  ;;  %10143 = vst [vmem:[#allocation49_spill] sm:$0xff] %v7706_v34  ;;  %v148_v2 = vld [vmem:[%s10144_s10 + $0x10] sm:$0xff]  ;;  %v165_v35 = vld [vmem:[%s10144_s10 + $0x98] sm:$0xff]  ;;  %s8559_s1 = sld [smem:[#allocation7 + $0x4d]]  ;;  %s9001_s15 = sld [smem:[#allocation10 + $0x2]] }
  0xa7   :  { %5652 = vmatprep.mubr.msk.f32.mxu0 %vm452_vm0, %v7241_v58  ;;  %6240 = vmatprep.subr.bf16.mxu0 %v6239_v16  ;;  %v451_v5 = vadd.f32 0.5, %v443_v42  ;;  %v149_v42 = vld [vmem:[%s10144_s10 + $0x18] sm:$0xff]  ;;  %v164_v13 = vld [vmem:[%s10144_s10 + $0x90] sm:$0xff] }
  0xa8   :  { %5672 = vmatmul.mubr.msk.f32.vlgmr.msra.gmra.mrb[8].mxu1 %vm452_vm0, %v7329_v10  ;;  %v7770_v30 = vpack.c.bf16 %v165_v35, %v164_v13 }
  0xa9   :  { %6254 = vmatpush3.bf16.msra.mxu1 %v6235_v22  ;;  %5653 = vmatmul.mubr.msk.f32.gmra.mrb[10].mxu0 %vm452_vm0, %v7260_v63  ;;  %v6247_v38 = vpack.c.bf16 %v451_v5, %v450_v47  ;;  %v150_v47 = vld [vmem:[%s10144_s10 + $0x20] sm:$0xff]  ;;  %v151_v5 = vld [vmem:[%s10144_s10 + $0x28] sm:$0xff] }
  0xaa   :  { %5674 = vmatprep.mubr.msk.f32.mxu1 %vm452_vm0, %v7336_v19  ;;  %6242 = vmatpush3.bf16.msra.mxu0 %v6239_v16  ;;  %10157 = vst [vmem:[#allocation62_spill] sm:$0xff] %v7770_v30 }
  0xab   :  { %6256 = vmatprep.subr.bf16.mxu1 %v6239_v16  ;;  %6244 = vmatprep.subr.bf16.mxu0 %v6243_v44 }
  0xac   :  { %5675 = vmatmul.mubr.msk.f32.gmra.mrb[10].mxu1 %vm452_vm0, %v7347_v12  ;;  %5693 = vmatprep.mubr.msk.f32.mxu0 %vm452_vm0, %v6977_v23  ;;  %v154_v23 = vld [vmem:[%s9855_s8 + $0x40] sm:$0xff]  ;;  %10321 = sst [smem:[#allocation26_spill]] %s9001_s15 }
  0xad   :  { %6258 = vmatpush3.bf16.msra.mxu1 %v6239_v16  ;;  %5715 = vmatprep.mubr.msk.f32.mxu1 %vm452_vm0, %v6996_v29  ;;  %v155_v29 = vld [vmem:[%s9855_s8 + $0x48] sm:$0xff] }
  0xae   :  { %6246 = vmatpush3.bf16.msra.mxu0 %v6243_v44  ;;  %6260 = vmatprep.subr.bf16.mxu1 %v6243_v44 }
  0xaf   :  { %6248 = vmatprep.subr.bf16.mxu0 %v6247_v38 }
  0xb1   :  { %6262 = vmatpush3.bf16.msra.mxu1 %v6243_v44 }
  0xb2   :  { %6250 = vmatpush3.bf16.msra.mxu0 %v6247_v38  ;;  %6264 = vmatprep.subr.bf16.mxu1 %v6247_v38 }
  0xb3   :  { %6268 = vmatprep.subr.bf16.mxu0 %v6235_v22 }
  0xb5   :  { %6266 = vmatpush3.bf16.msra.mxu1 %v6247_v38  ;;  %5694 = vmatmul.mubr.msk.f32.vlgmr.msra.gmra.mrb[12].mxu0 %vm452_vm0, %v7209_v4  ;;  %v7419_v4 = vpack.c.bf16 %v155_v29, %v154_v23  ;;  %v7727_v23 = vstv %s7624_s13  ;;  %v153_v29 = vld [vmem:[%s10144_s10 + $0x38] sm:$0xff]  ;;  %s8530_s13 = sld [smem:[#allocation7 + $0x44]] }
  0xb6   :  { %6270 = vmatpush3.bf16.msra.mxu0 %v6235_v22  ;;  %5696 = vmatprep.mubr.msk.f32.mxu0 %vm452_vm0, %v7228_v52  ;;  %v157_v52 = vld [vmem:[%s9855_s8 + $0x58] sm:$0xff]  ;;  %v7675_v22 = vstv %s7537_s5  ;;  %10146 = vst [vmem:[#allocation51_spill] sm:$0xff] %v7727_v23  ;;  %s8306_s5 = sld [smem:[#allocation7 + $0x35]] }
  0xb7   :  { %6272 = vmatprep.subr.bf16.mxu0 %v6239_v16  ;;  %10106 = vst [vmem:[#allocation19_spill] sm:$0xff] %v7419_v4  ;;  %6284 = vmatprep.subr.bf16.mxu1 %v7419_v4 }
  0xb8   :  { %5716 = vmatmul.mubr.msk.f32.vlgmr.msra.gmra.mrb[12].mxu1 %vm452_vm0, %v7214_v50  ;;  %v156_v50 = vld [vmem:[%s9855_s8 + $0x50] sm:$0xff] }
  0xb9   :  { %5697 = vmatmul.mubr.msk.f32.gmra.mrb[14].mxu0 %vm452_vm0, %v7255_v49  ;;  %5718 = vmatprep.mubr.msk.f32.mxu1 %vm452_vm0, %v7241_v58  ;;  %v7427_v58 = vpack.c.bf16 %v157_v52, %v156_v50  ;;  %v158_v49 = vld [vmem:[%s9855_s8 + $0x60] sm:$0xff]  ;;  %v163_v52 = vld [vmem:[%s10144_s10 + $0x88] sm:$0xff] }
  0xba   :  { %6274 = vmatpush3.bf16.msra.mxu0 %v6239_v16  ;;  %5737 = vmatprep.mubr.msk.f32.mxu0 %vm452_vm0, %v7276_v14  ;;  %v7697_v16 = vstv %s7560_s20  ;;  %v162_v50 = vld [vmem:[%s10144_s10 + $0x80] sm:$0xff]  ;;  %s8293_s20 = sld [smem:[#allocation7 + $0x32]] }
  0xbb   :  { %6276 = vmatprep.subr.bf16.mxu0 %v6243_v44  ;;  %10107 = vst [vmem:[#allocation20_spill] sm:$0xff] %v7427_v58  ;;  %6286 = vmatpush3.bf16.msra.mxu1 %v7419_v4 }
  0xbc   :  { %5719 = vmatmul.mubr.msk.f32.gmra.mrb[14].mxu1 %vm452_vm0, %v7260_v63  ;;  %v159_v63 = vld [vmem:[%s9855_s8 + $0x68] sm:$0xff]  ;;  %6288 = vmatprep.subr.bf16.mxu1 %v7427_v58  ;;  %s7531_s8 = sld [smem:[#allocation7 + $0x24]] }
  0xbd   :  { %v7441_v14 = vpack.c.bf16 %v159_v63, %v158_v49  ;;  %v7739_v49 = vstv %s7622_s25  ;;  %s8540_s25 = sld [smem:[#allocation7 + $0x47]] }
  0xbe   :  { %6278 = vmatpush3.bf16.msra.mxu0 %v6243_v44  ;;  %v7715_v44 = vstv %s7608_s24  ;;  %10147 = vst [vmem:[#allocation52_spill] sm:$0xff] %v7739_v49  ;;  %s8466_s24 = sld [smem:[#allocation7 + $0x4b]] }
  0xbf   :  { %6280 = vmatprep.subr.bf16.mxu0 %v6247_v38  ;;  %10108 = vst [vmem:[#allocation21_spill] sm:$0xff] %v7441_v14  ;;  %6290 = vmatpush3.bf16.msra.mxu1 %v7427_v58  ;;  %10145 = vst [vmem:[#allocation50_spill] sm:$0xff] %v7715_v44 }
  0xc0   :  { %6292 = vmatprep.subr.bf16.mxu1 %v7441_v14 }
  0xc2   :  { %6282 = vmatpush3.bf16.msra.mxu0 %v6247_v38  ;;  %v7668_v17 = vstv %s7531_s8  ;;  %v152_v38 = vld [vmem:[%s10144_s10 + $0x30] sm:$0xff]  ;;  %s8252_s8 = sld [smem:[#allocation7 + $0x1a]] }
  0xc3   :  { %6332 = vmatprep.subr.bf16.mxu0 %v7419_v4  ;;  %6294 = vmatpush3.bf16.msra.mxu1 %v7441_v14 }
  0xc4   :  { %6296 = vmatprep.subr.bf16.mxu1 %v7453_v51 }
  0xc5   :  { %5738 = vmatmul.mubr.msk.f32.vlgmr.msra.gmra.mrb[16].mxu0 %vm452_vm0, %v7329_v10  ;;  %v7584_v10 = vstv %s7491_s0  ;;  %s10131_s0 = sld [smem:[#allocation28_spill]] }
  0xc6   :  { %5740 = vmatprep.mubr.msk.f32.mxu0 %vm452_vm0, %v7336_v19  ;;  %6334 = vmatpush3.bf16.msra.mxu0 %v7419_v4  ;;  %v7606_v19 = vstv %s7503_s3  ;;  %s7640_s3 = sld [smem:[#allocation7 + $0x30]]  ;;  %v7764_v4 = vpack.c.bf16 %v151_v5, %v150_v47 }
  0xc7   :  { %6336 = vmatprep.subr.bf16.mxu0 %v7427_v58  ;;  %6298 = vmatpush3.bf16.msra.mxu1 %v7453_v51  ;;  %10130 = vst [vmem:[#allocation39_spill] sm:$0xff] %v7606_v19 }
  0xc8   :  { %6300 = vmatprep.subr.bf16.mxu1 %v7467_v36  ;;  %10154 = vst [vmem:[#allocation59_spill] sm:$0xff] %v7764_v4 }
  0xc9   :  { %5741 = vmatmul.mubr.msk.f32.gmra.mrb[18].mxu0 %vm452_vm0, %v7347_v12  ;;  %v7617_v12 = vstv %s7509_s17  ;;  %s7672_s17 = sld [smem:[#allocation7 + $0xb]] }
  0xca   :  { %6338 = vmatpush3.bf16.msra.mxu0 %v7427_v58  ;;  %v7762_v58 = vstv %s7670_s11  ;;  %s10317_s11 = sld [smem:[#allocation145_spill]] }
  0xcb   :  { %6340 = vmatprep.subr.bf16.mxu0 %v7441_v14  ;;  %v7652_v1 = vstv %s10131_s0  ;;  %10153 = vst [vmem:[#allocation58_spill] sm:$0xff] %v7762_v58  ;;  %s8503_s0 = sld [smem:[#allocation7 + $0x4e]] }
  0xcc   :  { %v7742_v63 = vstv %s7640_s3  ;;  %s8721_s3 = sld [smem:[#allocation7 + $0x50]] }
  0xcd   :  { %10148 = vst [vmem:[#allocation53_spill] sm:$0xff] %v7742_v63  ;;  %v7768_v63 = vpack.c.bf16 %v163_v52, %v162_v50 }
  0xce   :  { %6342 = vmatpush3.bf16.msra.mxu0 %v7441_v14  ;;  %v7759_v14 = vstv %s7656_s16  ;;  %s9003_s16 = sld [smem:[#allocation10 + $0x1b]] }
  0xcf   :  { %6344 = vmatprep.subr.bf16.mxu0 %v7453_v51  ;;  %10152 = vst [vmem:[#allocation57_spill] sm:$0xff] %v7759_v14  ;;  %10156 = vst [vmem:[#allocation61_spill] sm:$0xff] %v7768_v63  ;;  %v7773_v23 = vstv %s7672_s17  ;;  %s9007_s17 = sld [smem:[#allocation10 + $0x1d]] }
  0xd0   :  { %10158 = vst [vmem:[#allocation63_spill] sm:$0xff] %v7773_v23 }
  0xd2   :  { %6346 = vmatpush3.bf16.msra.mxu0 %v7453_v51  ;;  %v7756_v51 = vpack.c.bf16 %v149_v42, %v148_v2  ;;  %v7779_v2 = vstv %s7688_s19  ;;  %s8239_s19 = sld [smem:[#allocation7 + $0x17]] }
  0xd3   :  { %6348 = vmatprep.subr.bf16.mxu0 %v7467_v36  ;;  %v7766_v36 = vpack.c.bf16 %v153_v29, %v152_v38  ;;  %10160 = vst [vmem:[#allocation65_spill] sm:$0xff] %v7779_v2 }
  0xd4   :  { %10151 = vst [vmem:[#allocation56_spill] sm:$0xff] %v7756_v51  ;;  %10322 = sst [smem:[#allocation27_spill]] %s9003_s16 }
  0xd5   :  { %10155 = vst [vmem:[#allocation60_spill] sm:$0xff] %v7766_v36  ;;  %10324 = sst [smem:[#allocation29_spill]] %s9007_s17 }
 0x158   :  { %v5563_v49 = vpop.f32.mrb[0].mxu0  ;;  %v5585_v34 = vpop.f32.mrb[0].mxu1 }
 0x159   :  { %v1257_v42 = vmul.f32 %v5563_v49, %v7542_v45  ;;  %v1343_v51 = vmul.f32 %v5563_v49, %v7549_v6  ;;  %v1623_v47 = vmul.f32 %v5563_v49, %v7552_v61  ;;  %v1832_v5 = vmul.f32 %v5563_v49, %v7555_v33  ;;  %v7785_v38 = vpop.f32.mrb[1].mxu0  ;;  %v7787_v29 = vpop.f32.mrb[1].mxu1 }
 0x15a   :  { %10161 = vst [vmem:[#allocation66_spill] sm:$0xff] %v7785_v38  ;;  %10162 = vst [vmem:[#allocation67_spill] sm:$0xff] %v7787_v29  ;;  %v1918_v50 = vmul.f32 %v5563_v49, %v7558_v62  ;;  %v2198_v52 = vmul.f32 %v5563_v49, %v7565_v46  ;;  %v2407_v13 = vmul.f32 %v5563_v49, %v7568_v54 }
 0x15b   :  { %v2493_v35 = vmul.f32 %v5563_v49, %v7571_v3  ;;  %v2773_v30 = vmul.f32 %v5563_v49, %v7574_v9  ;;  %v1263_v63 = vmul.f32 %v5585_v34, %v7581_v55  ;;  %v1349_v36 = vmul.f32 %v5585_v34, %v7584_v10 }
 0x15c   :  { %v1629_v2 = vmul.f32 %v5585_v34, %v7587_v56  ;;  %v1838_v43 = vmul.f32 %v5585_v34, %v7590_v57  ;;  %v1924_v4 = vmul.f32 %v5585_v34, %v7597_v60  ;;  %v2204_v23 = vmul.f32 %v5585_v34, %v7600_v11  ;;  %v7801_v58 = vpop.f32.mrb[2].mxu0  ;;  %v7803_v54 = vpop.f32.mrb[2].mxu1 }
 0x15d   :  { %v2413_v46 = vmul.f32 %v5585_v34, %v7603_v59  ;;  %10163 = vst [vmem:[#allocation68_spill] sm:$0xff] %v7801_v58  ;;  %10164 = vst [vmem:[#allocation69_spill] sm:$0xff] %v7803_v54  ;;  %v7805_v3 = vadd.f32 %v1263_v63, %v1257_v42  ;;  %v7807_v49 = vadd.f32 %v1349_v36, %v1343_v51  ;;  %v7812_v53 = vpop.f32.mrb[3].mxu0  ;;  %v7814_v44 = vpop.f32.mrb[3].mxu1 }
 0x15e   :  { %v7809_v9 = vadd.f32 %v1629_v2, %v1623_v47  ;;  %v2499_v14 = vmul.f32 %v5585_v34, %v7606_v19  ;;  %10165 = vst [vmem:[#allocation70_spill] sm:$0xff] %v7812_v53  ;;  %10166 = vst [vmem:[#allocation71_spill] sm:$0xff] %v7814_v44  ;;  %v1842_v8 = vadd.f32 %v1838_v43, %v1832_v5 }
 0x15f   :  { %v1928_v11 = vadd.f32 %v1924_v4, %v1918_v50  ;;  %v2208_v39 = vadd.f32 %v2204_v23, %v2198_v52  ;;  %v2417_v59 = vadd.f32 %v2413_v46, %v2407_v13  ;;  %v2779_v41 = vmul.f32 %v5585_v34, %v7611_v21 }
 0x160   :  { %v2503_v56 = vadd.f32 %v2499_v14, %v2493_v35  ;;  %v1342_v63 = vmul.f32 %v7549_v6, %v7785_v38  ;;  %v1348_v51 = vmul.f32 %v7584_v10, %v7787_v29  ;;  %v1917_v36 = vmul.f32 %v7558_v62, %v7785_v38  ;;  %v166_v35 = vld [vmem:[%s10144_s10 + $0xa0] sm:$0xff] }
 0x161   :  { %v1923_v2 = vmul.f32 %v7597_v60, %v7787_v29  ;;  %v1344_v4 = vmul.f32 %v7549_v6, %v7812_v53  ;;  %v1350_v14 = vmul.f32 %v7584_v10, %v7814_v44  ;;  %v7829_v46 = vadd.f32 %v2779_v41, %v2773_v30 }
 0x162   :  { %v7831_v34 = vadd.f32 %v1348_v51, %v1342_v63  ;;  %v1919_v23 = vmul.f32 %v7558_v62, %v7812_v53  ;;  %v1925_v43 = vmul.f32 %v7597_v60, %v7814_v44  ;;  %v1345_v5 = vmul.f32 %v7801_v58, %v7549_v6  ;;  %v167_v6 = vld [vmem:[%s10144_s10 + $0xa8] sm:$0xff]  ;;  %v168_v51 = vld [vmem:[%s10144_s10 + $0xb0] sm:$0xff] }
 0x163   :  { %v7837_v42 = vadd.f32 %v1923_v2, %v1917_v36  ;;  %v7839_v47 = vadd.f32 %v1350_v14, %v1344_v4  ;;  %v1351_v50 = vmul.f32 %v7803_v54, %v7584_v10  ;;  %v1920_v30 = vmul.f32 %v7801_v58, %v7558_v62  ;;  %v169_v36 = vld [vmem:[%s10144_s10 + $0xb8] sm:$0xff]  ;;  %s8274_s10 = sld [smem:[#allocation7 + $0x29]] }
 0x164   :  { %v7845_v41 = vadd.f32 %v1925_v43, %v1919_v23  ;;  %v1926_v52 = vmul.f32 %v7803_v54, %v7597_v60  ;;  %v1256_v13 = vmul.f32 %v7542_v45, %v7785_v38  ;;  %v1262_v63 = vmul.f32 %v7581_v55, %v7787_v29 }
 0x165   :  { %v7859_v10 = vadd.f32 %v1351_v50, %v1345_v5  ;;  %v1831_v62 = vmul.f32 %v7555_v33, %v7785_v38  ;;  %v1837_v60 = vmul.f32 %v7590_v57, %v7787_v29  ;;  %v1258_v4 = vmul.f32 %v7542_v45, %v7812_v53 }
 0x166   :  { %v7873_v2 = vadd.f32 %v1926_v52, %v1920_v30  ;;  %v1264_v14 = vmul.f32 %v7581_v55, %v7814_v44  ;;  %v1833_v23 = vmul.f32 %v7555_v33, %v7812_v53  ;;  %v7881_v43 = vadd.f32 %v1262_v63, %v1256_v13 }
 0x167   :  { %v7883_v5 = vadd.f32 %v1837_v60, %v1831_v62  ;;  %v1839_v50 = vmul.f32 %v7590_v57, %v7814_v44  ;;  %v7887_v21 = vpack.c.bf16 %v167_v6, %v166_v35  ;;  %v7893_v52 = vmul.f32 %v7801_v58, %v7542_v45 }
 0x168   :  { %v7889_v30 = vadd.f32 %v1264_v14, %v1258_v4  ;;  %v7897_v19 = vmul.f32 %v7803_v54, %v7581_v55  ;;  %v7899_v53 = vpack.c.bf16 %v169_v36, %v168_v51  ;;  %v5607_v13 = vpop.f32.mrb[4].mxu0  ;;  %v7905_v62 = vmul.f32 %v7801_v58, %v7555_v33 }
 0x169   :  { %10167 = vst [vmem:[#allocation72_spill] sm:$0xff] %v7887_v21  ;;  %v7901_v63 = vadd.f32 %v1839_v50, %v1833_v23  ;;  %v7909_v35 = vmul.f32 %v7803_v54, %v7590_v57  ;;  %v7913_v45 = vmul.f32 %v7552_v61, %v7785_v38  ;;  %v1273_v55 = vmul.f32 %v5607_v13, %v7614_v40  ;;  %v7919_v36 = vpop.f32.mrb[5].mxu0 }
 0x16a   :  { %10168 = vst [vmem:[#allocation73_spill] sm:$0xff] %v7899_v53  ;;  %v1359_v6 = vmul.f32 %v5607_v13, %v7617_v12  ;;  %v1639_v60 = vmul.f32 %v5607_v13, %v7620_v18  ;;  %v1848_v51 = vmul.f32 %v5607_v13, %v7627_v7  ;;  %10169 = vst [vmem:[#allocation74_spill] sm:$0xff] %v7919_v36 }
 0x16b   :  { %v1934_v33 = vmul.f32 %v5607_v13, %v7630_v24  ;;  %v2214_v4 = vmul.f32 %v5607_v13, %v7633_v25  ;;  %v2423_v57 = vmul.f32 %v5607_v13, %v7636_v26  ;;  %v2509_v14 = vmul.f32 %v5607_v13, %v7643_v15  ;;  %v7930_v53 = vpop.f32.mrb[4].mxu1 }
 0x16c   :  { %v1277_v23 = vadd.f32 %v1273_v55, %v7805_v3  ;;  %v1363_v50 = vadd.f32 %v1359_v6, %v7807_v49  ;;  %v7928_v54 = vadd.f32 %v1639_v60, %v7809_v9  ;;  %v1852_v58 = vadd.f32 %v1848_v51, %v1842_v8  ;;  %10171 = vst [vmem:[#allocation76_spill] sm:$0xff] %v7930_v53  ;;  %v7938_v26 = vpop.f32.mrb[5].mxu1  ;;  %v7940_v15 = vpop.f32.mrb[6].mxu0 }
 0x16d   :  { %v1938_v21 = vadd.f32 %v1934_v33, %v1928_v11  ;;  %v7932_v44 = vadd.f32 %v2214_v4, %v2208_v39  ;;  %v7934_v61 = vadd.f32 %v2423_v57, %v2417_v59  ;;  %v7936_v25 = vadd.f32 %v2509_v14, %v2503_v56  ;;  %10175 = vst [vmem:[#allocation80_spill] sm:$0xff] %v7938_v26  ;;  %v7943_v49 = vpop.f32.mrb[7].mxu0 }
 0x16e   :  { %10170 = vst [vmem:[#allocation75_spill] sm:$0xff] %v7928_v54  ;;  %10176 = vst [vmem:[#allocation81_spill] sm:$0xff] %v7940_v15  ;;  %v2789_v3 = vmul.f32 %v5607_v13, %v7646_v0  ;;  %v1358_v9 = vmul.f32 %v7617_v12, %v7919_v36  ;;  %v1368_v11 = vmul.f32 %v7649_v48, %v7938_v26 }
 0x16f   :  { %10172 = vst [vmem:[#allocation77_spill] sm:$0xff] %v7932_v44  ;;  %10173 = vst [vmem:[#allocation78_spill] sm:$0xff] %v7934_v61  ;;  %v1369_v59 = vmul.f32 %v7930_v53, %v7649_v48  ;;  %v1933_v56 = vmul.f32 %v7630_v24, %v7919_v36  ;;  %v1943_v39 = vmul.f32 %v7652_v1, %v7938_v26  ;;  %v7962_v6 = vpop.f32.mrb[6].mxu1 }
 0x170   :  { %10174 = vst [vmem:[#allocation79_spill] sm:$0xff] %v7936_v25  ;;  %10177 = vst [vmem:[#allocation82_spill] sm:$0xff] %v7943_v49  ;;  %v1944_v8 = vmul.f32 %v7930_v53, %v7652_v1  ;;  %v1360_v13 = vmul.f32 %v7617_v12, %v7943_v49  ;;  %v7960_v55 = vadd.f32 %v2789_v3, %v7829_v46  ;;  %v7967_v4 = vpop.f32.mrb[7].mxu1 }
 0x171   :  { %v1362_v60 = vadd.f32 %v1358_v9, %v7831_v34  ;;  %v1373_v51 = vadd.f32 %v1369_v59, %v1363_v50  ;;  %v1935_v33 = vmul.f32 %v7630_v24, %v7943_v49  ;;  %10179 = vst [vmem:[#allocation84_spill] sm:$0xff] %v7967_v4  ;;  %v1937_v57 = vadd.f32 %v1933_v56, %v7837_v42 }
 0x172   :  { %10178 = vst [vmem:[#allocation83_spill] sm:$0xff] %v7960_v55  ;;  %v1948_v14 = vadd.f32 %v1944_v8, %v1938_v21  ;;  %v1364_v0 = vadd.f32 %v1360_v13, %v7839_v47  ;;  %v1361_v61 = vmul.f32 %v7940_v15, %v7617_v12  ;;  %v1370_v3 = vmul.f32 %v7649_v48, %v7967_v4 }
 0x173   :  { %v1372_v46 = vadd.f32 %v1368_v11, %v1362_v60  ;;  %v1939_v34 = vadd.f32 %v1935_v33, %v7845_v41  ;;  %v1945_v50 = vmul.f32 %v7652_v1, %v7967_v4  ;;  %v1947_v9 = vadd.f32 %v1943_v39, %v1937_v57 }
 0x174   :  { %v1365_v59 = vadd.f32 %v1361_v61, %v7859_v10  ;;  %v1371_v21 = vmul.f32 %v7962_v6, %v7649_v48  ;;  %v1936_v42 = vmul.f32 %v7940_v15, %v7630_v24  ;;  %v1374_v47 = vadd.f32 %v1370_v3, %v1364_v0 }
 0x175   :  { %v1949_v12 = vadd.f32 %v1945_v50, %v1939_v34  ;;  %v1946_v11 = vmul.f32 %v7962_v6, %v7652_v1  ;;  %v1272_v41 = vmul.f32 %v7614_v40, %v7919_v36  ;;  %v1282_v61 = vmul.f32 %v7665_v20, %v7938_v26 }
 0x176   :  { %v1375_v56 = vadd.f32 %v1371_v21, %v1365_v59  ;;  %v1940_v8 = vadd.f32 %v1936_v42, %v7873_v2  ;;  %v1283_v48 = vmul.f32 %v7930_v53, %v7665_v20  ;;  %v1847_v24 = vmul.f32 %v7627_v7, %v7919_v36 }
 0x177   :  { %v1276_v10 = vadd.f32 %v1272_v41, %v7881_v43  ;;  %v1857_v0 = vmul.f32 %v7668_v17, %v7938_v26  ;;  %v1858_v1 = vmul.f32 %v7930_v53, %v7668_v17  ;;  %v1274_v2 = vmul.f32 %v7614_v40, %v7943_v49 }
 0x178   :  { %v1950_v39 = vadd.f32 %v1946_v11, %v1940_v8  ;;  %v1287_v13 = vadd.f32 %v1283_v48, %v1277_v23  ;;  %v8003_v60 = vmul.f32 %v7665_v20, %v7967_v4  ;;  %v1851_v43 = vadd.f32 %v1847_v24, %v7883_v5  ;;  %v8010_v34 = vpop.f32.mrb[8].mxu0 }
 0x179   :  { %v1286_v33 = vadd.f32 %v1282_v61, %v1276_v10  ;;  %v1862_v57 = vadd.f32 %v1858_v1, %v1852_v58  ;;  %v8008_v3 = vmul.f32 %v7627_v7, %v7943_v49  ;;  %10180 = vst [vmem:[#allocation85_spill] sm:$0xff] %v8010_v34  ;;  %v1278_v50 = vadd.f32 %v1274_v2, %v7889_v30  ;;  %v8025_v58 = vpop.f32.mrb[9].mxu0 }
 0x17a   :  { %v8015_v23 = vmul.f32 %v7668_v17, %v7967_v4  ;;  %v8019_v59 = vadd.f32 %v7897_v19, %v7893_v52  ;;  %v8023_v5 = vmul.f32 %v7940_v15, %v7614_v40  ;;  %10181 = vst [vmem:[#allocation86_spill] sm:$0xff] %v8025_v58  ;;  %v1379_v21 = vmul.f32 %v8010_v34, %v7659_v27 }
 0x17b   :  { %v1954_v30 = vmul.f32 %v8010_v34, %v7662_v31  ;;  %v1293_v42 = vmul.f32 %v8010_v34, %v7681_v32  ;;  %v1861_v11 = vadd.f32 %v1857_v0, %v1851_v43  ;;  %v1378_v19 = vmul.f32 %v7659_v27, %v8025_v58  ;;  %v8041_v8 = vpop.f32.mrb[8].mxu1 }
 0x17c   :  { %v1953_v52 = vmul.f32 %v7662_v31, %v8025_v58  ;;  %v1292_v40 = vmul.f32 %v7681_v32, %v8025_v58  ;;  %v1867_v41 = vmul.f32 %v7684_v37, %v8025_v58  ;;  %10182 = vst [vmem:[#allocation87_spill] sm:$0xff] %v8041_v8  ;;  %v1383_v61 = vadd.f32 %v1379_v21, %v1373_v51  ;;  %v8045_v0 = vpop.f32.mrb[9].mxu1  ;;  %v8047_v1 = vpop.f32.mrb[10].mxu0 }
 0x17d   :  { %v1958_v48 = vadd.f32 %v1954_v30, %v1948_v14  ;;  %v1868_v10 = vmul.f32 %v8010_v34, %v7684_v37  ;;  %v1297_v24 = vadd.f32 %v1293_v42, %v1287_v13  ;;  %10183 = vst [vmem:[#allocation88_spill] sm:$0xff] %v8045_v0  ;;  %v1382_v2 = vadd.f32 %v1378_v19, %v1372_v46  ;;  %v8053_v4 = vpop.f32.mrb[11].mxu0 }
 0x17e   :  { %v1389_v43 = vmul.f32 %v8041_v8, %v7675_v22  ;;  %v1957_v55 = vadd.f32 %v1953_v52, %v1947_v9  ;;  %v1964_v25 = vmul.f32 %v8041_v8, %v7678_v28  ;;  %10184 = vst [vmem:[#allocation89_spill] sm:$0xff] %v8053_v4  ;;  %v1388_v51 = vmul.f32 %v7675_v22, %v8045_v0 }
 0x17f   :  { %v1963_v14 = vmul.f32 %v7678_v28, %v8045_v0  ;;  %v1381_v13 = vmul.f32 %v8047_v1, %v7659_v27  ;;  %v1956_v46 = vmul.f32 %v8047_v1, %v7662_v31  ;;  %v1380_v9 = vmul.f32 %v7659_v27, %v8053_v4  ;;  %v8067_v19 = vpop.f32.mrb[10].mxu1 }
 0x180   :  { %v1393_v21 = vadd.f32 %v1389_v43, %v1383_v61  ;;  %v1968_v30 = vadd.f32 %v1964_v25, %v1958_v48  ;;  %v1955_v42 = vmul.f32 %v7662_v31, %v8053_v4  ;;  %v1392_v52 = vadd.f32 %v1388_v51, %v1382_v2  ;;  %v8069_v34 = vpop.f32.mrb[11].mxu1 }
 0x181   :  { %v1967_v49 = vadd.f32 %v1963_v14, %v1957_v55  ;;  %v1385_v44 = vadd.f32 %v1381_v13, %v1375_v56  ;;  %v1960_v54 = vadd.f32 %v1956_v46, %v1950_v39  ;;  %10185 = vst [vmem:[#allocation90_spill] sm:$0xff] %v8069_v34  ;;  %v1384_v53 = vadd.f32 %v1380_v9, %v1374_v47  ;;  %v10186_v14 = vld [vmem:[#allocation47_spill] sm:$0xff] }
 0x182   :  { %v1959_v58 = vadd.f32 %v1955_v42, %v1949_v12  ;;  %v1391_v61 = vmul.f32 %v8067_v19, %v7675_v22  ;;  %v1966_v25 = vmul.f32 %v8067_v19, %v7678_v28  ;;  %v1390_v27 = vmul.f32 %v7675_v22, %v8069_v34  ;;  %v10190_v42 = vld [vmem:[#allocation45_spill] sm:$0xff] }
 0x183   :  { %v1965_v31 = vmul.f32 %v7678_v28, %v8069_v34  ;;  %v1296_v48 = vadd.f32 %v1292_v40, %v1286_v33  ;;  %v1302_v55 = vmul.f32 %v7697_v16, %v8045_v0  ;;  %v1303_v47 = vmul.f32 %v8041_v8, %v7697_v16 }
 0x184   :  { %v1395_v56 = vadd.f32 %v1391_v61, %v1385_v44  ;;  %v1970_v39 = vadd.f32 %v1966_v25, %v1960_v54  ;;  %v1871_v12 = vadd.f32 %v1867_v41, %v1861_v11  ;;  %v1394_v2 = vadd.f32 %v1390_v27, %v1384_v53  ;;  %v10191_v25 = vld [vmem:[#allocation46_spill] sm:$0xff] }
 0x185   :  { %v1969_v43 = vadd.f32 %v1965_v31, %v1959_v58  ;;  %v8083_v51 = vadd.f32 %v1302_v55, %v1296_v48  ;;  %v1877_v22 = vmul.f32 %v10186_v14, %v8045_v0  ;;  %v1878_v28 = vmul.f32 %v8041_v8, %v10186_v14  ;;  %v10187_v58 = vld [vmem:[#allocation36_spill] sm:$0xff]  ;;  %v10192_v27 = vld [vmem:[#allocation50_spill] sm:$0xff]  ;;  %v10193_v31 = vld [vmem:[#allocation51_spill] sm:$0xff] }
 0x186   :  { %v1307_v33 = vadd.f32 %v1303_v47, %v1297_v24  ;;  %v1872_v40 = vadd.f32 %v1868_v10, %v1862_v57  ;;  %v1288_v13 = vadd.f32 %v8003_v60, %v1278_v50  ;;  %v1294_v54 = vmul.f32 %v7681_v32, %v8053_v4 }
 0x187   :  { %v8090_v44 = vadd.f32 %v1877_v22, %v1871_v12  ;;  %v1853_v53 = vadd.f32 %v8008_v3, %v7901_v63  ;;  %v8098_v11 = vmul.f32 %v10187_v58, %v7787_v29  ;;  %v8102_v46 = vmul.f32 %v7697_v16, %v8069_v34  ;;  %v10197_v58 = vld [vmem:[#allocation49_spill] sm:$0xff] }
 0x188   :  { %v1882_v41 = vadd.f32 %v1878_v28, %v1872_v40  ;;  %v8106_v60 = vmul.f32 %v7684_v37, %v8053_v4  ;;  %v8110_v57 = vadd.f32 %v8023_v5, %v8019_v59  ;;  %v1298_v50 = vadd.f32 %v1294_v54, %v1288_v13  ;;  %v8123_v24 = vpop.f32.mrb[12].mxu0 }
 0x189   :  { %v8113_v63 = vadd.f32 %v8015_v23, %v1853_v53  ;;  %v8117_v3 = vmul.f32 %v10186_v14, %v8069_v34  ;;  %v8121_v10 = vmul.f32 %v7962_v6, %v7665_v20  ;;  %10188 = vst [vmem:[#allocation47_spill] sm:$0xff] %v8123_v24  ;;  %v8127_v9 = vmul.f32 %v8047_v1, %v7681_v32  ;;  %v8141_v20 = vpop.f32.mrb[13].mxu0 }
 0x18a   :  { %v8131_v59 = vmul.f32 %v8067_v19, %v7697_v16  ;;  %v8135_v23 = vadd.f32 %v7909_v35, %v7905_v62  ;;  %v8139_v5 = vmul.f32 %v7940_v15, %v7627_v7  ;;  %10189 = vst [vmem:[#allocation91_spill] sm:$0xff] %v8141_v20  ;;  %v1399_v61 = vmul.f32 %v8123_v24, %v10190_v42  ;;  %v10196_v15 = vld [vmem:[#allocation48_spill] sm:$0xff] }
 0x18b   :  { %v1974_v32 = vmul.f32 %v8123_v24, %v10191_v25  ;;  %v1313_v16 = vmul.f32 %v8123_v24, %v10192_v27  ;;  %v1888_v48 = vmul.f32 %v8123_v24, %v10193_v31  ;;  %v1398_v62 = vmul.f32 %v10190_v42, %v8141_v20  ;;  %v8159_v47 = vpop.f32.mrb[12].mxu1 }
 0x18c   :  { %v1973_v7 = vmul.f32 %v10191_v25, %v8141_v20  ;;  %v1312_v35 = vmul.f32 %v10192_v27, %v8141_v20  ;;  %v1887_v55 = vmul.f32 %v10193_v31, %v8141_v20  ;;  %10194 = vst [vmem:[#allocation45_spill] sm:$0xff] %v8159_v47  ;;  %v1403_v12 = vadd.f32 %v1399_v61, %v1393_v21  ;;  %v8161_v13 = vpop.f32.mrb[13].mxu1  ;;  %v8163_v54 = vpop.f32.mrb[14].mxu0 }
 0x18d   :  { %v1978_v22 = vadd.f32 %v1974_v32, %v1968_v30  ;;  %v1317_v28 = vadd.f32 %v1313_v16, %v1307_v33  ;;  %v1892_v40 = vadd.f32 %v1888_v48, %v1882_v41  ;;  %10195 = vst [vmem:[#allocation46_spill] sm:$0xff] %v8161_v13  ;;  %v1402_v53 = vadd.f32 %v1398_v62, %v1392_v52  ;;  %v8169_v24 = vpop.f32.mrb[15].mxu0 }
 0x18e   :  { %v1409_v34 = vmul.f32 %v8159_v47, %v10196_v15  ;;  %v1977_v4 = vadd.f32 %v1973_v7, %v1967_v49  ;;  %v1984_v29 = vmul.f32 %v8159_v47, %v10197_v58  ;;  %v1408_v21 = vmul.f32 %v10196_v15, %v8161_v13 }
 0x18f   :  { %v1983_v30 = vmul.f32 %v10197_v58, %v8161_v13  ;;  %v1401_v33 = vmul.f32 %v8163_v54, %v10190_v42  ;;  %v1976_v52 = vmul.f32 %v8163_v54, %v10191_v25  ;;  %v1400_v49 = vmul.f32 %v10190_v42, %v8169_v24  ;;  %v8183_v16 = vpop.f32.mrb[14].mxu1 }
 0x190   :  { %v1413_v41 = vadd.f32 %v1409_v34, %v1403_v12  ;;  %v1988_v61 = vadd.f32 %v1984_v29, %v1978_v22  ;;  %v1975_v32 = vmul.f32 %v10191_v25, %v8169_v24  ;;  %10198 = vst [vmem:[#allocation50_spill] sm:$0xff] %v8183_v16  ;;  %v1412_v48 = vadd.f32 %v1408_v21, %v1402_v53  ;;  %v8185_v8 = vpop.f32.mrb[15].mxu1 }
 0x191   :  { %v1987_v62 = vadd.f32 %v1983_v30, %v1977_v4  ;;  %v1405_v7 = vadd.f32 %v1401_v33, %v1395_v56  ;;  %v1980_v20 = vadd.f32 %v1976_v52, %v1970_v39  ;;  %v1404_v0 = vadd.f32 %v1400_v49, %v1394_v2  ;;  %v10199_v56 = vld [vmem:[#allocation52_spill] sm:$0xff] }
 0x192   :  { %v1979_v26 = vadd.f32 %v1975_v32, %v1969_v43  ;;  %v1411_v34 = vmul.f32 %v8183_v16, %v10196_v15  ;;  %v1986_v29 = vmul.f32 %v8183_v16, %v10197_v58  ;;  %v1410_v42 = vmul.f32 %v10196_v15, %v8185_v8 }
 0x193   :  { %v1985_v25 = vmul.f32 %v10197_v58, %v8185_v8  ;;  %v1316_v4 = vadd.f32 %v1312_v35, %v8083_v51  ;;  %v1322_v39 = vmul.f32 %v10199_v56, %v8161_v13  ;;  %v1323_v43 = vmul.f32 %v8159_v47, %v10199_v56  ;;  %v10200_v58 = vld [vmem:[#allocation53_spill] sm:$0xff] }
 0x194   :  { %v8198_v12 = vadd.f32 %v1411_v34, %v1405_v7  ;;  %v8200_v2 = vadd.f32 %v1986_v29, %v1980_v20  ;;  %v1891_v22 = vadd.f32 %v1887_v55, %v8090_v44  ;;  %v8205_v53 = vadd.f32 %v1410_v42, %v1404_v0  ;;  %v10202_v7 = vld [vmem:[#allocation55_spill] sm:$0xff]  ;;  %v10203_v29 = vld [vmem:[#allocation57_spill] sm:$0xff]  ;;  %v10204_v42 = vld [vmem:[#allocation58_spill] sm:$0xff] }
 0x195   :  { %v8207_v15 = vadd.f32 %v1985_v25, %v1979_v26  ;;  %v1326_v21 = vadd.f32 %v1322_v39, %v1316_v4  ;;  %v1897_v51 = vmul.f32 %v10200_v58, %v8161_v13  ;;  %v1898_v35 = vmul.f32 %v8159_v47, %v10200_v58 }
 0x196   :  { %v1327_v30 = vadd.f32 %v1323_v43, %v1317_v28  ;;  %v1308_v20 = vadd.f32 %v8102_v46, %v1298_v50  ;;  %v1314_v33 = vmul.f32 %v10192_v27, %v8169_v24  ;;  %v1324_v0 = vmul.f32 %v10199_v56, %v8185_v8 }
 0x197   :  { %v1901_v52 = vadd.f32 %v1897_v51, %v1891_v22  ;;  %v1873_v26 = vadd.f32 %v8106_v60, %v8113_v63  ;;  %v8222_v44 = vmul.f32 %v7962_v6, %v7668_v17  ;;  %v1902_v55 = vadd.f32 %v1898_v35, %v1892_v40 }
 0x198   :  { %v1318_v49 = vadd.f32 %v1314_v33, %v1308_v20  ;;  %v1889_v28 = vmul.f32 %v10193_v31, %v8169_v24  ;;  %v1289_v46 = vadd.f32 %v8121_v10, %v8110_v57  ;;  %v1899_v32 = vmul.f32 %v10200_v58, %v8185_v8  ;;  %v8241_v63 = vpop.f32.mrb[16].mxu0 }
 0x199   :  { %v1883_v50 = vadd.f32 %v8117_v3, %v1873_v26  ;;  %v1315_v60 = vmul.f32 %v8163_v54, %v10192_v27  ;;  %v8237_v17 = vadd.f32 %v8139_v5, %v8135_v23  ;;  %v8246_v3 = vmul.f32 %v8183_v16, %v10199_v56  ;;  %v8254_v27 = vpop.f32.mrb[17].mxu0  ;;  %v10201_v23 = vld [vmem:[#allocation54_spill] sm:$0xff] }
 0x19a   :  { %v1328_v40 = vadd.f32 %v1324_v0, %v1318_v49  ;;  %v1299_v57 = vadd.f32 %v8127_v9, %v1289_v46  ;;  %v8250_v10 = vmul.f32 %v8047_v1, %v7684_v37  ;;  %v1419_v5 = vmul.f32 %v8241_v63, %v10201_v23 }
 0x19b   :  { %v1994_v34 = vmul.f32 %v8241_v63, %v10202_v7  ;;  %v1333_v9 = vmul.f32 %v8241_v63, %v10203_v29  ;;  %v1908_v25 = vmul.f32 %v8241_v63, %v10204_v42  ;;  %v1418_v37 = vmul.f32 %v10201_v23, %v8254_v27 }
 0x19c   :  { %v1993_v4 = vmul.f32 %v10202_v7, %v8254_v27  ;;  %v1332_v56 = vmul.f32 %v10203_v29, %v8254_v27  ;;  %v1907_v39 = vmul.f32 %v10204_v42, %v8254_v27  ;;  %v1423_v43 = vadd.f32 %v1419_v5, %v1413_v41  ;;  %v8282_v20 = vpop.f32.mrb[18].mxu0 }
 0x19d   :  { %v1998_v22 = vadd.f32 %v1994_v34, %v1988_v61  ;;  %v8276_v51 = vadd.f32 %v1333_v9, %v1327_v30  ;;  %v8278_v35 = vadd.f32 %v1908_v25, %v1902_v55  ;;  %10205 = vst [vmem:[#allocation51_spill] sm:$0xff] %v8282_v20  ;;  %v1422_v33 = vadd.f32 %v1418_v37, %v1412_v48  ;;  %v8286_v46 = vpop.f32.mrb[19].mxu0 }
 0x19e   :  { %v1997_v0 = vadd.f32 %v1993_v4, %v1987_v62  ;;  %v1336_v26 = vadd.f32 %v1332_v56, %v1326_v21  ;;  %v1911_v49 = vadd.f32 %v1907_v39, %v1901_v52  ;;  %v1421_v41 = vmul.f32 %v8282_v20, %v10201_v23 }
 0x19f   :  { %v1996_v61 = vmul.f32 %v8282_v20, %v10202_v7  ;;  %v1893_v30 = vadd.f32 %v1889_v28, %v1883_v50  ;;  %v1309_v55 = vadd.f32 %v8131_v59, %v1299_v57  ;;  %5759 = vmatprep.mubr.msk.f32.mxu1 %vm452_vm0, %v1422_v33  ;;  %v1420_v48 = vmul.f32 %v10201_v23, %v8286_v46  ;;  %v10206_v23 = vld [vmem:[#allocation23_spill] sm:$0xff]  ;;  %v10210_v33 = vld [vmem:[#allocation63_spill] sm:$0xff] }
 0x1a0   :  { %5825 = vmatprep.mubr.msk.f32.mxu0 %vm452_vm0, %v1997_v0  ;;  %v1995_v62 = vmul.f32 %v10202_v7, %v8286_v46  ;;  %v1334_v21 = vmul.f32 %v10203_v29, %v8286_v46  ;;  %v8304_v52 = vstv %s8228_s18  ;;  %5760 = vmatmul.mubr.msk.f32.vlgmr.msra.gmra.mrb[16].mxu1 %vm452_vm0, %v1423_v43  ;;  %v1425_v59 = vadd.f32 %v1421_v41, %v8198_v12  ;;  %v10207_v12 = vld [vmem:[#allocation56_spill] sm:$0xff]  ;;  %v10211_v0 = vld [vmem:[#allocation59_spill] sm:$0xff]  ;;  %s9009_s18 = sld [smem:[#allocation10 + $0x36]] }
 0x1a1   :  { %5826 = vmatmul.mubr.msk.f32.vlgmr.msra.gmra.mrb[20].mxu0 %vm452_vm0, %v1998_v22  ;;  %v2000_v28 = vadd.f32 %v1996_v61, %v8200_v2  ;;  %v1903_v50 = vadd.f32 %v1899_v32, %v1893_v30  ;;  %v8313_v57 = vstv %s8239_s19  ;;  %6302 = vmatpush3.bf16.msra.mxu1 %v10206_v23  ;;  %v1424_v5 = vadd.f32 %v1420_v48, %v8205_v53  ;;  %v10213_v61 = vld [vmem:[#allocation64_spill] sm:$0xff]  ;;  %s1807_s19 = sld [smem:[#allocation8]] }
 0x1a2   :  { %6350 = vmatpush3.bf16.msra.mxu0 %v10206_v23  ;;  %v1999_v7 = vadd.f32 %v1995_v62, %v8207_v15  ;;  %v8319_v34 = vadd.f32 %v1334_v21, %v1328_v40  ;;  %v8322_v9 = vstv %s8252_s8  ;;  %6304 = vmatprep.subr.bf16.mxu1 %v10207_v12  ;;  %v1909_v2 = vmul.f32 %v10204_v42, %v8286_v46  ;;  %v10214_v48 = vld [vmem:[#allocation76_spill] sm:$0xff]  ;;  %v10215_v21 = vld [vmem:[#allocation85_spill] sm:$0xff]  ;;  %s5062_s8 = sld [smem:[#allocation8 + $0x1]] }
 0x1a3   :  { %6352 = vmatprep.subr.bf16.mxu0 %v10207_v12  ;;  %v1319_v32 = vadd.f32 %v1315_v60, %v1309_v55  ;;  %v1335_v53 = vmul.f32 %v8282_v20, %v10203_v29  ;;  %v8333_v15 = vstv %s8264_s9  ;;  %5762 = vmatprep.mubr.msk.f32.mxu1 %vm452_vm0, %v1424_v5  ;;  %v1864_v40 = vadd.f32 %v8222_v44, %v8237_v17  ;;  %v10208_v60 = vld [vmem:[#allocation32_spill] sm:$0xff]  ;;  %s9015_s9 = sld [smem:[#allocation10 + $0x3]] }
 0x1a4   :  { %5828 = vmatprep.mubr.msk.f32.mxu0 %vm452_vm0, %v1999_v7  ;;  %v1880_v25 = vmul.f32 %v8067_v19, %v10186_v14  ;;  %v2197_v37 = vmul.f32 %v10208_v60, %v7785_v38  ;;  %v8346_v4 = vstv %s8274_s10  ;;  %5763 = vmatmul.mubr.msk.f32.gmra.mrb[18].mxu1 %vm452_vm0, %v1425_v59  ;;  %v8350_v29 = vadd.f32 %v1909_v2, %v1903_v50  ;;  %v10217_v50 = vld [vmem:[#allocation65_spill] sm:$0xff]  ;;  %s9017_s10 = sld [smem:[#allocation10 + $0x4]] }
 0x1a5   :  { %5829 = vmatmul.mubr.msk.f32.gmra.mrb[22].mxu0 %vm452_vm0, %v2000_v28  ;;  %v1329_v56 = vadd.f32 %v8246_v3, %v1319_v32  ;;  %v1890_v44 = vmul.f32 %v8163_v54, %v10193_v31  ;;  %v8356_v17 = vstv %s8280_s21  ;;  %6306 = vmatpush3.bf16.msra.mxu1 %v10207_v12  ;;  %v1874_v14 = vadd.f32 %v8250_v10, %v1864_v40  ;;  %v10209_v10 = vld [vmem:[#allocation80_spill] sm:$0xff]  ;;  %v10226_v38 = vld [vmem:[#allocation41_spill] sm:$0xff]  ;;  %s5102_s21 = sld [smem:[#allocation8 + $0x2]] }
 0x1a6   :  { %6354 = vmatpush3.bf16.msra.mxu0 %v10207_v12  ;;  %v1632_v39 = vadd.f32 %v8098_v11, %v7913_v45  ;;  %v1638_v43 = vmul.f32 %v7620_v18, %v7919_v36  ;;  %v8366_v22 = vstv %s8284_s22  ;;  %5781 = vmatprep.mubr.msk.f32.mxu1 %vm452_vm0, %v1336_v26  ;;  %v1900_v3 = vmul.f32 %v8183_v16, %v10200_v58  ;;  %v10216_v28 = vld [vmem:[#allocation88_spill] sm:$0xff]  ;;  %v10225_v12 = vld [vmem:[#allocation37_spill] sm:$0xff]  ;;  %10325 = sst [smem:[#allocation30_spill]] %s9009_s18 }
 0x1a7   :  { %5847 = vmatprep.mubr.msk.f32.mxu0 %vm452_vm0, %v1911_v49  ;;  %v8372_v31 = vadd.f32 %v1335_v53, %v1329_v56  ;;  %v1648_v45 = vmul.f32 %v10210_v33, %v10209_v10  ;;  %v8379_v11 = vstv %s8293_s20  ;;  %6308 = vmatprep.subr.bf16.mxu1 %v10211_v0  ;;  %v1884_v26 = vadd.f32 %v1880_v25, %v1874_v14  ;;  %v10212_v49 = vld [vmem:[#allocation86_spill] sm:$0xff]  ;;  %v10220_v40 = vld [vmem:[#allocation60_spill] sm:$0xff]  ;;  %v10221_v25 = vld [vmem:[#allocation91_spill] sm:$0xff]  ;;  %s9021_s22 = sld [smem:[#allocation10 + $0x1e]]  ;;  %s9023_s20 = sld [smem:[#allocation10 + $0x1f]] }
 0x1a8   :  { %6356 = vmatprep.subr.bf16.mxu0 %v10211_v0  ;;  %v1642_v41 = vadd.f32 %v1638_v43, %v1632_v39  ;;  %v1658_v30 = vmul.f32 %v10213_v61, %v10212_v49  ;;  %v8388_v55 = vstv %s8306_s5  ;;  %v1910_v58 = vmul.f32 %v8282_v20, %v10204_v42  ;;  %v10218_v42 = vld [vmem:[#allocation87_spill] sm:$0xff]  ;;  %v10227_v16 = vld [vmem:[#allocation61_spill] sm:$0xff]  ;;  %s9025_s5 = sld [smem:[#allocation10 + $0x20]] }
 0x1a9   :  { %v1649_v62 = vmul.f32 %v10214_v48, %v10210_v33  ;;  %v8396_v59 = vmul.f32 %v10215_v21, %v10213_v61  ;;  %v1668_v5 = vmul.f32 %v10217_v50, %v10216_v28  ;;  %6310 = vmatpush3.bf16.msra.mxu1 %v10211_v0  ;;  %v1894_v7 = vadd.f32 %v1890_v44, %v1884_v26  ;;  %v10222_v14 = vld [vmem:[#allocation47_spill] sm:$0xff]  ;;  %10328 = sst [smem:[#allocation94_spill]] %s9015_s9 }
 0x1aa   :  { %6358 = vmatpush3.bf16.msra.mxu0 %v10211_v0  ;;  %v1652_v2 = vadd.f32 %v1648_v45, %v1642_v41  ;;  %v8406_v32 = vmul.f32 %v10218_v42, %v10217_v50  ;;  %v8409_v53 = vstv %s8324_s6  ;;  %6312 = vmatprep.subr.bf16.mxu1 %v10220_v40  ;;  %v1678_v56 = vmul.f32 %v8304_v52, %v10221_v25  ;;  %v10224_v0 = vld [vmem:[#allocation67_spill] sm:$0xff]  ;;  %10329 = sst [smem:[#allocation95_spill]] %s9017_s10  ;;  %s9027_s6 = sld [smem:[#allocation10 + $0x39]] }
 0x1ab   :  { %10219 = vst [vmem:[#allocation48_spill] sm:$0xff] %v8409_v53  ;;  %6360 = vmatprep.subr.bf16.mxu0 %v10220_v40  ;;  %v8419_v39 = vmul.f32 %v10222_v14, %v8304_v52  ;;  %v1688_v44 = vmul.f32 %v8313_v57, %v8161_v13  ;;  %v8424_v43 = vstv %s8335_s2  ;;  %v1904_v45 = vadd.f32 %v1900_v3, %v1894_v7  ;;  %s9029_s2 = sld [smem:[#allocation10 + $0x3a]] }
 0x1ac   :  { %10223 = vst [vmem:[#allocation49_spill] sm:$0xff] %v8424_v43  ;;  %v1662_v26 = vadd.f32 %v1658_v30, %v1652_v2  ;;  %v8430_v41 = vmul.f32 %v8159_v47, %v8313_v57  ;;  %v2203_v23 = vmul.f32 %v10225_v12, %v10224_v0  ;;  %v1698_v53 = vmul.f32 %v8322_v9, %v8254_v27 }
 0x1ad   :  { %v8440_v43 = vmul.f32 %v8241_v63, %v8322_v9  ;;  %v2213_v3 = vmul.f32 %v10226_v38, %v7919_v36  ;;  %v2223_v30 = vmul.f32 %v8333_v15, %v10209_v10  ;;  %6314 = vmatpush3.bf16.msra.mxu1 %v10220_v40  ;;  %v1914_v7 = vadd.f32 %v1910_v58, %v1904_v45  ;;  %10331 = sst [smem:[#allocation97_spill]] %s9021_s22 }
 0x1ae   :  { %6362 = vmatpush3.bf16.msra.mxu0 %v10220_v40  ;;  %v1672_v2 = vadd.f32 %v1668_v5, %v1662_v26  ;;  %v2207_v0 = vadd.f32 %v2203_v23, %v2197_v37  ;;  %v8451_v20 = vstv %s8368_s4  ;;  %6316 = vmatprep.subr.bf16.mxu1 %v10227_v16  ;;  %v2224_v10 = vmul.f32 %v10214_v48, %v8333_v15  ;;  %10332 = sst [smem:[#allocation98_spill]] %s9023_s20  ;;  %s9031_s4 = sld [smem:[#allocation10 + $0x3b]] }
 0x1af   :  { %6364 = vmatprep.subr.bf16.mxu0 %v10227_v16  ;;  %v2233_v36 = vmul.f32 %v8346_v4, %v10212_v49  ;;  %v2234_v58 = vmul.f32 %v10215_v21, %v8346_v4  ;;  %v8464_v5 = vstv %s8381_s26  ;;  %v2243_v45 = vmul.f32 %v8356_v17, %v10216_v28  ;;  %10333 = sst [smem:[#allocation99_spill]] %s9025_s5  ;;  %s9033_s26 = sld [smem:[#allocation10 + $0x7]] }
 0x1b0   :  { %10228 = vst [vmem:[#allocation52_spill] sm:$0xff] %v8464_v5  ;;  %v1682_v23 = vadd.f32 %v1678_v56, %v1672_v2  ;;  %v2217_v37 = vadd.f32 %v2213_v3, %v2207_v0  ;;  %v2244_v26 = vmul.f32 %v10218_v42, %v8356_v17  ;;  %5782 = vmatmul.mubr.msk.f32.vlgmr.msra.gmra.mrb[16].mxu1 %vm452_vm0, %v8276_v51  ;;  %v8483_v3 = vstv %s8400_s27  ;;  %v10234_v42 = vld [vmem:[#allocation31_spill] sm:$0xff]  ;;  %10334 = sst [smem:[#allocation100_spill]] %s9027_s6  ;;  %s9035_s27 = sld [smem:[#allocation10 + $0xa]] }
 0x1b1   :  { %5848 = vmatmul.mubr.msk.f32.vlgmr.msra.gmra.mrb[20].mxu0 %vm452_vm0, %v8278_v35  ;;  %v2253_v40 = vmul.f32 %v8366_v22, %v10221_v25  ;;  %v2254_v56 = vmul.f32 %v10222_v14, %v8366_v22  ;;  %v2263_v0 = vmul.f32 %v8379_v11, %v8161_v13  ;;  %10229 = vst [vmem:[#allocation53_spill] sm:$0xff] %v8483_v3  ;;  %v8491_v5 = vstv %s8411_s23  ;;  %v10231_v13 = vld [vmem:[#allocation75_spill] sm:$0xff]  ;;  %v10232_v14 = vld [vmem:[#allocation77_spill] sm:$0xff]  ;;  %v10233_v25 = vld [vmem:[#allocation70_spill] sm:$0xff]  ;;  %s10318_s23 = sld [smem:[#allocation146_spill]]  ;;  %10335 = sst [smem:[#allocation101_spill]] %s9029_s2 }
 0x1b2   :  { %5784 = vmatprep.mubr.msk.f32.mxu1 %vm452_vm0, %v8319_v34  ;;  %6318 = vmatpush3.bf16.msra.mxu1 %v10227_v16  ;;  %v1692_v51 = vadd.f32 %v1688_v44, %v1682_v23  ;;  %v2227_v35 = vadd.f32 %v2223_v30, %v2217_v37  ;;  %v2264_v2 = vmul.f32 %v8159_v47, %v8379_v11  ;;  %v8501_v23 = vstv %s8426_s28  ;;  %v10236_v30 = vld [vmem:[#allocation62_spill] sm:$0xff]  ;;  %s9037_s28 = sld [smem:[#allocation10 + $0xd]] }
 0x1b3   :  { %10230 = vst [vmem:[#allocation54_spill] sm:$0xff] %v8491_v5  ;;  %5850 = vmatprep.mubr.msk.f32.mxu0 %vm452_vm0, %v8350_v29  ;;  %6366 = vmatpush3.bf16.msra.mxu0 %v10227_v16  ;;  %v1653_v3 = vadd.f32 %v1649_v62, %v10231_v13  ;;  %v2228_v34 = vadd.f32 %v2224_v10, %v10232_v14  ;;  %10235 = vst [vmem:[#allocation55_spill] sm:$0xff] %v8501_v23  ;;  %v10237_v16 = vld [vmem:[#allocation71_spill] sm:$0xff]  ;;  %v10238_v5 = vld [vmem:[#allocation36_spill] sm:$0xff]  ;;  %v8510_v62 = vstv %s8434_s29  ;;  %s9039_s29 = sld [smem:[#allocation10 + $0x10]] }
 0x1b4   :  { %v1624_v44 = vmul.f32 %v10234_v42, %v10233_v25  ;;  %6320 = vmatprep.subr.bf16.mxu1 %v10236_v30  ;;  %6368 = vmatprep.subr.bf16.mxu0 %v10236_v30  ;;  %v1702_v37 = vadd.f32 %v1698_v53, %v1692_v51  ;;  %v2237_v29 = vadd.f32 %v2233_v36, %v2227_v35  ;;  %v10239_v23 = vld [vmem:[#allocation82_spill] sm:$0xff]  ;;  %v8519_v53 = vstv %s8446_s7  ;;  %10336 = sst [smem:[#allocation102_spill]] %s9031_s4  ;;  %s9041_s7 = sld [smem:[#allocation10 + $0x13]] }
 0x1b5   :  { %v1630_v13 = vmul.f32 %v10238_v5, %v10237_v16  ;;  %5785 = vmatmul.mubr.msk.f32.gmra.mrb[18].mxu1 %vm452_vm0, %v8372_v31  ;;  %5851 = vmatmul.mubr.msk.f32.gmra.mrb[22].mxu0 %vm452_vm0, %v1914_v7  ;;  %v1663_v10 = vadd.f32 %v8396_v59, %v1653_v3  ;;  %v2238_v14 = vadd.f32 %v2234_v58, %v2228_v34  ;;  %v10241_v31 = vld [vmem:[#allocation84_spill] sm:$0xff]  ;;  %v8528_v35 = vstv %s8453_s30  ;;  %10337 = sst [smem:[#allocation103_spill]] %s9033_s26  ;;  %s9043_s30 = sld [smem:[#allocation10 + $0x16]] }
 0x1b6   :  { %v1640_v47 = vmul.f32 %v7620_v18, %v10239_v23  ;;  %10240 = vst [vmem:[#allocation57_spill] sm:$0xff] %v8519_v53  ;;  %6322 = vmatpush3.bf16.msra.mxu1 %v10236_v30  ;;  %5803 = vmatprep.mubr.msk.f32.mxu1 %vm452_vm0, %v1702_v37  ;;  %v2247_v36 = vadd.f32 %v2243_v45, %v2237_v29  ;;  %10242 = vst [vmem:[#allocation58_spill] sm:$0xff] %v8528_v35  ;;  %v10243_v58 = vld [vmem:[#allocation72_spill] sm:$0xff]  ;;  %v8538_v37 = vstv %s8466_s24  ;;  %10338 = sst [smem:[#allocation104_spill]] %s9035_s27  ;;  %s9045_s24 = sld [smem:[#allocation10 + $0x19]] }
 0x1b7   :  { %v1634_v51 = vadd.f32 %v1630_v13, %v1624_v44  ;;  %v1650_v7 = vmul.f32 %v10210_v33, %v10241_v31  ;;  %6370 = vmatpush3.bf16.msra.mxu0 %v10236_v30  ;;  %v2273_v59 = vmul.f32 %v8388_v55, %v8254_v27  ;;  %6324 = vmatprep.subr.bf16.mxu1 %v10243_v58  ;;  %v10245_v13 = vld [vmem:[#allocation89_spill] sm:$0xff] }
 0x1b8   :  { %v1673_v3 = vadd.f32 %v8406_v32, %v1663_v10  ;;  %v2248_v34 = vadd.f32 %v2244_v26, %v2238_v14  ;;  %10244 = vst [vmem:[#allocation32_spill] sm:$0xff] %v8538_v37  ;;  %v2257_v45 = vadd.f32 %v2253_v40, %v2247_v36  ;;  %v2274_v44 = vmul.f32 %v8241_v63, %v8388_v55  ;;  %v10246_v32 = vld [vmem:[#allocation90_spill] sm:$0xff]  ;;  %10339 = sst [smem:[#allocation105_spill]] %s9037_s28  ;;  %s9140_s28 = sld [smem:[#allocation10 + $0x2f]] }
 0x1b9   :  { %6372 = vmatprep.subr.bf16.mxu0 %v10243_v58  ;;  %v1644_v29 = vadd.f32 %v1640_v47, %v1634_v51  ;;  %v1660_v30 = vmul.f32 %v10213_v61, %v10245_v13  ;;  %v1670_v26 = vmul.f32 %v10217_v50, %v10246_v32  ;;  %v1680_v10 = vmul.f32 %v8304_v52, %v8169_v24  ;;  %10340 = sst [smem:[#allocation106_spill]] %s9039_s29  ;;  %s9059_s29 = sld [smem:[#allocation10 + $0x34]] }
 0x1ba   :  { %v1683_v35 = vadd.f32 %v8419_v39, %v1673_v3  ;;  %v2258_v53 = vadd.f32 %v2254_v56, %v2248_v34  ;;  %v2267_v40 = vadd.f32 %v2263_v0, %v2257_v45  ;;  %6326 = vmatpush3.bf16.msra.mxu1 %v10243_v58  ;;  %v2199_v47 = vmul.f32 %v10208_v60, %v10233_v25  ;;  %v10247_v56 = vld [vmem:[#allocation73_spill] sm:$0xff]  ;;  %10341 = sst [smem:[#allocation107_spill]] %s9041_s7 }
 0x1bb   :  { %v1654_v14 = vadd.f32 %v1650_v7, %v1644_v29  ;;  %v2205_v39 = vmul.f32 %v10225_v12, %v10237_v16  ;;  %6374 = vmatpush3.bf16.msra.mxu0 %v10243_v58  ;;  %6328 = vmatprep.subr.bf16.mxu1 %v10247_v56  ;;  %v2215_v0 = vmul.f32 %v10226_v38, %v10239_v23  ;;  %v8567_v7 = vstv %s8503_s0  ;;  %10342 = sst [smem:[#allocation108_spill]] %s9043_s30  ;;  %s9047_s0 = sld [smem:[#allocation10 + $0x22]] }
 0x1bc   :  { %v1693_v36 = vadd.f32 %v8430_v41, %v1683_v35  ;;  %v2268_v51 = vadd.f32 %v2264_v2, %v2258_v53  ;;  %10248 = vst [vmem:[#allocation63_spill] sm:$0xff] %v8567_v7  ;;  %v2277_v3 = vadd.f32 %v2273_v59, %v2267_v40  ;;  %6376 = vmatprep.subr.bf16.mxu0 %v10247_v56  ;;  %v8576_v2 = vstv %s8521_s12  ;;  %10343 = sst [smem:[#allocation109_spill]] %s9045_s24  ;;  %s9049_s12 = sld [smem:[#allocation10 + $0x25]] }
 0x1bd   :  { %v1664_v34 = vadd.f32 %v1660_v30, %v1654_v14  ;;  %v2209_v45 = vadd.f32 %v2205_v39, %v2199_v47  ;;  %v2225_v29 = vmul.f32 %v8333_v15, %v10241_v31  ;;  %v1690_v41 = vmul.f32 %v8313_v57, %v8185_v8  ;;  %10249 = vst [vmem:[#allocation86_spill] sm:$0xff] %v8576_v2  ;;  %v10252_v14 = vld [vmem:[#allocation68_spill] sm:$0xff]  ;;  %s9061_s7 = sld [smem:[#allocation10 + $0x6]]  ;;  %s9063_s30 = sld [smem:[#allocation10 + $0x9]] }
 0x1be   :  { %v1703_v58 = vadd.f32 %v8440_v43, %v1693_v36  ;;  %v2278_v37 = vadd.f32 %v2274_v44, %v2268_v51  ;;  %5869 = vmatprep.mubr.msk.f32.mxu0 %vm452_vm0, %v2277_v3  ;;  %6330 = vmatpush3.bf16.msra.mxu1 %v10247_v56  ;;  %v2235_v30 = vmul.f32 %v8346_v4, %v10245_v13  ;;  %v8583_v59 = vstv %s8530_s13  ;;  %v10251_v43 = vld [vmem:[#allocation19_spill] sm:$0xff]  ;;  %v10254_v51 = vld [vmem:[#allocation69_spill] sm:$0xff]  ;;  %s9051_s13 = sld [smem:[#allocation10 + $0x28]]  ;;  %10382 = sst [smem:[#allocation138_spill]] %s9140_s28 }
 0x1bf   :  { %v1674_v53 = vadd.f32 %v1670_v26, %v1664_v34  ;;  %v2219_v35 = vadd.f32 %v2215_v0, %v2209_v45  ;;  %10250 = vst [vmem:[#allocation64_spill] sm:$0xff] %v8583_v59  ;;  %6378 = vmatpush3.bf16.msra.mxu0 %v10247_v56  ;;  %6380 = vmatprep.subr.bf16.mxu1 %v10251_v43  ;;  %v8594_v47 = vstv %s8540_s25  ;;  %v10255_v3 = vld [vmem:[#allocation81_spill] sm:$0xff]  ;;  %s9053_s25 = sld [smem:[#allocation10 + $0x2b]]  ;;  %10350 = sst [smem:[#allocation116_spill]] %s9059_s29 }
 0x1c0   :  { %v1700_v44 = vmul.f32 %v8322_v9, %v8286_v46  ;;  %v2245_v40 = vmul.f32 %v8356_v17, %v10246_v32  ;;  %v1625_v26 = vmul.f32 %v10252_v14, %v10234_v42  ;;  %10253 = vst [vmem:[#allocation76_spill] sm:$0xff] %v8594_v47  ;;  %v1631_v0 = vmul.f32 %v10254_v51, %v10238_v5  ;;  %s9075_s29 = sld [smem:[#allocation10 + $0x21]] }
 0x1c1   :  { %v1684_v39 = vadd.f32 %v1680_v10, %v1674_v53  ;;  %v2229_v36 = vadd.f32 %v2225_v29, %v2219_v35  ;;  %v1641_v34 = vmul.f32 %v10255_v3, %v7620_v18  ;;  %5804 = vmatmul.mubr.msk.f32.vlgmr.msra.gmra.mrb[16].mxu1 %vm452_vm0, %v1703_v58  ;;  %v2255_v45 = vmul.f32 %v8366_v22, %v8169_v24  ;;  %10344 = sst [smem:[#allocation110_spill]] %s9047_s0  ;;  %s9065_s0 = sld [smem:[#allocation10 + $0xc]] }
 0x1c2   :  { %v2265_v56 = vmul.f32 %v8379_v11, %v8185_v8  ;;  %v1651_v42 = vmul.f32 %v7962_v6, %v10210_v33  ;;  %v8608_v47 = vstv %s8552_s14  ;;  %5870 = vmatmul.mubr.msk.f32.vlgmr.msra.gmra.mrb[20].mxu0 %vm452_vm0, %v2278_v37  ;;  %6382 = vmatpush3.bf16.msra.mxu1 %v10251_v43  ;;  %v1635_v18 = vadd.f32 %v1631_v0, %v1625_v26  ;;  %v10258_v37 = vld [vmem:[#allocation20_spill] sm:$0xff]  ;;  %10345 = sst [smem:[#allocation111_spill]] %s9049_s12  ;;  %s9055_s14 = sld [smem:[#allocation10 + $0x2e]] }
 0x1c3   :  { %10256 = vst [vmem:[#allocation85_spill] sm:$0xff] %v8608_v47  ;;  %v1694_v10 = vadd.f32 %v1690_v41, %v1684_v39  ;;  %v2239_v5 = vadd.f32 %v2235_v30, %v2229_v36  ;;  %v8613_v29 = vstv %s8559_s1  ;;  %v2275_v58 = vmul.f32 %v8388_v55, %v8286_v46  ;;  %6384 = vmatprep.subr.bf16.mxu1 %v10258_v37  ;;  %s8997_s1 = sld [smem:[#allocation10]]  ;;  %10352 = sst [smem:[#allocation118_spill]] %s9063_s30 }
 0x1c4   :  { %10257 = vst [vmem:[#allocation65_spill] sm:$0xff] %v8613_v29  ;;  %v1661_v53 = vmul.f32 %v8047_v1, %v10213_v61  ;;  %v2200_v33 = vmul.f32 %v10252_v14, %v10208_v60  ;;  %v2206_v35 = vmul.f32 %v10254_v51, %v10225_v12  ;;  %v1645_v43 = vadd.f32 %v1641_v34, %v1635_v18  ;;  %v10260_v34 = vld [vmem:[#allocation51_spill] sm:$0xff]  ;;  %v10269_v29 = vld [vmem:[#allocation48_spill] sm:$0xff]  ;;  %10346 = sst [smem:[#allocation112_spill]] %s9051_s13  ;;  %s9067_s12 = sld [smem:[#allocation10 + $0xf]] }
 0x1c5   :  { %v1704_v41 = vadd.f32 %v1700_v44, %v1694_v10  ;;  %v2249_v30 = vadd.f32 %v2245_v40, %v2239_v5  ;;  %v2216_v26 = vmul.f32 %v10255_v3, %v10226_v38  ;;  %v1671_v39 = vmul.f32 %v8067_v19, %v10217_v50  ;;  %v10259_v44 = vld [vmem:[#allocation50_spill] sm:$0xff]  ;;  %10347 = sst [smem:[#allocation113_spill]] %s9053_s25  ;;  %s9069_s25 = sld [smem:[#allocation10 + $0x12]] }
 0x1c6   :  { %v1681_v61 = vmul.f32 %v8163_v54, %v8304_v52  ;;  %v2210_v36 = vadd.f32 %v2206_v35, %v2200_v33  ;;  %v2226_v60 = vmul.f32 %v7962_v6, %v8333_v15  ;;  %v1655_v0 = vadd.f32 %v1651_v42, %v1645_v43  ;;  %6386 = vmatpush3.bf16.msra.mxu1 %v10258_v37  ;;  %v10261_v52 = vld [vmem:[#allocation66_spill] sm:$0xff]  ;;  %v10263_v15 = vld [vmem:[#allocation67_spill] sm:$0xff]  ;;  %v10267_v43 = vld [vmem:[#allocation21_spill] sm:$0xff]  ;;  %10351 = sst [smem:[#allocation117_spill]] %s9061_s7  ;;  %s9077_s7 = sld [smem:[#allocation10 + $0x24]] }
 0x1c7   :  { %5806 = vmatprep.mubr.msk.f32.mxu1 %vm452_vm0, %v1704_v41  ;;  %v2259_v12 = vadd.f32 %v2255_v45, %v2249_v30  ;;  %v1691_v40 = vmul.f32 %v10259_v44, %v8313_v57  ;;  %v1701_v38 = vmul.f32 %v10260_v34, %v8322_v9  ;;  %v2236_v50 = vmul.f32 %v8047_v1, %v8346_v4  ;;  %v10262_v5 = vld [vmem:[#allocation34_spill] sm:$0xff]  ;;  %v10264_v33 = vld [vmem:[#allocation39_spill] sm:$0xff]  ;;  %10353 = sst [smem:[#allocation119_spill]] %s9065_s0  ;;  %s9073_s13 = sld [smem:[#allocation10 + $0x18]] }
 0x1c8   :  { %v2220_v10 = vadd.f32 %v2216_v26, %v2210_v36  ;;  %v2492_v18 = vmul.f32 %v10262_v5, %v10261_v52  ;;  %v2498_v35 = vmul.f32 %v10264_v33, %v10263_v15  ;;  %v1665_v42 = vadd.f32 %v1661_v53, %v1655_v0  ;;  %v10265_v41 = vld [vmem:[#allocation74_spill] sm:$0xff]  ;;  %v10266_v30 = vld [vmem:[#allocation43_spill] sm:$0xff]  ;;  %6388 = vmatprep.subr.bf16.mxu1 %v10267_v43  ;;  %v10268_v36 = vld [vmem:[#allocation80_spill] sm:$0xff]  ;;  %10348 = sst [smem:[#allocation114_spill]] %s9055_s14  ;;  %s9079_s30 = sld [smem:[#allocation10 + $0x27]] }
 0x1c9   :  { %v2269_v45 = vadd.f32 %v2265_v56, %v2259_v12  ;;  %v2246_v57 = vmul.f32 %v8067_v19, %v8356_v17  ;;  %v2508_v9 = vmul.f32 %v10266_v30, %v10265_v41  ;;  %v2256_v4 = vmul.f32 %v8163_v54, %v8366_v22  ;;  %v10270_v0 = vld [vmem:[#allocation49_spill] sm:$0xff]  ;;  %10319 = sst [smem:[#allocation24_spill]] %s8997_s1  ;;  %s9071_s14 = sld [smem:[#allocation10 + $0x15]] }
 0x1ca   :  { %v2230_v26 = vadd.f32 %v2226_v60, %v2220_v10  ;;  %v2502_v37 = vadd.f32 %v2498_v35, %v2492_v18  ;;  %v2518_v47 = vmul.f32 %v10269_v29, %v10268_v36  ;;  %v1675_v2 = vadd.f32 %v1671_v39, %v1665_v42  ;;  %6390 = vmatpush3.bf16.msra.mxu1 %v10267_v43  ;;  %v10271_v10 = vld [vmem:[#allocation87_spill] sm:$0xff]  ;;  %10354 = sst [smem:[#allocation120_spill]] %s9067_s12  ;;  %s9081_s0 = sld [smem:[#allocation10 + $0x2a]] }
 0x1cb   :  { %v2279_v59 = vadd.f32 %v2275_v58, %v2269_v45  ;;  %v2266_v56 = vmul.f32 %v10259_v44, %v8379_v11  ;;  %v2519_v17 = vmul.f32 %v10214_v48, %v10269_v29  ;;  %v2276_v12 = vmul.f32 %v10260_v34, %v8388_v55  ;;  %v10272_v35 = vld [vmem:[#allocation91_spill] sm:$0xff]  ;;  %v10273_v45 = vld [vmem:[#allocation52_spill] sm:$0xff]  ;;  %10355 = sst [smem:[#allocation121_spill]] %s9069_s25  ;;  %s9083_s12 = sld [smem:[#allocation10 + $0x2d]] }
 0x1cc   :  { %v2240_v53 = vadd.f32 %v2236_v50, %v2230_v26  ;;  %v2512_v60 = vadd.f32 %v2508_v9, %v2502_v37  ;;  %v2528_v22 = vmul.f32 %v10270_v0, %v10212_v49  ;;  %v1685_v58 = vadd.f32 %v1681_v61, %v1675_v2  ;;  %v10274_v9 = vld [vmem:[#allocation47_spill] sm:$0xff]  ;;  %v10275_v26 = vld [vmem:[#allocation22_spill] sm:$0xff]  ;;  %10358 = sst [smem:[#allocation124_spill]] %s9075_s29  ;;  %s9090_s29 = sld [smem:[#allocation10 + $0x8]] }
 0x1cd   :  { %5872 = vmatprep.mubr.msk.f32.mxu0 %vm452_vm0, %v2279_v59  ;;  %v2529_v39 = vmul.f32 %v10215_v21, %v10270_v0  ;;  %v2538_v11 = vmul.f32 %v8451_v20, %v10216_v28  ;;  %v2539_v50 = vmul.f32 %v10271_v10, %v8451_v20  ;;  %v2548_v42 = vmul.f32 %v10273_v45, %v10272_v35  ;;  %v10276_v59 = vld [vmem:[#allocation79_spill] sm:$0xff]  ;;  %10357 = sst [smem:[#allocation123_spill]] %s9073_s13  ;;  %s9088_s13 = sld [smem:[#allocation10 + $0x33]] }
 0x1ce   :  { %v2250_v18 = vadd.f32 %v2246_v57, %v2240_v53  ;;  %v2522_v55 = vadd.f32 %v2518_v47, %v2512_v60  ;;  %v2549_v43 = vmul.f32 %v10274_v9, %v10273_v45  ;;  %6392 = vmatprep.subr.bf16.mxu1 %v10275_v26  ;;  %v1695_v2 = vadd.f32 %v1691_v40, %v1685_v58  ;;  %v10277_v47 = vld [vmem:[#allocation46_spill] sm:$0xff]  ;;  %v10278_v53 = vld [vmem:[#allocation53_spill] sm:$0xff]  ;;  %s10440_s28 = sld [smem:[#allocation119_spill]] }
 0x1cf   :  { %v2523_v61 = vadd.f32 %v2519_v17, %v10276_v59  ;;  %v2494_v37 = vmul.f32 %v10262_v5, %v10233_v25  ;;  %v2500_v7 = vmul.f32 %v10264_v33, %v10237_v16  ;;  %v2558_v60 = vmul.f32 %v10278_v53, %v10277_v47  ;;  %6394 = vmatpush3.bf16.msra.mxu1 %v10275_v26  ;;  %v10279_v58 = vld [vmem:[#allocation23_spill] sm:$0xff]  ;;  %10356 = sst [smem:[#allocation122_spill]] %s9071_s14  ;;  %s9511_s14 = sld [smem:[#allocation10 + $0x49]] }
 0x1d0   :  { %v2260_v10 = vadd.f32 %v2256_v4, %v2250_v18  ;;  %v2532_v57 = vadd.f32 %v2528_v22, %v2522_v55  ;;  %v2510_v9 = vmul.f32 %v10266_v30, %v10239_v23  ;;  %v1705_v35 = vadd.f32 %v1701_v38, %v1695_v2  ;;  %6396 = vmatprep.subr.bf16.mxu1 %v10279_v58  ;;  %v10280_v4 = vld [vmem:[#allocation45_spill] sm:$0xff]  ;;  %v10281_v18 = vld [vmem:[#allocation54_spill] sm:$0xff]  ;;  %10359 = sst [smem:[#allocation125_spill]] %s9081_s0  ;;  %s9096_s0 = sld [smem:[#allocation10 + $0xb]] }
 0x1d1   :  { %v2533_v40 = vadd.f32 %v2529_v39, %v2523_v61  ;;  %v2504_v17 = vadd.f32 %v2500_v7, %v2494_v37  ;;  %v2520_v59 = vmul.f32 %v10269_v29, %v10241_v31  ;;  %v2559_v22 = vmul.f32 %v10280_v4, %v10278_v53  ;;  %10360 = sst [smem:[#allocation126_spill]] %s9083_s12  ;;  %s9098_s12 = sld [smem:[#allocation10 + $0xe]] }
 0x1d2   :  { %v2270_v25 = vadd.f32 %v2266_v56, %v2260_v10  ;;  %v2542_v16 = vadd.f32 %v2538_v11, %v2532_v57  ;;  %v2568_v55 = vmul.f32 %v10281_v18, %v8254_v27  ;;  %5807 = vmatmul.mubr.msk.f32.gmra.mrb[18].mxu1 %vm452_vm0, %v1705_v35  ;;  %v2569_v38 = vmul.f32 %v8241_v63, %v10281_v18 }
 0x1d3   :  { %v2543_v39 = vadd.f32 %v2539_v50, %v2533_v40  ;;  %v2514_v26 = vadd.f32 %v2510_v9, %v2504_v17  ;;  %v2530_v7 = vmul.f32 %v10270_v0, %v10245_v13  ;;  %v2495_v56 = vmul.f32 %v10252_v14, %v10262_v5  ;;  %v10282_v40 = vld [vmem:[#allocation33_spill] sm:$0xff]  ;;  %10362 = sst [smem:[#allocation128_spill]] %s9088_s13 }
 0x1d4   :  { %v2280_v2 = vadd.f32 %v2276_v12, %v2270_v25  ;;  %v2552_v61 = vadd.f32 %v2548_v42, %v2542_v16  ;;  %v2501_v11 = vmul.f32 %v10254_v51, %v10264_v33  ;;  %v2540_v35 = vmul.f32 %v8451_v20, %v10246_v32 }
 0x1d5   :  { %v2553_v10 = vadd.f32 %v2549_v43, %v2543_v39  ;;  %v2524_v37 = vadd.f32 %v2520_v59, %v2514_v26  ;;  %v2511_v50 = vmul.f32 %v10255_v3, %v10266_v30  ;;  %v2550_v16 = vmul.f32 %v10273_v45, %v8169_v24  ;;  %v10284_v26 = vld [vmem:[#allocation42_spill] sm:$0xff] }
 0x1d6   :  { %5873 = vmatmul.mubr.msk.f32.gmra.mrb[22].mxu0 %vm452_vm0, %v2280_v2  ;;  %v2562_v9 = vadd.f32 %v2558_v60, %v2552_v61  ;;  %v2505_v25 = vadd.f32 %v2501_v11, %v2495_v56  ;;  %v2521_v5 = vmul.f32 %v7962_v6, %v10269_v29  ;;  %v2560_v42 = vmul.f32 %v10278_v53, %v8185_v8  ;;  %v10283_v29 = vld [vmem:[#allocation38_spill] sm:$0xff]  ;;  %v10285_v61 = vld [vmem:[#allocation55_spill] sm:$0xff] }
 0x1d7   :  { %v2563_v12 = vadd.f32 %v2559_v22, %v2553_v10  ;;  %v2534_v33 = vadd.f32 %v2530_v7, %v2524_v37  ;;  %v2570_v43 = vmul.f32 %v10281_v18, %v8286_v46  ;;  %v2531_v60 = vmul.f32 %v8047_v1, %v10270_v0  ;;  %10363 = sst [smem:[#allocation129_spill]] %s9098_s12  ;;  %s9497_s12 = sld [smem:[#allocation10 + $0x35]] }
 0x1d8   :  { %v2572_v57 = vadd.f32 %v2568_v55, %v2562_v9  ;;  %v2515_v30 = vadd.f32 %v2511_v50, %v2505_v25  ;;  %v2406_v17 = vmul.f32 %v10282_v40, %v10261_v52  ;;  %v2412_v22 = vmul.f32 %v10283_v29, %v10263_v15  ;;  %v10287_v25 = vld [vmem:[#allocation57_spill] sm:$0xff] }
 0x1d9   :  { %v2573_v59 = vadd.f32 %v2569_v38, %v2563_v12  ;;  %v2544_v39 = vadd.f32 %v2540_v35, %v2534_v33  ;;  %v2422_v7 = vmul.f32 %v10284_v26, %v10265_v41  ;;  %v2541_v2 = vmul.f32 %v8067_v19, %v8451_v20  ;;  %v10288_v12 = vld [vmem:[#allocation87_spill] sm:$0xff] }
 0x1da   :  { %5891 = vmatprep.mubr.msk.f32.mxu1 %vm452_vm0, %v2572_v57  ;;  %v2525_v55 = vadd.f32 %v2521_v5, %v2515_v30  ;;  %v2551_v0 = vmul.f32 %v8163_v54, %v10273_v45  ;;  %v2433_v38 = vmul.f32 %v10214_v48, %v10285_v61  ;;  %v2561_v11 = vmul.f32 %v10259_v44, %v10278_v53  ;;  %v10289_v57 = vld [vmem:[#allocation91_spill] sm:$0xff]  ;;  %v10290_v30 = vld [vmem:[#allocation58_spill] sm:$0xff] }
 0x1db   :  { %5892 = vmatmul.mubr.msk.f32.vlgmr.msra.gmra.mrb[20].mxu1 %vm452_vm0, %v2573_v59  ;;  %v2554_v56 = vadd.f32 %v2550_v16, %v2544_v39  ;;  %v2416_v10 = vadd.f32 %v2412_v22, %v2406_v17  ;;  %v2432_v37 = vmul.f32 %v10285_v61, %v10268_v36  ;;  %v2571_v20 = vmul.f32 %v10260_v34, %v10281_v18  ;;  %v10286_v16 = vld [vmem:[#allocation56_spill] sm:$0xff]  ;;  %v10292_v59 = vld [vmem:[#allocation78_spill] sm:$0xff] }
 0x1dc   :  { %6398 = vmatpush3.bf16.msra.mxu1 %v10279_v58  ;;  %v2535_v35 = vadd.f32 %v2531_v60, %v2525_v55  ;;  %v2442_v45 = vmul.f32 %v8510_v62, %v10212_v49  ;;  %v2443_v50 = vmul.f32 %v10215_v21, %v8510_v62  ;;  %v2452_v5 = vmul.f32 %v10287_v25, %v10216_v28  ;;  %v10291_v60 = vld [vmem:[#allocation47_spill] sm:$0xff]  ;;  %v10293_v55 = vld [vmem:[#allocation70_spill] sm:$0xff] }
 0x1dd   :  { %v2564_v9 = vadd.f32 %v2560_v42, %v2554_v56  ;;  %6400 = vmatprep.subr.bf16.mxu1 %v10286_v16  ;;  %v2426_v53 = vadd.f32 %v2422_v7, %v2416_v10  ;;  %v2453_v58 = vmul.f32 %v10288_v12, %v10287_v25  ;;  %v2462_v18 = vmul.f32 %v10290_v30, %v10289_v57  ;;  %v10294_v56 = vld [vmem:[#allocation71_spill] sm:$0xff] }
 0x1de   :  { %v2545_v33 = vadd.f32 %v2541_v2, %v2535_v35  ;;  %v2463_v17 = vmul.f32 %v10291_v60, %v10290_v30  ;;  %v2437_v39 = vadd.f32 %v2433_v38, %v10292_v59  ;;  %v2408_v7 = vmul.f32 %v10282_v40, %v10293_v55  ;;  %v10295_v2 = vld [vmem:[#allocation32_spill] sm:$0xff]  ;;  %v10296_v38 = vld [vmem:[#allocation59_spill] sm:$0xff] }
 0x1df   :  { %v2574_v42 = vadd.f32 %v2570_v43, %v2564_v9  ;;  %v2436_v22 = vadd.f32 %v2432_v37, %v2426_v53  ;;  %v2414_v10 = vmul.f32 %v10283_v29, %v10294_v56  ;;  %v2472_v35 = vmul.f32 %v10295_v2, %v10277_v47 }
 0x1e0   :  { %v2555_v28 = vadd.f32 %v2551_v0, %v2545_v33  ;;  %6402 = vmatpush3.bf16.msra.mxu1 %v10286_v16  ;;  %v2447_v57 = vadd.f32 %v2443_v50, %v2437_v39  ;;  %v2424_v60 = vmul.f32 %v10284_v26, %v10239_v23  ;;  %v2434_v9 = vmul.f32 %v10285_v61, %v10241_v31  ;;  %v10298_v50 = vld [vmem:[#allocation63_spill] sm:$0xff] }
 0x1e1   :  { %5894 = vmatprep.mubr.msk.f32.mxu1 %vm452_vm0, %v2574_v42  ;;  %v2446_v43 = vadd.f32 %v2442_v45, %v2436_v22  ;;  %6404 = vmatprep.subr.bf16.mxu1 %v10296_v38  ;;  %v2418_v37 = vadd.f32 %v2414_v10, %v2408_v7  ;;  %v8766_v53 = vstv %s8721_s3  ;;  %v2473_v16 = vmul.f32 %v10280_v4, %v10295_v2  ;;  %s8999_s3 = sld [smem:[#allocation10 + $0x1]] }
 0x1e2   :  { %10297 = vst [vmem:[#allocation37_spill] sm:$0xff] %v8766_v53  ;;  %v2565_v0 = vadd.f32 %v2561_v11, %v2555_v28  ;;  %v2482_v33 = vmul.f32 %v10298_v50, %v8254_v27  ;;  %v2457_v59 = vadd.f32 %v2453_v58, %v2447_v57  ;;  %v2483_v45 = vmul.f32 %v8241_v63, %v10298_v50  ;;  %v10299_v58 = vld [vmem:[#allocation60_spill] sm:$0xff] }
 0x1e3   :  { %v2456_v39 = vadd.f32 %v2452_v5, %v2446_v43  ;;  %v2428_v42 = vadd.f32 %v2424_v60, %v2418_v37  ;;  %v2444_v22 = vmul.f32 %v8510_v62, %v10245_v13  ;;  %v2409_v28 = vmul.f32 %v10252_v14, %v10282_v40 }
 0x1e4   :  { %v2575_v7 = vadd.f32 %v2571_v20, %v2565_v0  ;;  %6406 = vmatpush3.bf16.msra.mxu1 %v10296_v38  ;;  %v2467_v10 = vadd.f32 %v2463_v17, %v2457_v59  ;;  %v2415_v11 = vmul.f32 %v10254_v51, %v10283_v29  ;;  %v2454_v57 = vmul.f32 %v10287_v25, %v10246_v32 }
 0x1e5   :  { %v2466_v53 = vadd.f32 %v2462_v18, %v2456_v39  ;;  %6408 = vmatprep.subr.bf16.mxu1 %v10299_v58  ;;  %v2438_v5 = vadd.f32 %v2434_v9, %v2428_v42  ;;  %v2425_v60 = vmul.f32 %v10255_v3, %v10284_v26  ;;  %v2464_v17 = vmul.f32 %v10290_v30, %v8169_v24 }
 0x1e6   :  { %5895 = vmatmul.mubr.msk.f32.gmra.mrb[22].mxu1 %vm452_vm0, %v2575_v7  ;;  %v2477_v20 = vadd.f32 %v2473_v16, %v2467_v10  ;;  %v2419_v40 = vadd.f32 %v2415_v11, %v2409_v28  ;;  %v2435_v29 = vmul.f32 %v7962_v6, %v10285_v61  ;;  %v2474_v38 = vmul.f32 %v10295_v2, %v8185_v8  ;;  %v10300_v16 = vld [vmem:[#allocation35_spill] sm:$0xff]  ;;  %v10301_v61 = vld [vmem:[#allocation61_spill] sm:$0xff]  ;;  %v10304_v28 = vld [vmem:[#allocation86_spill] sm:$0xff] }
 0x1e7   :  { %v2476_v18 = vadd.f32 %v2472_v35, %v2466_v53  ;;  %v2448_v43 = vadd.f32 %v2444_v22, %v2438_v5  ;;  %v2484_v37 = vmul.f32 %v10298_v50, %v8286_v46  ;;  %v2445_v0 = vmul.f32 %v8047_v1, %v8510_v62  ;;  %v10302_v53 = vld [vmem:[#allocation40_spill] sm:$0xff]  ;;  %10320 = sst [smem:[#allocation25_spill]] %s8999_s3 }
 0x1e8   :  { %6410 = vmatpush3.bf16.msra.mxu1 %v10299_v58  ;;  %v2487_v26 = vadd.f32 %v2483_v45, %v2477_v20  ;;  %v2429_v9 = vadd.f32 %v2425_v60, %v2419_v40  ;;  %v2772_v59 = vmul.f32 %v10300_v16, %v10261_v52  ;;  %v2778_v42 = vmul.f32 %v10302_v53, %v10263_v15  ;;  %v10303_v22 = vld [vmem:[#allocation44_spill] sm:$0xff] }
 0x1e9   :  { %v2486_v39 = vadd.f32 %v2482_v33, %v2476_v18  ;;  %6412 = vmatprep.subr.bf16.mxu1 %v10301_v61  ;;  %v2458_v35 = vadd.f32 %v2454_v57, %v2448_v43  ;;  %v2788_v7 = vmul.f32 %v10303_v22, %v10265_v41  ;;  %v2455_v45 = vmul.f32 %v8067_v19, %v10287_v25  ;;  %v10306_v60 = vld [vmem:[#allocation88_spill] sm:$0xff]  ;;  %v10310_v18 = vld [vmem:[#allocation85_spill] sm:$0xff] }
 0x1ea   :  { %v2439_v10 = vadd.f32 %v2435_v29, %v2429_v9  ;;  %v2465_v62 = vmul.f32 %v8163_v54, %v10290_v30  ;;  %v2799_v52 = vmul.f32 %v10214_v48, %v10304_v28  ;;  %v2475_v11 = vmul.f32 %v10259_v44, %v10295_v2  ;;  %v10305_v30 = vld [vmem:[#allocation64_spill] sm:$0xff]  ;;  %v10308_v29 = vld [vmem:[#allocation62_spill] sm:$0xff] }
 0x1eb   :  { %5913 = vmatprep.mubr.msk.f32.mxu1 %vm452_vm0, %v2486_v39  ;;  %v2468_v33 = vadd.f32 %v2464_v17, %v2458_v35  ;;  %v2782_v15 = vadd.f32 %v2778_v42, %v2772_v59  ;;  %v2798_v41 = vmul.f32 %v10304_v28, %v10268_v36  ;;  %v2485_v25 = vmul.f32 %v10260_v34, %v10298_v50  ;;  %v10307_v20 = vld [vmem:[#allocation76_spill] sm:$0xff]  ;;  %v10309_v50 = vld [vmem:[#allocation91_spill] sm:$0xff] }
 0x1ec   :  { %5914 = vmatmul.mubr.msk.f32.vlgmr.msra.gmra.mrb[20].mxu1 %vm452_vm0, %v2487_v26  ;;  %v2449_v58 = vadd.f32 %v2445_v0, %v2439_v10  ;;  %v2808_v5 = vmul.f32 %v10305_v30, %v10212_v49  ;;  %v2809_v48 = vmul.f32 %v10215_v21, %v10305_v30  ;;  %v2818_v17 = vmul.f32 %v10307_v20, %v10306_v60  ;;  %v10311_v49 = vld [vmem:[#allocation47_spill] sm:$0xff] }
 0x1ed   :  { %v2478_v57 = vadd.f32 %v2474_v38, %v2468_v33  ;;  %6414 = vmatpush3.bf16.msra.mxu1 %v10301_v61  ;;  %v2792_v2 = vadd.f32 %v2788_v7, %v2782_v15  ;;  %v2819_v36 = vmul.f32 %v10288_v12, %v10307_v20  ;;  %v2828_v43 = vmul.f32 %v10310_v18, %v10309_v50  ;;  %v10312_v21 = vld [vmem:[#allocation83_spill] sm:$0xff]  ;;  %v10313_v61 = vld [vmem:[#allocation65_spill] sm:$0xff] }
 0x1ee   :  { %v2459_v40 = vadd.f32 %v2455_v45, %v2449_v58  ;;  %6416 = vmatprep.subr.bf16.mxu1 %v10308_v29  ;;  %v2829_v26 = vmul.f32 %v10311_v49, %v10310_v18  ;;  %v2803_v38 = vadd.f32 %v2799_v52, %v10312_v21  ;;  %v2774_v59 = vmul.f32 %v10300_v16, %v10293_v55  ;;  %v10315_v52 = vld [vmem:[#allocation72_spill] sm:$0xff] }
 0x1ef   :  { %v2488_v9 = vadd.f32 %v2484_v37, %v2478_v57  ;;  %v2802_v0 = vadd.f32 %v2798_v41, %v2792_v2  ;;  %v2780_v39 = vmul.f32 %v10302_v53, %v10294_v56  ;;  %v2838_v35 = vmul.f32 %v10313_v61, %v10277_v47 }
 0x1f0   :  { %v2469_v12 = vadd.f32 %v2465_v62, %v2459_v40  ;;  %v2813_v42 = vadd.f32 %v2809_v48, %v2803_v38  ;;  %v2790_v7 = vmul.f32 %v10303_v22, %v10239_v23  ;;  %v2800_v55 = vmul.f32 %v10304_v28, %v10241_v31  ;;  %v10314_v62 = vld [vmem:[#allocation37_spill] sm:$0xff] }
 0x1f1   :  { %5916 = vmatprep.mubr.msk.f32.mxu1 %vm452_vm0, %v2488_v9  ;;  %6418 = vmatpush3.bf16.msra.mxu1 %v10308_v29  ;;  %v2812_v37 = vadd.f32 %v2808_v5, %v2802_v0  ;;  %v2784_v10 = vadd.f32 %v2780_v39, %v2774_v59  ;;  %v2839_v56 = vmul.f32 %v10280_v4, %v10313_v61 }
 0x1f2   :  { %v2479_v45 = vadd.f32 %v2475_v11, %v2469_v12  ;;  %v2848_v47 = vmul.f32 %v10314_v62, %v8254_v27  ;;  %6420 = vmatprep.subr.bf16.mxu1 %v10315_v52  ;;  %v2823_v33 = vadd.f32 %v2819_v36, %v2813_v42  ;;  %v2849_v15 = vmul.f32 %v8241_v63, %v10314_v62 }
 0x1f3   :  { %v2822_v23 = vadd.f32 %v2818_v17, %v2812_v37  ;;  %v2794_v41 = vadd.f32 %v2790_v7, %v2784_v10  ;;  %v2810_v58 = vmul.f32 %v10305_v30, %v10245_v13  ;;  %v2775_v11 = vmul.f32 %v10252_v14, %v10300_v16  ;;  %v10316_v13 = vld [vmem:[#allocation73_spill] sm:$0xff] }
 0x1f4   :  { %v2489_v5 = vadd.f32 %v2485_v25, %v2479_v45  ;;  %v2833_v31 = vadd.f32 %v2829_v26, %v2823_v33  ;;  %v2781_v4 = vmul.f32 %v10254_v51, %v10302_v53  ;;  %v2820_v57 = vmul.f32 %v10307_v20, %v10246_v32 }
 0x1f5   :  { %v2832_v27 = vadd.f32 %v2828_v43, %v2822_v23  ;;  %6422 = vmatpush3.bf16.msra.mxu1 %v10315_v52  ;;  %v2804_v48 = vadd.f32 %v2800_v55, %v2794_v41  ;;  %v2791_v63 = vmul.f32 %v10255_v3, %v10303_v22  ;;  %v2801_v14 = vmul.f32 %v7962_v6, %v10304_v28 }
 0x1f6   :  { %5917 = vmatmul.mubr.msk.f32.gmra.mrb[22].mxu1 %vm452_vm0, %v2489_v5  ;;  %6424 = vmatprep.subr.bf16.mxu1 %v10316_v13  ;;  %v2843_v25 = vadd.f32 %v2839_v56, %v2833_v31  ;;  %v2785_v2 = vadd.f32 %v2781_v4, %v2775_v11  ;;  %v2830_v53 = vmul.f32 %v10310_v18, %v8169_v24 }
 0x1f7   :  { %v2842_v51 = vadd.f32 %v2838_v35, %v2832_v27  ;;  %v2814_v16 = vadd.f32 %v2810_v58, %v2804_v48  ;;  %v2811_v32 = vmul.f32 %v8047_v1, %v10305_v30  ;;  %v2840_v36 = vmul.f32 %v10313_v61, %v8185_v8 }
 0x1f8   :  { %v2853_v60 = vadd.f32 %v2849_v15, %v2843_v25  ;;  %v2795_v17 = vadd.f32 %v2791_v63, %v2785_v2  ;;  %v2821_v6 = vmul.f32 %v8067_v19, %v10307_v20  ;;  %v2850_v24 = vmul.f32 %v10314_v62, %v8286_v46 }
 0x1f9   :  { %v2852_v3 = vadd.f32 %v2848_v47, %v2842_v51  ;;  %6426 = vmatpush3.bf16.msra.mxu1 %v10316_v13  ;;  %v2824_v22 = vadd.f32 %v2820_v57, %v2814_v16  ;;  %v2831_v30 = vmul.f32 %v8163_v54, %v10310_v18  ;;  %v2841_v8 = vmul.f32 %v10259_v44, %v10313_v61  ;;  %v8892_v54 = vld [vmem:[%s10317_s11] sm:$0xff]  ;;  %v8899_v44 = vld [vmem:[%s10317_s11 + $0x10] sm:$0xff] }
 0x1fa   :  { %v2805_v40 = vadd.f32 %v2801_v14, %v2795_v17  ;;  %v2851_v19 = vmul.f32 %v10260_v34, %v10314_v62  ;;  %5949 = vmatprep.mubr.msk.f32.mxu0 %vm2979_vm1, %v8892_v54  ;;  %v1808_v34 = vstv %s1807_s19  ;;  %v2383_v18 = vstv %s5062_s8  ;;  %s9011_s19 = sld [smem:[#allocation10 + $0x37]]  ;;  %s9013_s8 = sld [smem:[#allocation10 + $0x38]] }
 0x1fb   :  { %5935 = vmatprep.mubr.msk.f32.mxu1 %vm452_vm0, %v2852_v3  ;;  %v2834_v28 = vadd.f32 %v2830_v53, %v2824_v22 }
 0x1fc   :  { %5936 = vmatmul.mubr.msk.f32.vlgmr.msra.gmra.mrb[20].mxu1 %vm452_vm0, %v2853_v60  ;;  %v2815_v1 = vadd.f32 %v2811_v32, %v2805_v40 }
 0x1fd   :  { %v2844_v29 = vadd.f32 %v2840_v36, %v2834_v28 }
 0x1fe   :  { %v2825_v50 = vadd.f32 %v2821_v6, %v2815_v1 }
 0x1ff   :  { %v2854_v43 = vadd.f32 %v2850_v24, %v2844_v29  ;;  %v8908_v29 = vld [vmem:[%s10317_s11 + $0x8] sm:$0xff] }
 0x200   :  { %v2835_v49 = vadd.f32 %v2831_v30, %v2825_v50  ;;  %v8917_v50 = vld [vmem:[%s10317_s11 + $0x18] sm:$0xff]  ;;  %10326 = sst [smem:[#allocation92_spill]] %s9011_s19 }
 0x201   :  { %5938 = vmatprep.mubr.msk.f32.mxu1 %vm452_vm0, %v2854_v43  ;;  %v2958_v43 = vstv %s5102_s21  ;;  %10327 = sst [smem:[#allocation93_spill]] %s9013_s8  ;;  %s9019_s21 = sld [smem:[#allocation10 + $0x5]] }
 0x202   :  { %v2845_v20 = vadd.f32 %v2841_v8, %v2835_v49  ;;  %v8922_v8 = vld [vmem:[%s10317_s11 + $0x20] sm:$0xff]  ;;  %v8931_v49 = vld [vmem:[%s10317_s11 + $0x28] sm:$0xff]  ;;  %s9005_s11 = sld [smem:[#allocation10 + $0x1c]] }
 0x204   :  { %v2855_v46 = vadd.f32 %v2851_v19, %v2845_v20 }
 0x206   :  { %5939 = vmatmul.mubr.msk.f32.gmra.mrb[22].mxu1 %vm452_vm0, %v2855_v46 }
 0x207   :  { %6026 = vmatprep.mubr.msk.f32.mxu1 %vm2979_vm1, %v8899_v44  ;;  %10330 = sst [smem:[#allocation96_spill]] %s9019_s21 }
 0x208   :  { %10323 = sst [smem:[#allocation28_spill]] %s9005_s11 }
 0x294   :  { %v5805_v26 = vpop.f32.mrb[16].mxu1 }
 0x295   :  { %v1810_v21 = vadd.f32 %v5805_v26, %v1808_v34  ;;  %v5871_v38 = vpop.f32.mrb[20].mxu0  ;;  %v1784_v9 = vpop.f32.mrb[17].mxu1 }
 0x296   :  { %v2385_v0 = vadd.f32 %v5871_v38, %v2383_v18  ;;  %v1809_v59 = vadd.f32 %v1808_v34, %v1784_v9  ;;  %v2359_v39 = vpop.f32.mrb[21].mxu0 }
 0x297   :  { %v1814_v12 = vmul.f32 0.5, %v1810_v21  ;;  %v2384_v61 = vadd.f32 %v2383_v18, %v2359_v39 }
 0x298   :  { %v2389_v35 = vmul.f32 0.5, %v2385_v0  ;;  %v1813_v42 = vmul.f32 0.5, %v1809_v59 }
 0x299   :  { %6664 = vtanh.f32 %v1814_v12  ;;  %v2388_v7 = vmul.f32 0.5, %v2384_v61 }
 0x29a   :  { %6666 = vtanh.f32 %v2389_v35 }
 0x29b   :  { %6668 = vtanh.f32 %v1813_v42 }
 0x29c   :  { %6670 = vtanh.f32 %v2388_v7 }
 0x2a3   :  { %v6665_v37 = vpop.eup %6664 }
 0x2a4   :  { %v6667_v10 = vpop.eup %6666  ;;  %v1822_v55 = vmul.f32 0.5, %v6665_v37 }
 0x2a5   :  { %v6669_v45 = vpop.eup %6668  ;;  %v2397_v56 = vmul.f32 0.5, %v6667_v10  ;;  %v5808_v62 = vpop.f32.mrb[18].mxu1 }
 0x2a6   :  { %v6671_v47 = vpop.eup %6670  ;;  %v1826_v52 = vadd.f32 0.5, %v1822_v55  ;;  %v1821_v33 = vmul.f32 0.5, %v6669_v45  ;;  %v1812_v23 = vadd.f32 %v5808_v62, %v1808_v34  ;;  %v1794_v15 = vpop.f32.mrb[19].mxu1 }
 0x2a7   :  { %v2401_v41 = vadd.f32 0.5, %v2397_v56  ;;  %v2396_v58 = vmul.f32 0.5, %v6671_v47  ;;  %v1811_v5 = vadd.f32 %v1808_v34, %v1794_v15  ;;  %v182_v15 = vld [vmem:[%s10318_s23 + $0x30] sm:$0xff] }
 0x2a8   :  { %v1825_v31 = vadd.f32 0.5, %v1821_v33  ;;  %v1816_v11 = vmul.f32 0.5, %v1812_v23  ;;  %v181_v33 = vld [vmem:[%s10318_s23 + $0x28] sm:$0xff] }
 0x2a9   :  { %v5874_v4 = vpop.f32.mrb[22].mxu0  ;;  %v2400_v27 = vadd.f32 0.5, %v2396_v58  ;;  %v1815_v57 = vmul.f32 0.5, %v1811_v5  ;;  %v176_v5 = vld [vmem:[%s10318_s23] sm:$0xff] }
 0x2aa   :  { %v2387_v48 = vadd.f32 %v5874_v4, %v2383_v18  ;;  %v2369_v63 = vpop.f32.mrb[23].mxu0  ;;  %v6427_v13 = vpack.c.bf16 %v1826_v52, %v1825_v31  ;;  %6672 = vtanh.f32 %v1816_v11  ;;  %v177_v31 = vld [vmem:[%s10318_s23 + $0x8] sm:$0xff]  ;;  %v3674_v4 = vstv %s8997_s1  ;;  %s9104_s1 = sld [smem:[#allocation10 + $0x11]] }
 0x2ab   :  { %v2386_v25 = vadd.f32 %v2383_v18, %v2369_v63  ;;  %v8903_v2 = vpack.c.bf16 %v2401_v41, %v2400_v27  ;;  %6674 = vtanh.f32 %v1815_v57  ;;  %v183_v41 = vld [vmem:[%s10318_s23 + $0x38] sm:$0xff]  ;;  %v8993_v11 = vpack.c.bf16 %v177_v31, %v176_v5 }
 0x2ac   :  { %v2391_v14 = vmul.f32 0.5, %v2387_v48  ;;  %6428 = vmatprep.subr.bf16.mxu0 %v6427_v13  ;;  %v8981_v58 = vpack.c.bf16 %v183_v41, %v182_v15  ;;  %v3726_v27 = vstv %s8999_s3  ;;  %v3940_v48 = vstv %s9001_s15  ;;  %s9106_s15 = sld [smem:[#allocation10 + $0x14]]  ;;  %s9112_s3 = sld [smem:[#allocation10 + $0x17]] }
 0x2ad   :  { %v2390_v51 = vmul.f32 0.5, %v2386_v25  ;;  %6430 = vmatpush3.bf16.msra.mxu0 %v6427_v13  ;;  %v4087_v57 = vstv %s9003_s16  ;;  %v4139_v63 = vstv %s9005_s11  ;;  %v4500_v25 = vstv %s9009_s18  ;;  %s9122_s18 = sld [smem:[#allocation10 + $0x26]]  ;;  %s9183_s16 = sld [smem:[#allocation10 + $0x42]] }
 0x2ae   :  { %6676 = vtanh.f32 %v2391_v14  ;;  %v10101_v14 = vstv %s9013_s8  ;;  %s9160_s8 = sld [smem:[#allocation10 + $0x43]]  ;;  %s10502_s11 = sld [smem:[#allocation126_spill]] }
 0x2af   :  { %6678 = vtanh.f32 %v2390_v51  ;;  %v3678_v51 = vstv %s9015_s9  ;;  %s10392_s9 = sld [smem:[#allocation124_spill]] }
 0x2b0   :  { %10364 = sst [smem:[#allocation130_spill]] %s9104_s1 }
 0x2b2   :  { %10365 = sst [smem:[#allocation131_spill]] %s9106_s15 }
 0x2b3   :  { %10368 = sst [smem:[#allocation132_spill]] %s9112_s3  ;;  %s10386_s3 = sld [smem:[#allocation118_spill]] }
 0x2b4   :  { %v6673_v16 = vpop.eup %6672  ;;  %10372 = sst [smem:[#allocation135_spill]] %s9122_s18  ;;  %s10385_s18 = sld [smem:[#allocation117_spill]] }
 0x2b5   :  { %v6675_v53 = vpop.eup %6674  ;;  %v1824_v60 = vmul.f32 0.5, %v6673_v16  ;;  %v3730_v16 = vstv %s9017_s10  ;;  %s9128_s10 = sld [smem:[#allocation10 + $0x29]]  ;;  %10388 = sst [smem:[#allocation117_spill]] %s9160_s8 }
 0x2b6   :  { %v1823_v17 = vmul.f32 0.5, %v6675_v53  ;;  %v3944_v53 = vstv %s9019_s21  ;;  %s10373_s21 = sld [smem:[#allocation110_spill]]  ;;  %s9174_s8 = sld [smem:[#allocation10 + $0x3c]] }
 0x2b7   :  { %v1828_v3 = vadd.f32 0.5, %v1824_v60  ;;  %v4091_v60 = vstv %s9021_s22  ;;  %s10374_s22 = sld [smem:[#allocation111_spill]]  ;;  %10395 = sst [smem:[#allocation124_spill]] %s9183_s16 }
 0x2b8   :  { %v6677_v32 = vpop.eup %6676  ;;  %v1827_v40 = vadd.f32 0.5, %v1823_v17  ;;  %v4143_v17 = vstv %s9023_s20  ;;  %s10379_s20 = sld [smem:[#allocation146_spill]]  ;;  %s10402_s24 = sld [smem:[#allocation135_spill]] }
 0x2b9   :  { %v6679_v22 = vpop.eup %6678  ;;  %v2399_v36 = vmul.f32 0.5, %v6677_v32  ;;  %v4357_v32 = vstv %s9025_s5  ;;  %s10405_s5 = sld [smem:[#allocation117_spill]]  ;;  %s10490_s16 = sld [smem:[#allocation114_spill]] }
 0x2ba   :  { %v2398_v6 = vmul.f32 0.5, %v6679_v22  ;;  %v6431_v24 = vpack.c.bf16 %v1828_v3, %v1827_v40  ;;  %v4504_v3 = vstv %s9027_s6  ;;  %v4556_v22 = vstv %s9029_s2  ;;  %s9152_s2 = sld [smem:[#allocation10 + $0x3d]]  ;;  %s9513_s6 = sld [smem:[#allocation10 + $0x4c]] }
 0x2bb   :  { %v2403_v28 = vadd.f32 0.5, %v2399_v36  ;;  %v4770_v36 = vstv %s9031_s4  ;;  %v3736_v40 = vstv %s9033_s26  ;;  %10375 = sst [smem:[#allocation136_spill]] %s9128_s10  ;;  %s9142_s4 = sld [smem:[#allocation10 + $0x32]] }
 0x2bc   :  { %v2402_v1 = vadd.f32 0.5, %v2398_v6  ;;  %6432 = vmatprep.subr.bf16.mxu0 %v6431_v24  ;;  %v3742_v6 = vstv %s9035_s27  ;;  %s9162_s10 = sld [smem:[#allocation10 + $0x46]]  ;;  %s10438_s27 = sld [smem:[#allocation112_spill]] }
 0x2bd   :  { %6434 = vmatpush3.bf16.msra.mxu0 %v6431_v24  ;;  %s10511_s1 = sld [smem:[#allocation131_spill]]  ;;  %s10513_s15 = sld [smem:[#allocation132_spill]] }
 0x2be   :  { %v6455_v30 = vpack.c.bf16 %v2403_v28, %v2402_v1  ;;  %6436 = vmatprep.subr.bf16.mxu0 %v6427_v13  ;;  %s10518_s26 = sld [smem:[#allocation123_spill]] }
 0x2c0   :  { %5950 = vmatmul.mubr.msk.f32.vlgmr.msra.gmra.mrb[24].mxu0 %vm2979_vm1, %v8908_v29 }
 0x2c1   :  { %6438 = vmatpush3.bf16.msra.mxu0 %v6427_v13  ;;  %5960 = vmatprep.mubr.msk.f32.mxu0 %vm2979_vm1, %v8899_v44  ;;  %10383 = sst [smem:[#allocation139_spill]] %s9142_s4  ;;  %s10517_s4 = sld [smem:[#allocation116_spill]] }
 0x2c2   :  { %6440 = vmatprep.subr.bf16.mxu0 %v6431_v24  ;;  %10390 = sst [smem:[#allocation140_spill]] %s9162_s10 }
 0x2c3   :  { %s9176_s10 = sld [smem:[#allocation10 + $0x3f]] }
 0x2c4   :  { %s10474_s25 = sld [smem:[#allocation140_spill]] }
 0x2c5   :  { %6442 = vmatpush3.bf16.msra.mxu0 %v6431_v24 }
 0x2c6   :  { %6444 = vmatprep.subr.bf16.mxu0 %v6427_v13 }
 0x2c8   :  { %5961 = vmatmul.mubr.msk.f32.vlgmr.msra.gmra.mrb[26].mxu0 %vm2979_vm1, %v8917_v50 }
 0x2c9   :  { %6446 = vmatpush3.bf16.msra.mxu0 %v6427_v13  ;;  %5971 = vmatprep.mubr.msk.f32.mxu0 %vm2979_vm1, %v8922_v8  ;;  %v4353_v13 = vstv %s9007_s17  ;;  %s9114_s17 = sld [smem:[#allocation10 + $0x1a]] }
 0x2ca   :  { %6448 = vmatprep.subr.bf16.mxu0 %v6431_v24 }
 0x2cd   :  { %6450 = vmatpush3.bf16.msra.mxu0 %v6431_v24 }
 0x2ce   :  { %6452 = vmatprep.subr.bf16.mxu0 %v8903_v2 }
 0x2cf   :  { %v5937_v19 = vpop.f32.mrb[20].mxu1  ;;  %10369 = sst [smem:[#allocation133_spill]] %s9114_s17  ;;  %s9130_s17 = sld [smem:[#allocation10 + $0x2c]] }
 0x2d0   :  { %v2960_v20 = vadd.f32 %v5937_v19, %v2958_v43  ;;  %v2934_v46 = vpop.f32.mrb[21].mxu1  ;;  %5972 = vmatmul.mubr.msk.f32.vlgmr.msra.gmra.mrb[28].mxu0 %vm2979_vm1, %v8931_v49  ;;  %v4149_v19 = vstv %s10373_s21  ;;  %s9185_s21 = sld [smem:[#allocation10 + $0x45]] }
 0x2d1   :  { %v2959_v34 = vadd.f32 %v2958_v43, %v2934_v46  ;;  %6454 = vmatpush3.bf16.msra.mxu0 %v8903_v2  ;;  %5982 = vmatprep.mubr.msk.f32.mxu0 %vm2979_vm1, %v8892_v54 }
 0x2d2   :  { %v2964_v18 = vmul.f32 0.5, %v2960_v20  ;;  %6456 = vmatprep.subr.bf16.mxu0 %v6455_v30  ;;  %v4155_v20 = vstv %s10374_s22  ;;  %s9191_s22 = sld [smem:[#allocation10 + $0x3e]] }
 0x2d3   :  { %v2963_v26 = vmul.f32 0.5, %v2959_v34 }
 0x2d4   :  { %6680 = vtanh.f32 %v2964_v18 }
 0x2d5   :  { %6682 = vtanh.f32 %v2963_v26  ;;  %6458 = vmatpush3.bf16.msra.mxu0 %v6455_v30  ;;  %10377 = sst [smem:[#allocation137_spill]] %s9130_s17  ;;  %s10403_s17 = sld [smem:[#allocation136_spill]] }
 0x2d6   :  { %6460 = vmatprep.subr.bf16.mxu0 %v8903_v2  ;;  %10396 = sst [smem:[#allocation141_spill]] %s9185_s21  ;;  %s10471_s13 = sld [smem:[#allocation137_spill]] }
 0x2d8   :  { %5983 = vmatmul.mubr.msk.f32.vlgmr.msra.gmra.mrb[30].mxu0 %vm2979_vm1, %v8908_v29  ;;  %10397 = sst [smem:[#allocation142_spill]] %s9191_s22  ;;  %s10494_s22 = sld [smem:[#allocation121_spill]] }
 0x2d9   :  { %v5940_v21 = vpop.f32.mrb[22].mxu1  ;;  %6462 = vmatpush3.bf16.msra.mxu0 %v8903_v2  ;;  %5993 = vmatprep.mubr.msk.f32.mxu0 %vm2979_vm1, %v8899_v44 }
 0x2da   :  { %v2962_v38 = vadd.f32 %v5940_v21, %v2958_v43  ;;  %v2944_v9 = vpop.f32.mrb[23].mxu1  ;;  %6464 = vmatprep.subr.bf16.mxu0 %v6455_v30 }
 0x2db   :  { %v2961_v0 = vadd.f32 %v2958_v43, %v2944_v9  ;;  %v184_v43 = vld [vmem:[%s10379_s20 + $0x40] sm:$0xff]  ;;  %v187_v9 = vld [vmem:[%s10379_s20 + $0x58] sm:$0xff] }
 0x2dc   :  { %v2966_v59 = vmul.f32 0.5, %v2962_v38  ;;  %v186_v38 = vld [vmem:[%s10379_s20 + $0x50] sm:$0xff] }
 0x2dd   :  { %v2965_v39 = vmul.f32 0.5, %v2961_v0  ;;  %6466 = vmatpush3.bf16.msra.mxu0 %v6455_v30 }
 0x2de   :  { %v6681_v12 = vpop.eup %6680  ;;  %6684 = vtanh.f32 %v2966_v59  ;;  %6468 = vmatprep.subr.bf16.mxu0 %v8903_v2  ;;  %v3684_v59 = vstv %s10385_s18  ;;  %s10481_s18 = sld [smem:[#allocation142_spill]] }
 0x2df   :  { %v6683_v61 = vpop.eup %6682  ;;  %v2972_v35 = vmul.f32 0.5, %v6681_v12  ;;  %6686 = vtanh.f32 %v2965_v39  ;;  %v3690_v39 = vstv %s10386_s3 }
 0x2e0   :  { %v2971_v42 = vmul.f32 0.5, %v6683_v61  ;;  %5994 = vmatmul.mubr.msk.f32.vlgmr.msra.gmra.mrb[32].mxu0 %vm2979_vm1, %v8917_v50 }
 0x2e1   :  { %v2976_v7 = vadd.f32 0.5, %v2972_v35  ;;  %6470 = vmatpush3.bf16.msra.mxu0 %v8903_v2  ;;  %6004 = vmatprep.mubr.msk.f32.mxu0 %vm2979_vm1, %v8922_v8  ;;  %v4552_v2 = vstv %s9011_s19  ;;  %s9120_s19 = sld [smem:[#allocation10 + $0x23]] }
 0x2e2   :  { %v2975_v37 = vadd.f32 0.5, %v2971_v42  ;;  %6472 = vmatprep.subr.bf16.mxu0 %v6455_v30 }
 0x2e4   :  { %v6475_v44 = vpack.c.bf16 %v2976_v7, %v2975_v37 }
 0x2e5   :  { %6474 = vmatpush3.bf16.msra.mxu0 %v6455_v30  ;;  %v178_v30 = vld [vmem:[%s10379_s20 + $0x10] sm:$0xff] }
 0x2e6   :  { %6484 = vmatprep.subr.bf16.mxu1 %v6475_v44  ;;  %6476 = vmatprep.subr.bf16.mxu0 %v6475_v44 }
 0x2e7   :  { %6486 = vmatpush3.bf16.msra.mxu1 %v6475_v44  ;;  %10371 = sst [smem:[#allocation134_spill]] %s9120_s19  ;;  %s9154_s19 = sld [smem:[#allocation10 + $0x40]] }
 0x2e8   :  { %v6685_v10 = vpop.eup %6684  ;;  %6005 = vmatmul.mubr.msk.f32.vlgmr.msra.gmra.mrb[34].mxu0 %vm2979_vm1, %v8931_v49  ;;  %s10401_s3 = sld [smem:[#allocation134_spill]] }
 0x2e9   :  { %v6687_v55 = vpop.eup %6686  ;;  %v2974_v45 = vmul.f32 0.5, %v6685_v10  ;;  %6478 = vmatpush3.bf16.msra.mxu0 %v6475_v44  ;;  %6015 = vmatprep.mubr.msk.f32.mxu0 %vm2979_vm1, %v8892_v54  ;;  %v180_v54 = vld [vmem:[%s10318_s23 + $0x20] sm:$0xff]  ;;  %s9057_s23 = sld [smem:[#allocation10 + $0x31]] }
 0x2ea   :  { %v2973_v56 = vmul.f32 0.5, %v6687_v55  ;;  %v8969_v23 = vpack.c.bf16 %v181_v33, %v180_v54  ;;  %v9198_v55 = vpack.c.bf16 %v187_v9, %v186_v38  ;;  %v3950_v54 = vstv %s9090_s29  ;;  %s10444_s29 = sld [smem:[#allocation129_spill]] }
 0x2eb   :  { %v2978_v62 = vadd.f32 0.5, %v2974_v45 }
 0x2ec   :  { %v2977_v47 = vadd.f32 0.5, %v2973_v56 }
 0x2ee   :  { %v6479_v52 = vpack.c.bf16 %v2978_v62, %v2977_v47  ;;  %v4510_v47 = vstv %s9174_s8  ;;  %s10451_s8 = sld [smem:[#allocation124_spill]] }
 0x2ef   :  { %10349 = sst [smem:[#allocation115_spill]] %s9057_s23  ;;  %s9085_s23 = sld [smem:[#allocation10 + $0x30]] }
 0x2f0   :  { %6480 = vmatprep.subr.bf16.mxu0 %v6479_v52  ;;  %6488 = vmatprep.subr.bf16.mxu1 %v6479_v52  ;;  %s10491_s21 = sld [smem:[#allocation115_spill]] }
 0x2f1   :  { %6482 = vmatpush3.bf16.msra.mxu0 %v6479_v52  ;;  %6490 = vmatpush3.bf16.msra.mxu1 %v6479_v52 }
 0x2f2   :  { %6492 = vmatprep.subr.bf16.mxu0 %v6475_v44  ;;  %6500 = vmatprep.subr.bf16.mxu1 %v8969_v23 }
 0x2f4   :  { %6016 = vmatmul.mubr.msk.f32.vlgmr.msra.gmra.mrb[36].mxu0 %vm2979_vm1, %v8908_v29  ;;  %6027 = vmatmul.mubr.msk.f32.vlgmr.msra.gmra.mrb[24].mxu1 %vm2979_vm1, %v8917_v50  ;;  %v179_v29 = vld [vmem:[%s10379_s20 + $0x18] sm:$0xff] }
 0x2f5   :  { %6494 = vmatpush3.bf16.msra.mxu0 %v6475_v44  ;;  %6037 = vmatprep.mubr.msk.f32.mxu0 %vm2979_vm1, %v8922_v8  ;;  %10361 = sst [smem:[#allocation127_spill]] %s9085_s23  ;;  %v9166_v21 = vpack.c.bf16 %v179_v29, %v178_v30  ;;  %v4097_v44 = vstv %s10392_s9  ;;  %v4562_v8 = vstv %s9152_s2  ;;  %s10475_s2 = sld [smem:[#allocation141_spill]] }
 0x2f6   :  { %6496 = vmatprep.subr.bf16.mxu0 %v6479_v52  ;;  %6502 = vmatpush3.bf16.msra.mxu1 %v8969_v23  ;;  %s10506_s23 = sld [smem:[#allocation127_spill]]  ;;  %s10515_s9 = sld [smem:[#allocation109_spill]] }
 0x2f7   :  { %6504 = vmatprep.subr.bf16.mxu1 %v8981_v58 }
 0x2f9   :  { %6498 = vmatpush3.bf16.msra.mxu0 %v6479_v52 }
 0x2fa   :  { %6524 = vmatprep.subr.bf16.mxu0 %v8969_v23  ;;  %6506 = vmatpush3.bf16.msra.mxu1 %v8981_v58 }
 0x2fb   :  { %6508 = vmatprep.subr.bf16.mxu1 %v8993_v11 }
 0x2fc   :  { %6038 = vmatmul.mubr.msk.f32.vlgmr.msra.gmra.mrb[38].mxu0 %vm2979_vm1, %v8931_v49  ;;  %v185_v49 = vld [vmem:[%s10379_s20 + $0x48] sm:$0xff]  ;;  %s9193_s20 = sld [smem:[#allocation10 + $0x41]] }
 0x2fd   :  { %6526 = vmatpush3.bf16.msra.mxu0 %v8969_v23  ;;  %v9181_v12 = vpack.c.bf16 %v185_v49, %v184_v43  ;;  %v4363_v49 = vstv %s10401_s3  ;;  %s10436_s3 = sld [smem:[#allocation105_spill]] }
 0x2fe   :  { %6528 = vmatprep.subr.bf16.mxu0 %v8981_v58 }
 0x301   :  { %6530 = vmatpush3.bf16.msra.mxu0 %v8981_v58 }
 0x302   :  { %6532 = vmatprep.subr.bf16.mxu0 %v8993_v11  ;;  %10398 = sst [smem:[#allocation143_spill]] %s9193_s20  ;;  %s10418_s20 = sld [smem:[#allocation93_spill]] }
 0x393   :  { %v9208_v41 = vpop.f32.mrb[24].mxu0 }
 0x394   :  { %v3052_v43 = vpop.f32.mrb[25].mxu0  ;;  %v3676_v0 = vmul.f32 %v9208_v41, %v3674_v4  ;;  %v3728_v18 = vmul.f32 %v9208_v41, %v3726_v27  ;;  %v3942_v50 = vmul.f32 %v9208_v41, %v3940_v48  ;;  %v4089_v1 = vmul.f32 %v9208_v41, %v4087_v57 }
 0x395   :  { %v4141_v37 = vmul.f32 %v9208_v41, %v4139_v63  ;;  %v4355_v26 = vmul.f32 %v9208_v41, %v4353_v13  ;;  %v4502_v42 = vmul.f32 %v9208_v41, %v4500_v25  ;;  %v4554_v31 = vmul.f32 %v9208_v41, %v4552_v2 }
 0x396   :  { %v3727_v52 = vmul.f32 %v3726_v27, %v3052_v43  ;;  %v4140_v5 = vmul.f32 %v4139_v63, %v3052_v43  ;;  %v3675_v56 = vmul.f32 %v3674_v4, %v3052_v43  ;;  %v4088_v35 = vmul.f32 %v4087_v57, %v3052_v43 }
 0x397   :  { %v3941_v24 = vmul.f32 %v3940_v48, %v3052_v43  ;;  %v4354_v7 = vmul.f32 %v4353_v13, %v3052_v43  ;;  %v4553_v29 = vmul.f32 %v4552_v2, %v3052_v43  ;;  %v4501_v27 = vmul.f32 %v4500_v25, %v3052_v43 }
 0x398   :  { %v9280_v15 = vmul.f32 %v10101_v14, %v3052_v43 }
 0x39b   :  { %v5962_v34 = vpop.f32.mrb[26].mxu0 }
 0x39c   :  { %v3680_v63 = vmul.f32 %v5962_v34, %v3678_v51  ;;  %v3732_v4 = vmul.f32 %v5962_v34, %v3730_v16  ;;  %v4093_v9 = vmul.f32 %v5962_v34, %v4091_v60  ;;  %v9276_v57 = vpop.f32.mrb[27].mxu0  ;;  %v3946_v48 = vmul.f32 %v5962_v34, %v3944_v53 }
 0x39d   :  { %v4145_v13 = vmul.f32 %v5962_v34, %v4143_v17  ;;  %v4359_v2 = vmul.f32 %v5962_v34, %v4357_v32  ;;  %v4506_v25 = vmul.f32 %v5962_v34, %v4504_v3  ;;  %v4558_v45 = vmul.f32 %v5962_v34, %v4556_v22 }
 0x39e   :  { %v3731_v61 = vmul.f32 %v3730_v16, %v9276_v57  ;;  %v4144_v43 = vmul.f32 %v4143_v17, %v9276_v57  ;;  %v3734_v14 = vadd.f32 %v3732_v4, %v3728_v18  ;;  %v3679_v28 = vmul.f32 %v3678_v51, %v9276_v57 }
 0x39f   :  { %v4147_v46 = vadd.f32 %v4145_v13, %v4141_v37  ;;  %v4092_v62 = vmul.f32 %v4091_v60, %v9276_v57  ;;  %v3682_v30 = vadd.f32 %v3680_v63, %v3676_v0  ;;  %v4095_v10 = vadd.f32 %v4093_v9, %v4089_v1 }
 0x3a0   :  { %v3733_v38 = vadd.f32 %v3731_v61, %v3727_v52  ;;  %v4146_v33 = vadd.f32 %v4144_v43, %v4140_v5  ;;  %v3945_v16 = vmul.f32 %v3944_v53, %v9276_v57  ;;  %v3681_v17 = vadd.f32 %v3679_v28, %v3675_v56 }
 0x3a1   :  { %v4094_v18 = vadd.f32 %v4092_v62, %v4088_v35  ;;  %v4358_v51 = vmul.f32 %v4357_v32, %v9276_v57  ;;  %v3948_v60 = vadd.f32 %v3946_v48, %v3942_v50  ;;  %v9312_v0 = vmul.f32 %v5962_v34, %v4770_v36 }
 0x3a2   :  { %v3947_v1 = vadd.f32 %v3945_v16, %v3941_v24  ;;  %v4361_v61 = vadd.f32 %v4359_v2, %v4355_v26  ;;  %v4560_v37 = vadd.f32 %v4558_v45, %v4554_v31  ;;  %v4557_v35 = vmul.f32 %v4556_v22, %v9276_v57 }
 0x3a3   :  { %v9314_v53 = vpop.f32.mrb[28].mxu0  ;;  %v4360_v28 = vadd.f32 %v4358_v51, %v4354_v7  ;;  %v4505_v32 = vmul.f32 %v4504_v3, %v9276_v57  ;;  %v9322_v56 = vadd.f32 %v4506_v25, %v4502_v42  ;;  %v9376_v43 = vmul.f32 %v4770_v36, %v9276_v57 }
 0x3a4   :  { %v9324_v50 = vpop.f32.mrb[29].mxu0  ;;  %v3738_v34 = vmul.f32 %v9314_v53, %v3736_v40  ;;  %v4151_v24 = vmul.f32 %v9314_v53, %v4149_v19  ;;  %v3686_v26 = vmul.f32 %v9314_v53, %v3684_v59  ;;  %v4099_v22 = vmul.f32 %v9314_v53, %v4097_v44 }
 0x3a5   :  { %v3737_v3 = vmul.f32 %v3736_v40, %v9324_v50  ;;  %v4150_v42 = vmul.f32 %v4149_v19, %v9324_v50  ;;  %v3685_v7 = vmul.f32 %v3684_v59, %v9324_v50  ;;  %v4098_v45 = vmul.f32 %v4097_v44, %v9324_v50 }
 0x3a6   :  { %v3740_v62 = vadd.f32 %v3738_v34, %v3734_v14  ;;  %v4153_v52 = vadd.f32 %v4151_v24, %v4147_v46  ;;  %v3688_v5 = vadd.f32 %v3686_v26, %v3682_v30  ;;  %v4101_v31 = vadd.f32 %v4099_v22, %v4095_v10 }
 0x3a7   :  { %v3739_v9 = vadd.f32 %v3737_v3, %v3733_v38  ;;  %v4152_v63 = vadd.f32 %v4150_v42, %v4146_v33  ;;  %v3687_v4 = vadd.f32 %v3685_v7, %v3681_v17  ;;  %v4100_v48 = vadd.f32 %v4098_v45, %v4094_v18 }
 0x3a8   :  { %v3951_v40 = vmul.f32 %v3950_v54, %v9324_v50  ;;  %v3952_v19 = vmul.f32 %v9314_v53, %v3950_v54  ;;  %v4364_v59 = vmul.f32 %v4363_v49, %v9324_v50  ;;  %v4365_v14 = vmul.f32 %v9314_v53, %v4363_v49 }
 0x3a9   :  { %v4559_v46 = vadd.f32 %v4557_v35, %v4553_v29  ;;  %v4563_v44 = vmul.f32 %v4562_v8, %v9324_v50  ;;  %v4564_v10 = vmul.f32 %v9314_v53, %v4562_v8  ;;  %v4507_v33 = vadd.f32 %v4505_v32, %v4501_v27 }
 0x3aa   :  { %v3953_v54 = vadd.f32 %v3951_v40, %v3947_v1  ;;  %v4366_v30 = vadd.f32 %v4364_v59, %v4360_v28  ;;  %v3954_v38 = vadd.f32 %v3952_v19, %v3948_v60  ;;  %v4367_v13 = vadd.f32 %v4365_v14, %v4361_v61 }
 0x3ab   :  { %v9368_v49 = vpop.f32.mrb[30].mxu0  ;;  %v4565_v29 = vadd.f32 %v4563_v44, %v4559_v46  ;;  %v4566_v2 = vadd.f32 %v4564_v10, %v4560_v37  ;;  %v4511_v25 = vmul.f32 %v4510_v47, %v9324_v50  ;;  %v10430_v18 = vstv %s9077_s7  ;;  %s10456_s7 = sld [smem:[#allocation106_spill]] }
 0x3ac   :  { %v9378_v8 = vpop.f32.mrb[31].mxu0  ;;  %v3744_v27 = vmul.f32 %v9368_v49, %v3742_v6  ;;  %v4157_v16 = vmul.f32 %v9368_v49, %v4155_v20  ;;  %v3692_v17 = vmul.f32 %v9368_v49, %v3690_v39  ;;  %v4105_v51 = vmul.f32 %v9368_v49, %v10430_v18 }
 0x3ad   :  { %v3743_v36 = vmul.f32 %v3742_v6, %v9378_v8  ;;  %v4156_v57 = vmul.f32 %v4155_v20, %v9378_v8  ;;  %v3691_v60 = vmul.f32 %v3690_v39, %v9378_v8  ;;  %v10431_v1 = vmov %v10430_v18 }
 0x3ae   :  { %v4104_v61 = vmul.f32 %v10431_v1, %v9378_v8  ;;  %v3746_v37 = vadd.f32 %v3744_v27, %v3740_v62  ;;  %v4159_v28 = vadd.f32 %v4157_v16, %v4153_v52  ;;  %v3694_v35 = vadd.f32 %v3692_v17, %v3688_v5 }
 0x3af   :  { %v4107_v32 = vadd.f32 %v4105_v51, %v4101_v31  ;;  %v3745_v34 = vadd.f32 %v3743_v36, %v3739_v9  ;;  %v4158_v24 = vadd.f32 %v4156_v57, %v4152_v63  ;;  %v3693_v26 = vadd.f32 %v3691_v60, %v3687_v4 }
 0x3b0   :  { %v4106_v6 = vadd.f32 %v4104_v61, %v4100_v48  ;;  %v10432_v22 = vstv %s9096_s0  ;;  %v10434_v39 = vstv %s10402_s24  ;;  %v10437_v52 = vstv %s9154_s19  ;;  %s10460_s24 = sld [smem:[#allocation120_spill]]  ;;  %s10462_s0 = sld [smem:[#allocation125_spill]] }
 0x3b1   :  { %v3957_v20 = vmul.f32 %v10432_v22, %v9378_v8  ;;  %v10433_v3 = vmov %v10432_v22  ;;  %v4370_v7 = vmul.f32 %v10434_v39, %v9378_v8  ;;  %v10435_v45 = vmov %v10434_v39  ;;  %s10485_s19 = sld [smem:[#allocation143_spill]] }
 0x3b2   :  { %v3958_v42 = vmul.f32 %v9368_v49, %v10433_v3  ;;  %v4371_v62 = vmul.f32 %v9368_v49, %v10435_v45  ;;  %v4569_v5 = vmul.f32 %v10437_v52, %v9378_v8  ;;  %v10439_v31 = vmov %v10437_v52 }
 0x3b3   :  { %v4570_v9 = vmul.f32 %v9368_v49, %v10439_v31  ;;  %v4513_v63 = vadd.f32 %v4511_v25, %v4507_v33  ;;  %v10441_v4 = vstv %s9176_s10  ;;  %v3959_v40 = vadd.f32 %v3957_v20, %v3953_v54  ;;  %v9425_v46 = vpop.f32.mrb[32].mxu0 }
 0x3b4   :  { %v4517_v48 = vmul.f32 %v10441_v4, %v9378_v8  ;;  %v4372_v19 = vadd.f32 %v4370_v7, %v4366_v30  ;;  %v3960_v59 = vadd.f32 %v3958_v42, %v3954_v38  ;;  %v4373_v14 = vadd.f32 %v4371_v62, %v4367_v13  ;;  %v9430_v33 = vpop.f32.mrb[33].mxu0 }
 0x3b5   :  { %v4571_v44 = vadd.f32 %v4569_v5, %v4565_v29  ;;  %v4572_v10 = vadd.f32 %v4570_v9, %v4566_v2  ;;  %v4512_v27 = vmul.f32 %v9314_v53, %v4510_v47  ;;  %v10442_v25 = vstv %s10436_s3  ;;  %s9643_s3 = sld [smem:[#allocation10 + $0x4f]] }
 0x3b6   :  { %v4519_v16 = vadd.f32 %v4517_v48, %v4513_v63  ;;  %v3750_v17 = vmul.f32 %v9425_v46, %v10442_v25  ;;  %v10443_v18 = vstv %s10438_s27  ;;  %v10445_v30 = vstv %s10440_s28  ;;  %s9649_s27 = sld [smem:[#allocation10 + $0x48]]  ;;  %s10520_s28 = sld [smem:[#allocation128_spill]] }
 0x3b7   :  { %v4163_v54 = vmul.f32 %v9425_v46, %v10443_v18  ;;  %v3698_v38 = vmul.f32 %v9425_v46, %v10445_v30  ;;  %v10446_v13 = vstv %s9079_s30  ;;  %v10447_v47 = vmov %v10442_v25  ;;  %s10458_s30 = sld [smem:[#allocation113_spill]] }
 0x3b8   :  { %v4111_v29 = vmul.f32 %v9425_v46, %v10446_v13  ;;  %v3749_v2 = vmul.f32 %v10447_v47, %v9430_v33  ;;  %v10448_v51 = vmov %v10443_v18  ;;  %v10449_v57 = vmov %v10445_v30 }
 0x3b9   :  { %v4162_v36 = vmul.f32 %v10448_v51, %v9430_v33  ;;  %v3697_v60 = vmul.f32 %v10449_v57, %v9430_v33  ;;  %v10450_v1 = vmov %v10446_v13  ;;  %v3752_v22 = vadd.f32 %v3750_v17, %v3746_v37 }
 0x3ba   :  { %v4110_v61 = vmul.f32 %v10450_v1, %v9430_v33  ;;  %v4165_v20 = vadd.f32 %v4163_v54, %v4159_v28  ;;  %v3700_v3 = vadd.f32 %v3698_v38, %v3694_v35  ;;  %v4113_v42 = vadd.f32 %v4111_v29, %v4107_v32 }
 0x3bb   :  { %v3751_v39 = vadd.f32 %v3749_v2, %v3745_v34  ;;  %v4164_v7 = vadd.f32 %v4162_v36, %v4158_v24  ;;  %v3699_v45 = vadd.f32 %v3697_v60, %v3693_v26  ;;  %v10452_v52 = vstv %s10444_s29  ;;  %v9480_v38 = vpop.f32.mrb[34].mxu0  ;;  %s9663_s29 = sld [smem:[#allocation10 + $0x4b]] }
 0x3bc   :  { %v4112_v62 = vadd.f32 %v4110_v61, %v4106_v6  ;;  %v3963_v5 = vmul.f32 %v10452_v52, %v9430_v33  ;;  %v10453_v31 = vmov %v10452_v52  ;;  %v10454_v63 = vstv %s10403_s17  ;;  %v9483_v51 = vpop.f32.mrb[35].mxu0  ;;  %s10487_s17 = sld [smem:[#allocation107_spill]] }
 0x3bd   :  { %v3964_v9 = vmul.f32 %v9425_v46, %v10453_v31  ;;  %v4376_v4 = vmul.f32 %v10454_v63, %v9430_v33  ;;  %v10455_v48 = vmov %v10454_v63  ;;  %v10457_v28 = vstv %s10405_s5  ;;  %s10468_s5 = sld [smem:[#allocation130_spill]] }
 0x3be   :  { %v4377_v37 = vmul.f32 %v9425_v46, %v10455_v48  ;;  %v4575_v35 = vmul.f32 %v10457_v28, %v9430_v33  ;;  %v10459_v32 = vmov %v10457_v28  ;;  %v10461_v24 = vstv %s9176_s10  ;;  %s10488_s10 = sld [smem:[#allocation108_spill]] }
 0x3bf   :  { %v4576_v34 = vmul.f32 %v9425_v46, %v10459_v32  ;;  %v4518_v26 = vmul.f32 %v9368_v49, %v10461_v24  ;;  %v10463_v6 = vstv %s10451_s8  ;;  %v3965_v17 = vadd.f32 %v3963_v5, %v3959_v40 }
 0x3c0   :  { %v4523_v25 = vmul.f32 %v10463_v6, %v9430_v33  ;;  %v4378_v18 = vadd.f32 %v4376_v4, %v4372_v19  ;;  %v3966_v54 = vadd.f32 %v3964_v9, %v3960_v59  ;;  %v4379_v30 = vadd.f32 %v4377_v37, %v4373_v14 }
 0x3c1   :  { %v4577_v13 = vadd.f32 %v4575_v35, %v4571_v44  ;;  %v4578_v29 = vadd.f32 %v4576_v34, %v4572_v10  ;;  %v4514_v2 = vadd.f32 %v4512_v27, %v9322_v56  ;;  %v10464_v36 = vstv %s10456_s7  ;;  %s9690_s7 = sld [smem:[#allocation10 + $0x44]] }
 0x3c2   :  { %v4525_v47 = vadd.f32 %v4523_v25, %v4519_v16  ;;  %v3756_v57 = vmul.f32 %v9480_v38, %v10464_v36  ;;  %v10465_v60 = vstv %s10458_s30  ;;  %v10466_v19 = vstv %s10460_s24  ;;  %s10531_s30 = sld [smem:[#allocation133_spill]]  ;;  %s10533_s24 = sld [smem:[#allocation138_spill]] }
 0x3c3   :  { %v4169_v40 = vmul.f32 %v9480_v38, %v10465_v60  ;;  %v3704_v59 = vmul.f32 %v9480_v38, %v10466_v19  ;;  %v10467_v1 = vstv %s10462_s0  ;;  %v10469_v44 = vmov %v10464_v36  ;;  %s9699_s0 = sld [smem:[#allocation10 + $0x47]] }
 0x3c4   :  { %v4117_v14 = vmul.f32 %v9480_v38, %v10467_v1  ;;  %v3755_v56 = vmul.f32 %v10469_v44, %v9483_v51  ;;  %v10470_v10 = vmov %v10465_v60  ;;  %v10472_v16 = vmov %v10466_v19 }
 0x3c5   :  { %v4168_v27 = vmul.f32 %v10470_v10, %v9483_v51  ;;  %v3703_v61 = vmul.f32 %v10472_v16, %v9483_v51  ;;  %v10473_v52 = vmov %v10467_v1  ;;  %v3758_v31 = vadd.f32 %v3756_v57, %v3752_v22 }
 0x3c6   :  { %v4116_v5 = vmul.f32 %v10473_v52, %v9483_v51  ;;  %v4171_v9 = vadd.f32 %v4169_v40, %v4165_v20  ;;  %v9515_v63 = vadd.f32 %v3704_v59, %v3700_v3  ;;  %v9517_v4 = vadd.f32 %v4117_v14, %v4113_v42 }
 0x3c7   :  { %v3757_v48 = vadd.f32 %v3755_v56, %v3751_v39  ;;  %v4170_v37 = vadd.f32 %v4168_v27, %v4164_v7  ;;  %v3705_v28 = vadd.f32 %v3703_v61, %v3699_v45  ;;  %v10476_v32 = vstv %s10468_s5  ;;  %s10535_s5 = sld [smem:[#allocation139_spill]] }
 0x3c8   :  { %v4118_v35 = vadd.f32 %v4116_v5, %v4112_v62  ;;  %v3969_v34 = vmul.f32 %v10476_v32, %v9483_v51  ;;  %v10477_v24 = vmov %v10476_v32  ;;  %v10478_v25 = vstv %s10471_s13  ;;  %s9738_s13 = sld [smem:[#allocation10 + $0x4a]] }
 0x3c9   :  { %v3970_v6 = vmul.f32 %v9480_v38, %v10477_v24  ;;  %v4382_v22 = vmul.f32 %v10478_v25, %v9483_v51  ;;  %v10479_v20 = vmov %v10478_v25  ;;  %v10480_v42 = vstv %s10474_s25  ;;  %s9767_s25 = sld [smem:[#allocation10 + $0x50]] }
 0x3ca   :  { %v4383_v3 = vmul.f32 %v9480_v38, %v10479_v20  ;;  %v4581_v39 = vmul.f32 %v10480_v42, %v9483_v51  ;;  %v10482_v7 = vmov %v10480_v42  ;;  %v10483_v62 = vstv %s10451_s8  ;;  %s9676_s8 = sld [smem:[#allocation10 + $0x4e]] }
 0x3cb   :  { %v4582_v45 = vmul.f32 %v9480_v38, %v10482_v7  ;;  %v4524_v36 = vmul.f32 %v9425_v46, %v10483_v62  ;;  %v10484_v57 = vstv %s10475_s2  ;;  %v9543_v40 = vadd.f32 %v3969_v34, %v3965_v17  ;;  %s5220_s2 = sld [smem:[#allocation11 + $0x2]] }
 0x3cc   :  { %v4529_v60 = vmul.f32 %v10484_v57, %v9483_v51  ;;  %v9545_v19 = vadd.f32 %v4382_v22, %v4378_v18  ;;  %v9547_v59 = vadd.f32 %v3970_v6, %v3966_v54  ;;  %v9549_v1 = vadd.f32 %v4383_v3, %v4379_v30 }
 0x3cd   :  { %v9551_v14 = vadd.f32 %v4581_v39, %v4577_v13  ;;  %v9553_v44 = vadd.f32 %v4582_v45, %v4578_v29  ;;  %v4520_v10 = vadd.f32 %v4518_v26, %v4514_v2  ;;  %v10486_v27 = vstv %s10418_s20  ;;  %v9575_v2 = vpop.f32.mrb[36].mxu0  ;;  %s10496_s20 = sld [smem:[#allocation122_spill]] }
 0x3ce   :  { %v9555_v56 = vadd.f32 %v4529_v60, %v4525_v47  ;;  %v4768_v16 = vmul.f32 %v9208_v41, %v10486_v27  ;;  %v4399_v17 = vstv %s9497_s12  ;;  %v4773_v18 = vadd.f32 %v9376_v43, %v9280_v15  ;;  %v9577_v15 = vpop.f32.mrb[24].mxu1  ;;  %v9594_v34 = vpop.f32.mrb[37].mxu0  ;;  %s9757_s12 = sld [smem:[#allocation10 + $0x4d]] }
 0x3cf   :  { %v10489_v54 = vstv %s10481_s18  ;;  %v10492_v47 = vmov %v10484_v57  ;;  %v9573_v41 = vadd.f32 %v4524_v36, %v4520_v10  ;;  %v10495_v52 = vstv %s10485_s19  ;;  %v9596_v24 = vpop.f32.mrb[25].mxu1  ;;  %s6810_s18 = smov [#allocation13]  }
 0x3d0   :  { %v4777_v30 = vmul.f32 %v10489_v54, %v9324_v50  ;;  %v9571_v26 = vmul.f32 %v9480_v38, %v10492_v47  ;;  %v10493_v43 = vmov %v10489_v54  ;;  %v9589_v5 = vmul.f32 %v10495_v52, %v9378_v8 }
 0x3d1   :  { %v9582_v50 = vmul.f32 %v9314_v53, %v10493_v43  ;;  %v9592_v32 = vadd.f32 %v9312_v0, %v4768_v16  ;;  %v10497_v6 = vstv %s10487_s17  ;;  %v10498_v25 = vstv %s10488_s10 }
 0x3d2   :  { %v9584_v61 = vadd.f32 %v4777_v30, %v4773_v18  ;;  %v3762_v53 = vmul.f32 %v9575_v2, %v10497_v6  ;;  %v3768_v22 = vmul.f32 %v9577_v15, %v10498_v25  ;;  %v10499_v20 = vstv %s10490_s16 }
 0x3d3   :  { %v4175_v3 = vmul.f32 %v9575_v2, %v10499_v20  ;;  %v10500_v8 = vstv %s10491_s21  ;;  %v10501_v0 = vmov %v10497_v6  ;;  %v10503_v7 = vmov %v10498_v25 }
 0x3d4   :  { %v4181_v42 = vmul.f32 %v9577_v15, %v10500_v8  ;;  %v3761_v39 = vmul.f32 %v10501_v0, %v9594_v34  ;;  %v3767_v45 = vmul.f32 %v10503_v7, %v9596_v24  ;;  %v10504_v62 = vmov %v10499_v20 }
 0x3d5   :  { %v4174_v36 = vmul.f32 %v10504_v62, %v9594_v34  ;;  %v10505_v57 = vmov %v10500_v8  ;;  %v3764_v10 = vadd.f32 %v3762_v53, %v3758_v31  ;;  %v4177_v27 = vadd.f32 %v4175_v3, %v4171_v9 }
 0x3d6   :  { %v4180_v60 = vmul.f32 %v10505_v57, %v9596_v24  ;;  %v10507_v16 = vstv %s10494_s22  ;;  %v3763_v47 = vadd.f32 %v3761_v39, %v3757_v48  ;;  %v10509_v52 = vstv %s10496_s20  ;;  %v9651_v57 = vpop.f32.mrb[38].mxu0 }
 0x3d7   :  { %v3709_v18 = vmul.f32 %v10507_v16, %v9594_v34  ;;  %v10508_v54 = vmov %v10507_v16  ;;  %v4176_v43 = vadd.f32 %v4174_v36, %v4170_v37  ;;  %v3715_v6 = vmul.f32 %v10509_v52, %v9596_v24 }
 0x3d8   :  { %v3710_v30 = vmul.f32 %v9575_v2, %v10508_v54  ;;  %v10510_v25 = vmov %v10509_v52  ;;  %v3770_v8 = vadd.f32 %v3768_v22, %v3764_v10  ;;  %v4183_v0 = vadd.f32 %v4181_v42, %v4177_v27 }
 0x3d9   :  { %v3716_v20 = vmul.f32 %v9577_v15, %v10510_v25  ;;  %v3711_v31 = vadd.f32 %v3709_v18, %v3705_v28  ;;  %v10512_v9 = vstv %s10502_s11  ;;  %v3769_v3 = vadd.f32 %v3767_v45, %v3763_v47 }
 0x3da   :  { %v4122_v53 = vmul.f32 %v10512_v9, %v9594_v34  ;;  %v4182_v7 = vadd.f32 %v4180_v60, %v4176_v43  ;;  %v10514_v62 = vmov %v10512_v9  ;;  %v10516_v37 = vstv %s10506_s23 }
 0x3db   :  { %v4123_v48 = vmul.f32 %v9575_v2, %v10514_v62  ;;  %v4128_v39 = vmul.f32 %v10516_v37, %v9596_v24  ;;  %v3717_v22 = vadd.f32 %v3715_v6, %v3711_v31  ;;  %v10519_v28 = vmov %v10516_v37 }
 0x3dc   :  { %v4124_v42 = vadd.f32 %v4122_v53, %v4118_v35  ;;  %v4129_v36 = vmul.f32 %v9577_v15, %v10519_v28  ;;  %v3712_v45 = vadd.f32 %v3710_v30, %v9515_v63  ;;  %v10521_v10 = vstv %s10511_s1  ;;  %v9665_v63 = vpop.f32.mrb[39].mxu0 }
 0x3dd   :  { %v4125_v60 = vadd.f32 %v4123_v48, %v9517_v4  ;;  %v3975_v27 = vmul.f32 %v10521_v10, %v9594_v34  ;;  %v10522_v16 = vmov %v10521_v10  ;;  %v10523_v18 = vstv %s10513_s15 }
 0x3de   :  { %v3976_v35 = vmul.f32 %v9575_v2, %v10522_v16  ;;  %v3981_v54 = vmul.f32 %v10523_v18, %v9596_v24  ;;  %v10524_v30 = vstv %s10515_s9  ;;  %v10525_v43 = vstv %s10517_s4 }
 0x3df   :  { %v3774_v47 = vmul.f32 %v9651_v57, %v10524_v30  ;;  %v4187_v4 = vmul.f32 %v9651_v57, %v10525_v43  ;;  %v10526_v52 = vstv %s10518_s26  ;;  %v4130_v25 = vadd.f32 %v4128_v39, %v4124_v42 }
 0x3e0   :  { %v3722_v6 = vmul.f32 %v9651_v57, %v10526_v52  ;;  %v10527_v31 = vmov %v10524_v30  ;;  %v10528_v53 = vmov %v10525_v43  ;;  %v10529_v48 = vmov %v10526_v52 }
 0x3e1   :  { %v3773_v9 = vmul.f32 %v10527_v31, %v9665_v63  ;;  %v4186_v62 = vmul.f32 %v10528_v53, %v9665_v63  ;;  %v3721_v37 = vmul.f32 %v10529_v48, %v9665_v63  ;;  %v10530_v28 = vstv %s10520_s28 }
 0x3e2   :  { %v4134_v10 = vmul.f32 %v10530_v28, %v9665_v63  ;;  %v3776_v16 = vadd.f32 %v3774_v47, %v3770_v8  ;;  %v4189_v39 = vadd.f32 %v4187_v4, %v4183_v0  ;;  %v10532_v42 = vmov %v10530_v28 }
 0x3e3   :  { %v4135_v18 = vmul.f32 %v9651_v57, %v10532_v42  ;;  %v3718_v30 = vadd.f32 %v3716_v20, %v3712_v45  ;;  %v3775_v43 = vadd.f32 %v3773_v9, %v3769_v3  ;;  %v4188_v52 = vadd.f32 %v4186_v62, %v4182_v7 }
 0x3e4   :  { %v3723_v31 = vadd.f32 %v3721_v37, %v3717_v22  ;;  %v4136_v53 = vadd.f32 %v4134_v10, %v4130_v25  ;;  %v4131_v28 = vadd.f32 %v4129_v36, %v4125_v60  ;;  %v3977_v29 = vadd.f32 %v3975_v27, %v9543_v40 }
 0x3e5   :  { %v3724_v48 = vadd.f32 %v3722_v6, %v3718_v30  ;;  %v10534_v13 = vstv %s10513_s15  ;;  %6048 = vmatprep.mubr.msk.f32.mxu1 %vm2979_vm1, %v3775_v43  ;;  %6081 = vmatprep.mubr.msk.f32.mxu0 %vm2979_vm1, %v4188_v52  ;;  %v10536_v20 = vstv %s10531_s30  ;;  %v10538_v40 = vstv %s10533_s24 }
 0x3e6   :  { %v3982_v8 = vmul.f32 %v9577_v15, %v10534_v13  ;;  %v3987_v0 = vmul.f32 %v10536_v20, %v9665_v63  ;;  %v10537_v3 = vmov %v10536_v20  ;;  %v4388_v22 = vmul.f32 %v10538_v40, %v9594_v34  ;;  %6049 = vmatmul.mubr.msk.f32.vlgmr.msra.gmra.mrb[26].mxu1 %vm2979_vm1, %v3776_v16  ;;  %6082 = vmatmul.mubr.msk.f32.vlgmr.msra.gmra.mrb[40].mxu0 %vm2979_vm1, %v4189_v39 }
 0x3e7   :  { %v3988_v7 = vmul.f32 %v9651_v57, %v10537_v3  ;;  %v4598_v36 = vstv %s9643_s3  ;;  %v4137_v13 = vadd.f32 %v4135_v18, %v4131_v28  ;;  %v3983_v45 = vadd.f32 %v3981_v54, %v3977_v29  ;;  %6510 = vmatpush3.bf16.msra.mxu1 %v8993_v11  ;;  %6059 = vmatprep.mubr.msk.f32.mxu1 %vm2979_vm1, %v3723_v31 }
 0x3e8   :  { %v10539_v60 = vmov %v10538_v40  ;;  %v4534_v47 = vstv %s9649_s27  ;;  %v4390_v4 = vadd.f32 %v4388_v22, %v9545_v19  ;;  %v10540_v6 = vstv %s10535_s5  ;;  %6534 = vmatpush3.bf16.msra.mxu0 %v8993_v11  ;;  %6092 = vmatprep.mubr.msk.f32.mxu0 %vm2979_vm1, %v4136_v53 }
 0x3e9   :  { %v4389_v27 = vmul.f32 %v9575_v2, %v10539_v60  ;;  %v4394_v25 = vmul.f32 %v10540_v6, %v9596_v24  ;;  %v10541_v9 = vmov %v10540_v6  ;;  %v4540_v29 = vstv %s9663_s29  ;;  %6512 = vmatprep.subr.bf16.mxu1 %v9166_v21  ;;  %6536 = vmatprep.subr.bf16.mxu0 %v9166_v21 }
 0x3ea   :  { %v4395_v62 = vmul.f32 %v9577_v15, %v10541_v9  ;;  %v3989_v54 = vadd.f32 %v3987_v0, %v3983_v45  ;;  %v4400_v19 = vmul.f32 %v4399_v17, %v9665_v63  ;;  %v4401_v37 = vmul.f32 %v9651_v57, %v4399_v17 }
 0x3eb   :  { %v4546_v10 = vstv %s9676_s8  ;;  %v4396_v16 = vadd.f32 %v4394_v25, %v4390_v4  ;;  %v3978_v39 = vadd.f32 %v3976_v35, %v9547_v59  ;;  %v4391_v42 = vadd.f32 %v4389_v27, %v9549_v1  ;;  %6514 = vmatpush3.bf16.msra.mxu1 %v9166_v21 }
 0x3ec   :  { %v4788_v18 = vstv %s9690_s7  ;;  %v10542_v30 = vstv %s9511_s14  ;;  %v10544_v31 = vstv %s9513_s6  ;;  %v4599_v0 = vmul.f32 %v4598_v36, %v9665_v63  ;;  %6538 = vmatpush3.bf16.msra.mxu0 %v9166_v21  ;;  %6516 = vmatprep.subr.bf16.mxu1 %v9181_v12  ;;  %s4074_s14 = sld [smem:[#allocation11]]  ;;  %s5186_s6 = sld [smem:[#allocation11 + $0x1]] }
 0x3ed   :  { %v4587_v43 = vmul.f32 %v10542_v30, %v9594_v34  ;;  %v10543_v52 = vmov %v10542_v30  ;;  %v4593_v53 = vmul.f32 %v10544_v31, %v9596_v24  ;;  %v10545_v28 = vmov %v10544_v31  ;;  %6540 = vmatprep.subr.bf16.mxu0 %v9181_v12 }
 0x3ee   :  { %v4588_v17 = vmul.f32 %v9575_v2, %v10543_v52  ;;  %v4594_v20 = vmul.f32 %v9577_v15, %v10545_v28  ;;  %v4402_v59 = vadd.f32 %v4400_v19, %v4396_v16  ;;  %v3984_v1 = vadd.f32 %v3982_v8, %v3978_v39  ;;  %6060 = vmatmul.mubr.msk.f32.vlgmr.msra.gmra.mrb[26].mxu1 %vm2979_vm1, %v3724_v48 }
 0x3ef   :  { %v4397_v35 = vadd.f32 %v4395_v62, %v4391_v42  ;;  %v4589_v3 = vadd.f32 %v4587_v43, %v9551_v14  ;;  %v4600_v40 = vmul.f32 %v9651_v57, %v4598_v36  ;;  %v4794_v45 = vstv %s9699_s0  ;;  %6518 = vmatpush3.bf16.msra.mxu1 %v9181_v12  ;;  %6093 = vmatmul.mubr.msk.f32.vlgmr.msra.gmra.mrb[40].mxu0 %vm2979_vm1, %v4137_v13 }
 0x3f0   :  { %v4590_v22 = vadd.f32 %v4588_v17, %v9553_v44  ;;  %v3990_v60 = vadd.f32 %v3988_v7, %v3984_v1  ;;  %v4535_v27 = vmul.f32 %v4534_v47, %v9594_v34  ;;  %v4789_v4 = vmul.f32 %v4788_v18, %v9430_v33  ;;  %6070 = vmatprep.mubr.msk.f32.mxu1 %vm2979_vm1, %v3989_v54 }
 0x3f1   :  { %v4403_v8 = vadd.f32 %v4401_v37, %v4397_v35  ;;  %v4595_v6 = vadd.f32 %v4593_v53, %v4589_v3  ;;  %v4536_v36 = vmul.f32 %v9575_v2, %v4534_v47  ;;  %v4541_v44 = vmul.f32 %v4540_v29, %v9596_v24  ;;  %6542 = vmatpush3.bf16.msra.mxu0 %v9181_v12 }
 0x3f2   :  { %v4596_v14 = vadd.f32 %v4594_v20, %v4590_v22  ;;  %v4537_v7 = vadd.f32 %v4535_v27, %v9555_v56  ;;  %v4542_v25 = vmul.f32 %v9577_v15, %v4540_v29  ;;  %v4547_v33 = vmul.f32 %v4546_v10, %v9665_v63  ;;  %6103 = vmatprep.mubr.msk.f32.mxu0 %vm2979_vm1, %v4402_v59 }
 0x3f3   :  { %v4601_v48 = vadd.f32 %v4599_v0, %v4595_v6  ;;  %v4532_v9 = vadd.f32 %v9571_v26, %v9573_v41  ;;  %v4800_v62 = vstv %s9738_s13  ;;  %6520 = vmatprep.subr.bf16.mxu1 %v9198_v55  ;;  %v4785_v13 = vadd.f32 %v9589_v5, %v9584_v61  ;;  %6544 = vmatprep.subr.bf16.mxu0 %v9198_v55 }
 0x3f4   :  { %v4602_v47 = vadd.f32 %v4600_v40, %v4596_v14  ;;  %v4543_v56 = vadd.f32 %v4541_v44, %v4537_v7  ;;  %v4795_v29 = vmul.f32 %v4794_v45, %v9483_v51  ;;  %v4548_v54 = vmul.f32 %v9651_v57, %v4546_v10  ;;  %6522 = vmatpush3.bf16.msra.mxu1 %v9198_v55 }
 0x3f5   :  { %v4538_v19 = vadd.f32 %v4536_v36, %v4532_v9  ;;  %v10546_v37 = vstv %s10485_s19  ;;  %v4806_v41 = vstv %s9757_s12  ;;  %v4791_v39 = vadd.f32 %v4789_v4, %v4785_v13  ;;  %6546 = vmatpush3.bf16.msra.mxu0 %v9198_v55  ;;  %6548 = vmatprep.subr.bf16.mxu1 %v8969_v23  ;;  %s4924_s19 = sshll.u32 %s6810_s18, 4  ;;  %s4925_s19 = int_to_ptr.vmem [resolvable:$true] %s4924_s19 }
 0x3f6   :  { %v4784_v26 = vmul.f32 %v9368_v49, %v10546_v37  ;;  %v4549_v16 = vadd.f32 %v4547_v33, %v4543_v56  ;;  %v4801_v42 = vmul.f32 %v4800_v62, %v9594_v34  ;;  %v4790_v61 = vmul.f32 %v9425_v46, %v4788_v18  ;;  %s6772_s17 = scalar_lea.vmem %s4925_s19, 768  ;;  %p6777_p3 = scmp.lt.s32.totalorder %s4925_s19, %s4925_s19 }
 0x3f7   :  { %v4544_v51 = vadd.f32 %v4542_v25, %v4538_v19  ;;  %v4812_v5 = vstv %s9767_s25  ;;  %v4780_v10 = vadd.f32 %v9582_v50, %v9592_v32  ;;  %v4797_v30 = vadd.f32 %v4795_v29, %v4791_v39  ;;  %6071 = vmatmul.mubr.msk.f32.vlgmr.msra.gmra.mrb[26].mxu1 %vm2979_vm1, %v3990_v60  ;;  %p6773_p2 = scmp.ne.s32.totalorder %s4925_s19, %s6772_s17  ;;  %p6778_p4 = scmp.lt.s32.totalorder %s6772_s17, %s6772_s17 }
 0x3f8   :  { %v4807_v49 = vmul.f32 %v4806_v41, %v9596_v24  ;;  %v4796_v52 = vmul.f32 %v9480_v38, %v4794_v45  ;;  %6104 = vmatmul.mubr.msk.f32.vlgmr.msra.gmra.mrb[40].mxu0 %vm2979_vm1, %v4403_v8  ;;  %6550 = vmatpush3.bf16.msra.mxu1 %v8969_v23  ;;  %v4813_v46 = vmul.f32 %v4812_v5, %v9665_v63  ;;  %v4901_v25 = vstv %s5220_s2 }
 0x3f9   :  { %v4550_v43 = vadd.f32 %v4548_v54, %v4544_v51  ;;  %v4786_v34 = vadd.f32 %v4784_v26, %v4780_v10  ;;  %v4803_v17 = vadd.f32 %v4801_v42, %v4797_v30  ;;  %6114 = vmatprep.mubr.msk.f32.mxu1 %vm2979_vm1, %v4601_v48  ;;  %6552 = vmatprep.subr.bf16.mxu1 %v8981_v58  ;;  %p6779_p5 = por %p6778_p4, %p6777_p3 }
 0x3fa   :  { %v4802_v50 = vmul.f32 %v9575_v2, %v4800_v62  ;;  %v4808_v18 = vmul.f32 %v9577_v15, %v4806_v41  ;;  %v4814_v23 = vmul.f32 %v9651_v57, %v4812_v5 }
 0x3fb   :  { %v4792_v32 = vadd.f32 %v4790_v61, %v4786_v34  ;;  %v4809_v24 = vadd.f32 %v4807_v49, %v4803_v17  ;;  %p6780_p6 = pnand %p6779_p5, %p6773_p2 }
 0x3fc   :  { %6554 = vmatpush3.bf16.msra.mxu1 %v8981_v58  ;;  %v4075_v58 = vstv %s4074_s14 }
 0x3fd   :  { %v4798_v31 = vadd.f32 %v4796_v52, %v4792_v32  ;;  %v4815_v38 = vadd.f32 %v4813_v46, %v4809_v24  ;;  %6556 = vmatprep.subr.bf16.mxu1 %v8993_v11 }
 0x3ff   :  { %v4804_v53 = vadd.f32 %v4802_v50, %v4798_v31  ;;  %6115 = vmatmul.mubr.msk.f32.vlgmr.msra.gmra.mrb[28].mxu1 %vm2979_vm1, %v4602_v47 }
 0x400   :  { %6558 = vmatpush3.bf16.msra.mxu1 %v8993_v11  ;;  %6125 = vmatprep.mubr.msk.f32.mxu1 %vm2979_vm1, %v4549_v16  ;;  %v4488_v11 = vstv %s5186_s6 }
 0x401   :  { %v4810_v63 = vadd.f32 %v4808_v18, %v4804_v53  ;;  %6560 = vmatprep.subr.bf16.mxu1 %v9166_v21 }
 0x403   :  { %v4816_v2 = vadd.f32 %v4814_v23, %v4810_v63 }
 0x404   :  { %6562 = vmatpush3.bf16.msra.mxu1 %v9166_v21 }
 0x405   :  { %6564 = vmatprep.subr.bf16.mxu1 %v9181_v12 }
 0x407   :  { %6126 = vmatmul.mubr.msk.f32.vlgmr.msra.gmra.mrb[28].mxu1 %vm2979_vm1, %v4550_v43 }
 0x408   :  { %6566 = vmatpush3.bf16.msra.mxu1 %v9181_v12  ;;  %6136 = vmatprep.mubr.msk.f32.mxu1 %vm2979_vm1, %v4815_v38 }
 0x409   :  { %6568 = vmatprep.subr.bf16.mxu1 %v9198_v55 }
 0x40c   :  { %6570 = vmatpush3.bf16.msra.mxu1 %v9198_v55 }
 0x40f   :  { %6137 = vmatmul.mubr.msk.f32.vlgmr.msra.gmra.mrb[28].mxu1 %vm2979_vm1, %v4816_v2 }
 0x4ca   :  { %v6072_v15 = vpop.f32.mrb[26].mxu1 }
 0x4cb   :  { %v4077_v21 = vadd.f32 %v6072_v15, %v4075_v58  ;;  %v6105_v57 = vpop.f32.mrb[40].mxu0  ;;  %v4063_v28 = vpop.f32.mrb[27].mxu1 }
 0x4cc   :  { %v4490_v20 = vadd.f32 %v6105_v57, %v4488_v11  ;;  %v4076_v59 = vadd.f32 %v4075_v58, %v4063_v28  ;;  %v4476_v1 = vpop.f32.mrb[41].mxu0 }
 0x4cd   :  { %v4079_v12 = vmul.f32 0.5, %v4077_v21  ;;  %v4489_v35 = vadd.f32 %v4488_v11, %v4476_v1 }
 0x4ce   :  { %v4492_v0 = vmul.f32 0.5, %v4490_v20  ;;  %v4078_v3 = vmul.f32 0.5, %v4076_v59 }
 0x4cf   :  { %6688 = vtanh.f32 %v4079_v12  ;;  %v4491_v40 = vmul.f32 0.5, %v4489_v35 }
 0x4d0   :  { %6690 = vtanh.f32 %v4492_v0 }
 0x4d1   :  { %6692 = vtanh.f32 %v4078_v3 }
 0x4d2   :  { %6694 = vtanh.f32 %v4491_v40 }
 0x4d9   :  { %v6689_v55 = vpop.eup %6688 }
 0x4da   :  { %v6691_v22 = vpop.eup %6690  ;;  %v4083_v45 = vmul.f32 0.5, %v6689_v55 }
 0x4db   :  { %v6693_v60 = vpop.eup %6692  ;;  %v4496_v8 = vmul.f32 0.5, %v6691_v22 }
 0x4dc   :  { %v6695_v27 = vpop.eup %6694  ;;  %v4085_v4 = vadd.f32 0.5, %v4083_v45  ;;  %v4082_v6 = vmul.f32 0.5, %v6693_v60 }
 0x4dd   :  { %v4498_v14 = vadd.f32 0.5, %v4496_v8  ;;  %v4495_v36 = vmul.f32 0.5, %v6695_v27 }
 0x4de   :  { %4914 = vst.msk [vmem:[#allocation13 + $0x8] sm:$0xff] %vm4912_vm2, %v4085_v4  ;;  %v4084_v44 = vadd.f32 0.5, %v4082_v6 }
 0x4df   :  { %4916 = vst.msk [vmem:[#allocation13 + $0x18] sm:$0xff] %vm4912_vm2, %v4498_v14  ;;  %v4497_v7 = vadd.f32 0.5, %v4495_v36 }
 0x4e0   :  { %4913 = vst.msk [vmem:[#allocation13] sm:$0xff] %vm4912_vm2, %v4084_v44 }
 0x4e1   :  { %4915 = vst.msk [vmem:[#allocation13 + $0x10] sm:$0xff] %vm4912_vm2, %v4497_v7 }
 0x4e2   :  { %v6138_v33 = vpop.f32.mrb[28].mxu1 }
 0x4e3   :  { %v4903_v48 = vadd.f32 %v6138_v33, %v4901_v25  ;;  %v4889_v47 = vpop.f32.mrb[29].mxu1 }
 0x4e4   :  { %v4902_v9 = vadd.f32 %v4901_v25, %v4889_v47 }
 0x4e5   :  { %v4905_v62 = vmul.f32 0.5, %v4903_v48 }
 0x4e6   :  { %v4904_v56 = vmul.f32 0.5, %v4902_v9 }
 0x4e7   :  { %6696 = vtanh.f32 %v4905_v62 }
 0x4e8   :  { %6698 = vtanh.f32 %v4904_v56 }
 0x4f1   :  { %v6697_v13 = vpop.eup %6696 }
 0x4f2   :  { %v6699_v29 = vpop.eup %6698  ;;  %v4909_v54 = vmul.f32 0.5, %v6697_v13 }
 0x4f3   :  { %v4908_v19 = vmul.f32 0.5, %v6699_v29 }
 0x4f4   :  { %v4911_v37 = vadd.f32 0.5, %v4909_v54 }
 0x4f5   :  { %v4910_v26 = vadd.f32 0.5, %v4908_v19 }
 0x4f6   :  { %4918 = vst.msk [vmem:[#allocation13 + $0x28] sm:$0xff] %vm4912_vm2, %v4911_v37 }
 0x4f7   :  { %4917 = vst.msk [vmem:[#allocation13 + $0x20] sm:$0xff] %vm4912_vm2, %v4910_v26 }
 0x4f8   :  { %6783 = shalt.err (!%p6780_p6)
}
 0x4f9   :  { %s10547_s21 = sld [smem:[#allocation147_spill]] }
 0x4ff   :  { %s6784_s22 = scalar_lea.hbm %s10547_s21, 768 }
 0x500   :  { %p6785_p7 = scmp.ne.s32.totalorder %s10547_s21, %s6784_s22  ;;  %p6788_p8 = scmp.lt.u32.totalorder %s6784_s22, %s10547_s21 }
 0x502   :  { %p6790_p9 = pnand %p6788_p8, %p6785_p7 }
 0x504   :  { %6793 = shalt.err (!%p6790_p9)
}
 0x505   :  { %s6811_s15 = smov 128   ;;  %s6812_s9 = smov 8  }
 0x506   :  { %4930 = dma.vmem_to_hbm [thread:$0]  %s4925_s19, 768, %s10547_s21, [#allocation3], %s6811_s15, %s6811_s15, %s6812_s9  }
 0x507   :  { %6802 = dma.done.wait [#allocation3], 768  }
 0x508   :  { %6803 = vsyncadd [#allocation3], 4294966528 }
 0x509   :  { %4934 = vsyncpa [#allocation3], 1 }
 0x50a   :  { %4935 = vsyncpa [#allocation4], 1 }
 0x50b   :  { %4936 = vsyncpa [#allocation6], 1 }
 0x50c   :  { %4937 = vsyncpa [#allocation9], 1 }
 0x50d   :  { %4938 = vsyncpa [#allocation12], 1 }

</bundles_post_ra>
